<compile_context>
chip_gen: v7x
topology: tpu7x:2x2x1
jax: 0.10.0
libtpu: 0.0.40
codegen_flags: <defaults>
</compile_context>

<pallas_src>
import functools

import jax
import jax.numpy as jnp
from jax.experimental import pallas as pl
from jax.experimental.pallas import tpu as pltpu

_VMEM = pl.BlockSpec(memory_space=pltpu.MemorySpace.VMEM)


# ----------------------------------------------------------------------------
# Pallas kernels
# ----------------------------------------------------------------------------
def _conv_block_kernel(p_ref, w_ref, b_ref, o_ref):
    # fused: conv (as matmul, BN scale pre-folded into w) + bias + LeakyReLU(0.2)
    z = jnp.dot(p_ref[...], w_ref[...], preferred_element_type=jnp.float32)
    z = z + b_ref[...]
    o_ref[...] = jnp.where(z >= 0.0, z, 0.2 * z).astype(o_ref.dtype)


def conv_block_matmul(patches, w, bias):
    """patches: [M, K] bf16, w: [K, OC] bf16, bias: [OC] f32 -> [M, OC] bf16."""
    M, K = patches.shape
    OC = w.shape[1]
    M_pad = ((M + 7) // 8) * 8            # 8-sublane alignment only
    if M_pad != M:
        patches = jnp.pad(patches, ((0, M_pad - M), (0, 0)))
    out = pl.pallas_call(
        _conv_block_kernel,
        out_shape=jax.ShapeDtypeStruct((M_pad, OC), jnp.bfloat16),
        in_specs=[_VMEM, _VMEM, _VMEM],
        out_specs=_VMEM,
    )(patches, w, bias.reshape(1, OC))
    return out[:M] if M_pad != M else out


def _head_kernel(x_ref, w1_ref, b1_ref, w2_ref, b2_ref, o_ref):
    # Conv2d(16,8,4) on a 4x4 map == matmul over the flattened (kh,kw,C) axis
    h = jnp.dot(x_ref[...], w1_ref[...],
                preferred_element_type=jnp.float32) + b1_ref[...]
    h = pl.reciprocal(1.0 + jnp.exp(-h), approx=True)    # Sigmoid (after Flatten), EUP
    o = jnp.dot(h, w2_ref[...],
                preferred_element_type=jnp.float32) + b2_ref[...]
    o_ref[...] = 1.0 / (1.0 + jnp.exp(-o))               # final Sigmoid (exact)


def head(x_flat, w1, b1, w2, b2):
    N = x_flat.shape[0]
    return pl.pallas_call(
        _head_kernel,
        out_shape=jax.ShapeDtypeStruct((N, 1), jnp.float32),
        in_specs=[_VMEM] * 5,
        out_specs=_VMEM,
    )(x_flat, w1, b1.reshape(1, -1), w2, b2.reshape(1, -1))


# ----------------------------------------------------------------------------
# JAX glue: im2col (NHWC), pooling, block wrapper
# ----------------------------------------------------------------------------
def im2col_nhwc(x, k, pad):
    """x: [N, H, W, C] -> patches [N*OH*OW, k*k*C], columns in (kh, kw, C) order."""
    N, H, W, C = x.shape
    if pad:                                   # pad/k are static Python ints
        x = jnp.pad(x, ((0, 0), (pad, pad), (pad, pad), (0, 0)))
    Hp, Wp = x.shape[1], x.shape[2]
    OH, OW = Hp - k + 1, Wp - k + 1
    cols = [x[:, i:i + OH, j:j + OW, :] for i in range(k) for j in range(k)]
    p = jnp.stack(cols, axis=3)               # [N, OH, OW, k*k, C]
    return p.reshape(N * OH * OW, k * k * C), OH, OW


def gan_conv_block(x, prm, k, pad):
    """Conv2d(k, padding) + eval-mode BatchNorm2d + LeakyReLU(0.2). NHWC in/out."""
    N, H, W, C = x.shape
    OC = prm['w'].shape[0]
    patches, OH, OW = im2col_nhwc(x, k, pad)
    inv = 1.0 / jnp.sqrt(prm['bn_var'] + 1e-5)
    scale = prm['bn_gamma'] * inv                                     # [OC]
    bias = (prm['b'] - prm['bn_mean']) * scale + prm['bn_beta']       # [OC]
    # fold BN scale into the weight matrix; rows in (kh, kw, IC) order to match patches
    wm = prm['w'].transpose(2, 3, 1, 0).reshape(k * k * C, OC) * scale[None, :]
    out = conv_block_matmul(patches.astype(jnp.bfloat16),
                            wm.astype(jnp.bfloat16), bias)            # [M, OC] bf16
    return out.reshape(N, OH, OW, OC)


def max_pool2(x):
    N, H, W, C = x.shape
    H2, W2 = H // 2, W // 2
    x = x[:, :H2 * 2, :W2 * 2, :].reshape(N, H2, 2, W2, 2, C)
    return x.max(axis=(2, 4))


def adaptive_max_pool(x, out_size=4):
    # matches torch.nn.AdaptiveMaxPool2d bin boundaries (floor/ceil convention)
    N, H, W, C = x.shape
    rows = []
    for i in range(out_size):
        hs = (i * H) // out_size
        he = ((i + 1) * H + out_size - 1) // out_size
        cols = []
        for j in range(out_size):
            ws = (j * W) // out_size
            we = ((j + 1) * W + out_size - 1) // out_size
            cols.append(x[:, hs:he, ws:we, :].max(axis=(1, 2)))       # [N, C]
        rows.append(jnp.stack(cols, axis=1))                          # [N, out, C]
    return jnp.stack(rows, axis=1)                                    # [N, out, out, C]


# ----------------------------------------------------------------------------
# Static structure + parameter init (deterministic, synthetic)
# ----------------------------------------------------------------------------
def block_cfg(hidden_channels=8):
    hidden = (hidden_channels // 2) * 2
    # (in_c, out_c, kernel, padding) for each GANConvBlock, in forward order
    return (
        (1, hidden, 5, 0),
        (hidden, hidden, 3, 1),
        (hidden, hidden, 3, 1),
        (hidden, 64, 3, 0),
        (64, 32, 3, 0),
        (32, 16, 3, 0),
    )


def init_params(key, cfg):
    params = {'blocks': []}
    for (ic, oc, k, pad) in cfg:
        key, k1, k2, k3, k4, k5, k6 = jax.random.split(key, 7)
        params['blocks'].append({
            'w': 0.1 * jax.random.normal(k1, (oc, ic, k, k), jnp.float32),
            'b': 0.1 * jax.random.normal(k2, (oc,), jnp.float32),
            'bn_gamma': jax.random.uniform(k3, (oc,), jnp.float32, 0.5, 1.5),
            'bn_beta': 0.1 * jax.random.normal(k4, (oc,), jnp.float32),
            'bn_mean': 0.1 * jax.random.normal(k5, (oc,), jnp.float32),
            'bn_var': jax.random.uniform(k6, (oc,), jnp.float32, 0.5, 1.5),
        })
    key, k1, k2, k3, k4 = jax.random.split(key, 5)
    params['head_conv_w'] = 0.1 * jax.random.normal(k1, (8, 16, 4, 4), jnp.float32)
    params['head_conv_b'] = 0.1 * jax.random.normal(k2, (8,), jnp.float32)
    params['lin_w'] = 0.1 * jax.random.normal(k3, (1, 8), jnp.float32)   # torch Linear: [out, in]
    params['lin_b'] = 0.1 * jax.random.normal(k4, (1,), jnp.float32)
    return params


# ----------------------------------------------------------------------------
# Forward pass (final_layer='linear')
# ----------------------------------------------------------------------------
@functools.partial(jax.jit, static_argnums=2)
def dis_forward(params, x, cfg):
    """x: [N, 1, H, W] (PyTorch NCHW)."""
    blks = params['blocks']
    x = x.transpose(0, 2, 3, 1)                            # NCHW -> NHWC, once
    x = gan_conv_block(x, blks[0], cfg[0][2], cfg[0][3])   # Conv(1->h,5,p0)+BN+LReLU
    # Dropout2d(p=0.2): identity in eval mode
    x = gan_conv_block(x, blks[1], cfg[1][2], cfg[1][3])   # Conv(h->h,3,p1)+BN+LReLU
    x = max_pool2(x)                                       # MaxPool2d(2)
    x = gan_conv_block(x, blks[2], cfg[2][2], cfg[2][3])   # Conv(h->h,3,p1)+BN+LReLU
    x = gan_conv_block(x, blks[3], cfg[3][2], cfg[3][3])   # Conv(h->64,3,p0)+BN+LReLU
    x = gan_conv_block(x, blks[4], cfg[4][2], cfg[4][3])   # Conv(64->32,3,p0)+BN+LReLU
    x = gan_conv_block(x, blks[5], cfg[5][2], cfg[5][3])   # Conv(32->16,3,p0)+BN+LReLU
    x = adaptive_max_pool(x, 4)                            # [N, 4, 4, 16]
    N = x.shape[0]
    x_flat = x.reshape(N, 4 * 4 * 16)                      # (H, W, C) flatten order
    # head conv weight in matching (kh, kw, IC) row order
    w1 = params['head_conv_w'].transpose(2, 3, 1, 0).reshape(4 * 4 * 16, 8)
    w2 = params['lin_w'].T                                 # [8, 1]
    return head(x_flat.astype(jnp.bfloat16), w1.astype(jnp.bfloat16),
                params['head_conv_b'], w2, params['lin_b'])


if __name__ == "__main__":
    key = jax.random.PRNGKey(0)
    key_x, key_p = jax.random.split(key)
    cfg = block_cfg(hidden_channels=8)
    params = init_params(key_p, cfg)
    # batch=2, 1-channel 28x28 images (the architecture needs H,W >= ~18)
    x = jax.random.normal(key_x, (2, 1, 28, 28), jnp.float32)

    out = dis_forward(params, x, cfg)
    out = jax.block_until_ready(out)

    assert out.shape == (2, 1), out.shape
    assert bool(jnp.all(jnp.isfinite(out)))
    assert bool(jnp.all((out >= 0.0) & (out <= 1.0)))   # sigmoid output
    print("KERNEL_OK")
</pallas_src>

<mosaic_0001>
module attributes {stable_mosaic.version = 11 : i64} {
  func.func @_conv_block_kernel(%arg0: memref<1152x25xbf16, #tpu.memory_space<vmem>>, %arg1: memref<25x8xbf16, #tpu.memory_space<vmem>>, %arg2: memref<1x8xf32, #tpu.memory_space<vmem>>, %arg3: memref<1152x8xbf16, #tpu.memory_space<vmem>>) attributes {dimension_semantics = [], scalar_prefetch = 0 : i64, scratch_operands = 0 : i64, tpu.core_type = #tpu.core_type<tc>} {
    %c0 = arith.constant 0 : index
    %c0_0 = arith.constant 0 : index
    %0 = vector.load %arg0[%c0, %c0_0] : memref<1152x25xbf16, #tpu.memory_space<vmem>>, vector<1152x25xbf16>
    %c0_1 = arith.constant 0 : index
    %c0_2 = arith.constant 0 : index
    %1 = vector.load %arg1[%c0_1, %c0_2] : memref<25x8xbf16, #tpu.memory_space<vmem>>, vector<25x8xbf16>
    %cst = arith.constant dense<0.000000e+00> : vector<1152x8xf32>
    %2 = tpu.matmul %0, %1, %cst {dimension_numbers = #tpu.dot_dimension_numbers<[1], [0], [0], [1], [0, 0, 1, 1], [], []>} : vector<1152x25xbf16>, vector<25x8xbf16>, vector<1152x8xf32> -> vector<1152x8xf32>
    %c0_3 = arith.constant 0 : index
    %c0_4 = arith.constant 0 : index
    %3 = vector.load %arg2[%c0_3, %c0_4] : memref<1x8xf32, #tpu.memory_space<vmem>>, vector<1x8xf32>
    %4 = vector.broadcast %3 : vector<1x8xf32> to vector<1152x8xf32>
    %5 = arith.addf %2, %4 : vector<1152x8xf32>
    %cst_5 = arith.constant 0.000000e+00 : f32
    %6 = vector.broadcast %cst_5 : f32 to vector<1152x8xf32>
    %7 = arith.cmpf oge, %5, %6 : vector<1152x8xf32>
    %cst_6 = arith.constant 2.000000e-01 : f32
    %8 = vector.broadcast %cst_6 : f32 to vector<1152x8xf32>
    %9 = arith.mulf %8, %5 : vector<1152x8xf32>
    %10 = arith.select %7, %5, %9 : vector<1152x8xi1>, vector<1152x8xf32>
    %11 = arith.truncf %10 : vector<1152x8xf32> to vector<1152x8xbf16>
    %c0_7 = arith.constant 0 : index
    %c0_8 = arith.constant 0 : index
    %12 = vector.load %arg3[%c0_7, %c0_8] : memref<1152x8xbf16, #tpu.memory_space<vmem>>, vector<1152x8xbf16>
    tpu.vector_store %arg3[%c0_7, %c0_8], %11 {strides = array<i32>} : memref<1152x8xbf16, #tpu.memory_space<vmem>>, vector<1152x8xbf16>,
    return
  }
}

module attributes {stable_mosaic.version = 11 : i64} {
  func.func @_conv_block_kernel(%arg0: memref<1152x72xbf16, #tpu.memory_space<vmem>>, %arg1: memref<72x8xbf16, #tpu.memory_space<vmem>>, %arg2: memref<1x8xf32, #tpu.memory_space<vmem>>, %arg3: memref<1152x8xbf16, #tpu.memory_space<vmem>>) attributes {dimension_semantics = [], scalar_prefetch = 0 : i64, scratch_operands = 0 : i64, tpu.core_type = #tpu.core_type<tc>} {
    %c0 = arith.constant 0 : index
    %c0_0 = arith.constant 0 : index
    %0 = vector.load %arg0[%c0, %c0_0] : memref<1152x72xbf16, #tpu.memory_space<vmem>>, vector<1152x72xbf16>
    %c0_1 = arith.constant 0 : index
    %c0_2 = arith.constant 0 : index
    %1 = vector.load %arg1[%c0_1, %c0_2] : memref<72x8xbf16, #tpu.memory_space<vmem>>, vector<72x8xbf16>
    %cst = arith.constant dense<0.000000e+00> : vector<1152x8xf32>
    %2 = tpu.matmul %0, %1, %cst {dimension_numbers = #tpu.dot_dimension_numbers<[1], [0], [0], [1], [0, 0, 1, 1], [], []>} : vector<1152x72xbf16>, vector<72x8xbf16>, vector<1152x8xf32> -> vector<1152x8xf32>
    %c0_3 = arith.constant 0 : index
    %c0_4 = arith.constant 0 : index
    %3 = vector.load %arg2[%c0_3, %c0_4] : memref<1x8xf32, #tpu.memory_space<vmem>>, vector<1x8xf32>
    %4 = vector.broadcast %3 : vector<1x8xf32> to vector<1152x8xf32>
    %5 = arith.addf %2, %4 : vector<1152x8xf32>
    %cst_5 = arith.constant 0.000000e+00 : f32
    %6 = vector.broadcast %cst_5 : f32 to vector<1152x8xf32>
    %7 = arith.cmpf oge, %5, %6 : vector<1152x8xf32>
    %cst_6 = arith.constant 2.000000e-01 : f32
    %8 = vector.broadcast %cst_6 : f32 to vector<1152x8xf32>
    %9 = arith.mulf %8, %5 : vector<1152x8xf32>
    %10 = arith.select %7, %5, %9 : vector<1152x8xi1>, vector<1152x8xf32>
    %11 = arith.truncf %10 : vector<1152x8xf32> to vector<1152x8xbf16>
    %c0_7 = arith.constant 0 : index
    %c0_8 = arith.constant 0 : index
    %12 = vector.load %arg3[%c0_7, %c0_8] : memref<1152x8xbf16, #tpu.memory_space<vmem>>, vector<1152x8xbf16>
    tpu.vector_store %arg3[%c0_7, %c0_8], %11 {strides = array<i32>} : memref<1152x8xbf16, #tpu.memory_space<vmem>>, vector<1152x8xbf16>,
    return
  }
}

module attributes {stable_mosaic.version = 11 : i64} {
  func.func @_conv_block_kernel(%arg0: memref<288x72xbf16, #tpu.memory_space<vmem>>, %arg1: memref<72x8xbf16, #tpu.memory_space<vmem>>, %arg2: memref<1x8xf32, #tpu.memory_space<vmem>>, %arg3: memref<288x8xbf16, #tpu.memory_space<vmem>>) attributes {dimension_semantics = [], scalar_prefetch = 0 : i64, scratch_operands = 0 : i64, tpu.core_type = #tpu.core_type<tc>} {
    %c0 = arith.constant 0 : index
    %c0_0 = arith.constant 0 : index
    %0 = vector.load %arg0[%c0, %c0_0] : memref<288x72xbf16, #tpu.memory_space<vmem>>, vector<288x72xbf16>
    %c0_1 = arith.constant 0 : index
    %c0_2 = arith.constant 0 : index
    %1 = vector.load %arg1[%c0_1, %c0_2] : memref<72x8xbf16, #tpu.memory_space<vmem>>, vector<72x8xbf16>
    %cst = arith.constant dense<0.000000e+00> : vector<288x8xf32>
    %2 = tpu.matmul %0, %1, %cst {dimension_numbers = #tpu.dot_dimension_numbers<[1], [0], [0], [1], [0, 0, 1, 1], [], []>} : vector<288x72xbf16>, vector<72x8xbf16>, vector<288x8xf32> -> vector<288x8xf32>
    %c0_3 = arith.constant 0 : index
    %c0_4 = arith.constant 0 : index
    %3 = vector.load %arg2[%c0_3, %c0_4] : memref<1x8xf32, #tpu.memory_space<vmem>>, vector<1x8xf32>
    %4 = vector.broadcast %3 : vector<1x8xf32> to vector<288x8xf32>
    %5 = arith.addf %2, %4 : vector<288x8xf32>
    %cst_5 = arith.constant 0.000000e+00 : f32
    %6 = vector.broadcast %cst_5 : f32 to vector<288x8xf32>
    %7 = arith.cmpf oge, %5, %6 : vector<288x8xf32>
    %cst_6 = arith.constant 2.000000e-01 : f32
    %8 = vector.broadcast %cst_6 : f32 to vector<288x8xf32>
    %9 = arith.mulf %8, %5 : vector<288x8xf32>
    %10 = arith.select %7, %5, %9 : vector<288x8xi1>, vector<288x8xf32>
    %11 = arith.truncf %10 : vector<288x8xf32> to vector<288x8xbf16>
    %c0_7 = arith.constant 0 : index
    %c0_8 = arith.constant 0 : index
    %12 = vector.load %arg3[%c0_7, %c0_8] : memref<288x8xbf16, #tpu.memory_space<vmem>>, vector<288x8xbf16>
    tpu.vector_store %arg3[%c0_7, %c0_8], %11 {strides = array<i32>} : memref<288x8xbf16, #tpu.memory_space<vmem>>, vector<288x8xbf16>,
    return
  }
}

module attributes {stable_mosaic.version = 11 : i64} {
  func.func @_conv_block_kernel(%arg0: memref<200x72xbf16, #tpu.memory_space<vmem>>, %arg1: memref<72x64xbf16, #tpu.memory_space<vmem>>, %arg2: memref<1x64xf32, #tpu.memory_space<vmem>>, %arg3: memref<200x64xbf16, #tpu.memory_space<vmem>>) attributes {dimension_semantics = [], scalar_prefetch = 0 : i64, scratch_operands = 0 : i64, tpu.core_type = #tpu.core_type<tc>} {
    %c0 = arith.constant 0 : index
    %c0_0 = arith.constant 0 : index
    %0 = vector.load %arg0[%c0, %c0_0] : memref<200x72xbf16, #tpu.memory_space<vmem>>, vector<200x72xbf16>
    %c0_1 = arith.constant 0 : index
    %c0_2 = arith.constant 0 : index
    %1 = vector.load %arg1[%c0_1, %c0_2] : memref<72x64xbf16, #tpu.memory_space<vmem>>, vector<72x64xbf16>
    %cst = arith.constant dense<0.000000e+00> : vector<200x64xf32>
    %2 = tpu.matmul %0, %1, %cst {dimension_numbers = #tpu.dot_dimension_numbers<[1], [0], [0], [1], [0, 0, 1, 1], [], []>} : vector<200x72xbf16>, vector<72x64xbf16>, vector<200x64xf32> -> vector<200x64xf32>
    %c0_3 = arith.constant 0 : index
    %c0_4 = arith.constant 0 : index
    %3 = vector.load %arg2[%c0_3, %c0_4] : memref<1x64xf32, #tpu.memory_space<vmem>>, vector<1x64xf32>
    %4 = vector.broadcast %3 : vector<1x64xf32> to vector<200x64xf32>
    %5 = arith.addf %2, %4 : vector<200x64xf32>
    %cst_5 = arith.constant 0.000000e+00 : f32
    %6 = vector.broadcast %cst_5 : f32 to vector<200x64xf32>
    %7 = arith.cmpf oge, %5, %6 : vector<200x64xf32>
    %cst_6 = arith.constant 2.000000e-01 : f32
    %8 = vector.broadcast %cst_6 : f32 to vector<200x64xf32>
    %9 = arith.mulf %8, %5 : vector<200x64xf32>
    %10 = arith.select %7, %5, %9 : vector<200x64xi1>, vector<200x64xf32>
    %11 = arith.truncf %10 : vector<200x64xf32> to vector<200x64xbf16>
    %c0_7 = arith.constant 0 : index
    %c0_8 = arith.constant 0 : index
    %12 = vector.load %arg3[%c0_7, %c0_8] : memref<200x64xbf16, #tpu.memory_space<vmem>>, vector<200x64xbf16>
    tpu.vector_store %arg3[%c0_7, %c0_8], %11 {strides = array<i32>} : memref<200x64xbf16, #tpu.memory_space<vmem>>, vector<200x64xbf16>,
    return
  }
}

module attributes {stable_mosaic.version = 11 : i64} {
  func.func @_conv_block_kernel(%arg0: memref<128x576xbf16, #tpu.memory_space<vmem>>, %arg1: memref<576x32xbf16, #tpu.memory_space<vmem>>, %arg2: memref<1x32xf32, #tpu.memory_space<vmem>>, %arg3: memref<128x32xbf16, #tpu.memory_space<vmem>>) attributes {dimension_semantics = [], scalar_prefetch = 0 : i64, scratch_operands = 0 : i64, tpu.core_type = #tpu.core_type<tc>} {
    %c0 = arith.constant 0 : index
    %c0_0 = arith.constant 0 : index
    %0 = vector.load %arg0[%c0, %c0_0] : memref<128x576xbf16, #tpu.memory_space<vmem>>, vector<128x576xbf16>
    %c0_1 = arith.constant 0 : index
    %c0_2 = arith.constant 0 : index
    %1 = vector.load %arg1[%c0_1, %c0_2] : memref<576x32xbf16, #tpu.memory_space<vmem>>, vector<576x32xbf16>
    %cst = arith.constant dense<0.000000e+00> : vector<128x32xf32>
    %2 = tpu.matmul %0, %1, %cst {dimension_numbers = #tpu.dot_dimension_numbers<[1], [0], [0], [1], [0, 0, 1, 1], [], []>} : vector<128x576xbf16>, vector<576x32xbf16>, vector<128x32xf32> -> vector<128x32xf32>
    %c0_3 = arith.constant 0 : index
    %c0_4 = arith.constant 0 : index
    %3 = vector.load %arg2[%c0_3, %c0_4] : memref<1x32xf32, #tpu.memory_space<vmem>>, vector<1x32xf32>
    %4 = vector.broadcast %3 : vector<1x32xf32> to vector<128x32xf32>
    %5 = arith.addf %2, %4 : vector<128x32xf32>
    %cst_5 = arith.constant 0.000000e+00 : f32
    %6 = vector.broadcast %cst_5 : f32 to vector<128x32xf32>
    %7 = arith.cmpf oge, %5, %6 : vector<128x32xf32>
    %cst_6 = arith.constant 2.000000e-01 : f32
    %8 = vector.broadcast %cst_6 : f32 to vector<128x32xf32>
    %9 = arith.mulf %8, %5 : vector<128x32xf32>
    %10 = arith.select %7, %5, %9 : vector<128x32xi1>, vector<128x32xf32>
    %11 = arith.truncf %10 : vector<128x32xf32> to vector<128x32xbf16>
    %c0_7 = arith.constant 0 : index
    %c0_8 = arith.constant 0 : index
    %12 = vector.load %arg3[%c0_7, %c0_8] : memref<128x32xbf16, #tpu.memory_space<vmem>>, vector<128x32xbf16>
    tpu.vector_store %arg3[%c0_7, %c0_8], %11 {strides = array<i32>} : memref<128x32xbf16, #tpu.memory_space<vmem>>, vector<128x32xbf16>,
    return
  }
}

module attributes {stable_mosaic.version = 11 : i64} {
  func.func @_conv_block_kernel(%arg0: memref<72x288xbf16, #tpu.memory_space<vmem>>, %arg1: memref<288x16xbf16, #tpu.memory_space<vmem>>, %arg2: memref<1x16xf32, #tpu.memory_space<vmem>>, %arg3: memref<72x16xbf16, #tpu.memory_space<vmem>>) attributes {dimension_semantics = [], scalar_prefetch = 0 : i64, scratch_operands = 0 : i64, tpu.core_type = #tpu.core_type<tc>} {
    %c0 = arith.constant 0 : index
    %c0_0 = arith.constant 0 : index
    %0 = vector.load %arg0[%c0, %c0_0] : memref<72x288xbf16, #tpu.memory_space<vmem>>, vector<72x288xbf16>
    %c0_1 = arith.constant 0 : index
    %c0_2 = arith.constant 0 : index
    %1 = vector.load %arg1[%c0_1, %c0_2] : memref<288x16xbf16, #tpu.memory_space<vmem>>, vector<288x16xbf16>
    %cst = arith.constant dense<0.000000e+00> : vector<72x16xf32>
    %2 = tpu.matmul %0, %1, %cst {dimension_numbers = #tpu.dot_dimension_numbers<[1], [0], [0], [1], [0, 0, 1, 1], [], []>} : vector<72x288xbf16>, vector<288x16xbf16>, vector<72x16xf32> -> vector<72x16xf32>
    %c0_3 = arith.constant 0 : index
    %c0_4 = arith.constant 0 : index
    %3 = vector.load %arg2[%c0_3, %c0_4] : memref<1x16xf32, #tpu.memory_space<vmem>>, vector<1x16xf32>
    %4 = vector.broadcast %3 : vector<1x16xf32> to vector<72x16xf32>
    %5 = arith.addf %2, %4 : vector<72x16xf32>
    %cst_5 = arith.constant 0.000000e+00 : f32
    %6 = vector.broadcast %cst_5 : f32 to vector<72x16xf32>
    %7 = arith.cmpf oge, %5, %6 : vector<72x16xf32>
    %cst_6 = arith.constant 2.000000e-01 : f32
    %8 = vector.broadcast %cst_6 : f32 to vector<72x16xf32>
    %9 = arith.mulf %8, %5 : vector<72x16xf32>
    %10 = arith.select %7, %5, %9 : vector<72x16xi1>, vector<72x16xf32>
    %11 = arith.truncf %10 : vector<72x16xf32> to vector<72x16xbf16>
    %c0_7 = arith.constant 0 : index
    %c0_8 = arith.constant 0 : index
    %12 = vector.load %arg3[%c0_7, %c0_8] : memref<72x16xbf16, #tpu.memory_space<vmem>>, vector<72x16xbf16>
    tpu.vector_store %arg3[%c0_7, %c0_8], %11 {strides = array<i32>} : memref<72x16xbf16, #tpu.memory_space<vmem>>, vector<72x16xbf16>,
    return
  }
}

module attributes {stable_mosaic.version = 11 : i64} {
  func.func @_head_kernel(%arg0: memref<2x256xbf16, #tpu.memory_space<vmem>>, %arg1: memref<256x8xbf16, #tpu.memory_space<vmem>>, %arg2: memref<1x8xf32, #tpu.memory_space<vmem>>, %arg3: memref<8x1xf32, #tpu.memory_space<vmem>>, %arg4: memref<1x1xf32, #tpu.memory_space<vmem>>, %arg5: memref<2x1xf32, #tpu.memory_space<vmem>>) attributes {dimension_semantics = [], scalar_prefetch = 0 : i64, scratch_operands = 0 : i64, tpu.core_type = #tpu.core_type<tc>} {
    %c0 = arith.constant 0 : index
    %c0_0 = arith.constant 0 : index
    %0 = vector.load %arg0[%c0, %c0_0] : memref<2x256xbf16, #tpu.memory_space<vmem>>, vector<2x256xbf16>
    %c0_1 = arith.constant 0 : index
    %c0_2 = arith.constant 0 : index
    %1 = vector.load %arg1[%c0_1, %c0_2] : memref<256x8xbf16, #tpu.memory_space<vmem>>, vector<256x8xbf16>
    %cst = arith.constant dense<0.000000e+00> : vector<2x8xf32>
    %2 = tpu.matmul %0, %1, %cst {dimension_numbers = #tpu.dot_dimension_numbers<[1], [0], [0], [1], [0, 0, 1, 1], [], []>} : vector<2x256xbf16>, vector<256x8xbf16>, vector<2x8xf32> -> vector<2x8xf32>
    %c0_3 = arith.constant 0 : index
    %c0_4 = arith.constant 0 : index
    %3 = vector.load %arg2[%c0_3, %c0_4] : memref<1x8xf32, #tpu.memory_space<vmem>>, vector<1x8xf32>
    %4 = vector.broadcast %3 : vector<1x8xf32> to vector<2x8xf32>
    %5 = arith.addf %2, %4 : vector<2x8xf32>
    %cst_5 = arith.constant 0.000000e+00 : f32
    %6 = vector.broadcast %cst_5 : f32 to vector<2x8xf32>
    %7 = arith.subf %6, %5 : vector<2x8xf32>
    %8 = math.exp %7 : vector<2x8xf32>
    %cst_6 = arith.constant 1.000000e+00 : f32
    %9 = vector.broadcast %cst_6 : f32 to vector<2x8xf32>
    %10 = arith.addf %9, %8 : vector<2x8xf32>
    %11 = tpu.reciprocal %10 {approx = true} : vector<2x8xf32> -> vector<2x8xf32>
    %c0_7 = arith.constant 0 : index
    %c0_8 = arith.constant 0 : index
    %12 = vector.load %arg3[%c0_7, %c0_8] : memref<8x1xf32, #tpu.memory_space<vmem>>, vector<8x1xf32>
    %cst_9 = arith.constant dense<0.000000e+00> : vector<2x1xf32>
    %13 = tpu.matmul %11, %12, %cst_9 {dimension_numbers = #tpu.dot_dimension_numbers<[1], [0], [0], [1], [0, 0, 1, 1], [], []>} : vector<2x8xf32>, vector<8x1xf32>, vector<2x1xf32> -> vector<2x1xf32>
    %c0_10 = arith.constant 0 : index
    %c0_11 = arith.constant 0 : index
    %14 = vector.load %arg4[%c0_10, %c0_11] : memref<1x1xf32, #tpu.memory_space<vmem>>, vector<1x1xf32>
    %15 = vector.broadcast %14 : vector<1x1xf32> to vector<2x1xf32>
    %16 = arith.addf %13, %15 : vector<2x1xf32>
    %cst_12 = arith.constant 0.000000e+00 : f32
    %17 = vector.broadcast %cst_12 : f32 to vector<2x1xf32>
    %18 = arith.subf %17, %16 : vector<2x1xf32>
    %19 = math.exp %18 : vector<2x1xf32>
    %cst_13 = arith.constant 1.000000e+00 : f32
    %20 = vector.broadcast %cst_13 : f32 to vector<2x1xf32>
    %21 = arith.addf %20, %19 : vector<2x1xf32>
    %cst_14 = arith.constant 1.000000e+00 : f32
    %22 = vector.broadcast %cst_14 : f32 to vector<2x1xf32>
    %23 = arith.divf %22, %21 : vector<2x1xf32>
    %c0_15 = arith.constant 0 : index
    %c0_16 = arith.constant 0 : index
    %24 = vector.load %arg5[%c0_15, %c0_16] : memref<2x1xf32, #tpu.memory_space<vmem>>, vector<2x1xf32>
    tpu.vector_store %arg5[%c0_15, %c0_16], %23 {strides = array<i32>} : memref<2x1xf32, #tpu.memory_space<vmem>>, vector<2x1xf32>,
    return
  }
}

</mosaic_0001>

<bundles_post_ra>
// kernel: dis_forward.7
= control target key start
LH: loop header
LB: loop body
LE: loop exit
PB: predicated region body
PF: predicated region fallthrough
CT: control target
= control target key end

     0   :  { %vm758_vm0 = vcmask 1043456   ;;  %vm759_vm1 = vcmask 1044480   ;;  %vm541_vm2 = vcmask 203776   ;;  %v3268_v1 = vmov 65535   ;;  %s4637_s1 = inlined_call_operand.vmem [shape: bf16[25,8], index: 1, kind: input, shape index: {}]   ;;  %s4638_s0 = inlined_call_operand.vmem [shape: bf16[1152,25], index: 0, kind: input, shape index: {}]   ;;  %s4639_s2 = inlined_call_operand.vmem [shape: f32[1,8], index: 2, kind: input, shape index: {}]   ;;  %s4640_s3 = inlined_call_operand.vmem [shape: bf16[1152,8], index: 3, kind: output, shape index: {}]  }
   0x1   :  { %v3193_v0 = vld [vmem:[%s4637_s1] sm:$0xff]   ;;  %v760_v2 = vsel %vm758_vm0, 4294967295, %v3268_v1  ;;  %v3194_v3 = vld [vmem:[%s4637_s1 + $0x8] sm:$0x1f]   ;;  %v3199_v10 = vld [vmem:[%s4638_s0 + $0x10] sm:$0xff]   ;;  %vm2382_vm3 = vcmask 60416  }
   0x2   :  { %3040 = vmatprep.subr.bf16.mxu0 %v3193_v0  ;;  %3188 = vmatprep.subr.bf16.mxu1 %v3193_v0  ;;  %v761_v4 = vsel %vm759_vm1, %v760_v2, 0  ;;  %v3195_v5 = vld [vmem:[%s4638_s0] sm:$0xff]   ;;  %v3197_v8 = vld [vmem:[%s4638_s0 + $0x8] sm:$0xff]   ;;  %v3200_v11 = vld [vmem:[%s4638_s0 + $0x130] sm:$0xff]  }
   0x3   :  { %3041 = vmatpush3.bf16.msra.mxu0 %v3193_v0  ;;  %3190 = vmatpush3.bf16.msra.mxu1 %v3193_v0  ;;  %v763_v6 = vand.u32 %v3194_v3, %v761_v4  ;;  %v3196_v7 = vld [vmem:[%s4638_s0 + $0x120] sm:$0xff]   ;;  %v3198_v9 = vld [vmem:[%s4638_s0 + $0x128] sm:$0xff]   ;;  %v3201_v12 = vld [vmem:[%s4638_s0 + $0x18] sm:$0xff]  }
   0x4   :  { %3044 = vmatprep.mubr.msk.bf16.mxu0 %vm541_vm2, %v3195_v5  ;;  %3116 = vmatprep.mubr.msk.bf16.mxu1 %vm541_vm2, %v3196_v7  ;;  %v3202_v13 = vld [vmem:[%s4638_s0 + $0x138] sm:$0xff]   ;;  %v3203_v14 = vld [vmem:[%s4638_s0 + $0x20] sm:$0xff]   ;;  %v3205_v16 = vld [vmem:[%s4638_s0 + $0x28] sm:$0xff]  }
   0x5   :  { %3042 = vmatprep.subr.bf16.mxu0 %v763_v6  ;;  %3189 = vmatprep.subr.bf16.mxu1 %v763_v6  ;;  %v3204_v15 = vld [vmem:[%s4638_s0 + $0x140] sm:$0xff]   ;;  %v3206_v17 = vld [vmem:[%s4638_s0 + $0x148] sm:$0xff]   ;;  %v3207_v18 = vld [vmem:[%s4638_s0 + $0x30] sm:$0xff]  }
   0x6   :  { %v3208_v19 = vld [vmem:[%s4638_s0 + $0x150] sm:$0xff]   ;;  %v3209_v20 = vld [vmem:[%s4638_s0 + $0x38] sm:$0xff]   ;;  %v3211_v22 = vld [vmem:[%s4638_s0 + $0x40] sm:$0xff]  }
   0x7   :  { %3043 = vmatpush3.bf16.msra.mxu0 %v763_v6  ;;  %3191 = vmatpush3.bf16.msra.mxu1 %v763_v6  ;;  %v3210_v21 = vld [vmem:[%s4638_s0 + $0x158] sm:$0xff]   ;;  %v3212_v23 = vld [vmem:[%s4638_s0 + $0x160] sm:$0xff]   ;;  %v3213_v24 = vld [vmem:[%s4638_s0 + $0x48] sm:$0xff]  }
   0x8   :  { %v3214_v25 = vld [vmem:[%s4638_s0 + $0x168] sm:$0xff]   ;;  %v3215_v26 = vld [vmem:[%s4638_s0 + $0x50] sm:$0xff]   ;;  %v3217_v28 = vld [vmem:[%s4638_s0 + $0x58] sm:$0xff]  }
   0x9   :  { %v3216_v27 = vld [vmem:[%s4638_s0 + $0x170] sm:$0xff]   ;;  %v3218_v29 = vld [vmem:[%s4638_s0 + $0x178] sm:$0xff]   ;;  %v3219_v30 = vld [vmem:[%s4638_s0 + $0x60] sm:$0xff]  }
   0xa   :  { %3045 = vmatmul.mubr.msk.bf16.vlgmr.msra.gmra.mrb[0].mxu0 %vm541_vm2, %v3197_v8  ;;  %3117 = vmatmul.mubr.msk.bf16.vlgmr.msra.gmra.mrb[0].mxu1 %vm541_vm2, %v3198_v9  ;;  %v3220_v31 = vld [vmem:[%s4638_s0 + $0x180] sm:$0xff]   ;;  %v3221_v32 = vld [vmem:[%s4638_s0 + $0x68] sm:$0xff]   ;;  %v3223_v34 = vld [vmem:[%s4638_s0 + $0x70] sm:$0xff]  }
   0xb   :  { %3048 = vmatprep.mubr.msk.bf16.mxu0 %vm541_vm2, %v3199_v10  ;;  %3120 = vmatprep.mubr.msk.bf16.mxu1 %vm541_vm2, %v3200_v11  ;;  %v3222_v33 = vld [vmem:[%s4638_s0 + $0x188] sm:$0xff]   ;;  %v3224_v35 = vld [vmem:[%s4638_s0 + $0x190] sm:$0xff]   ;;  %v3225_v36 = vld [vmem:[%s4638_s0 + $0x78] sm:$0xff]  }
   0xc   :  { %v3226_v37 = vld [vmem:[%s4638_s0 + $0x198] sm:$0xff]   ;;  %v3227_v38 = vld [vmem:[%s4638_s0 + $0x80] sm:$0xff]   ;;  %v3229_v40 = vld [vmem:[%s4638_s0 + $0x88] sm:$0xff]  }
   0xd   :  { %v3228_v39 = vld [vmem:[%s4638_s0 + $0x1a0] sm:$0xff]   ;;  %v3230_v41 = vld [vmem:[%s4638_s0 + $0x1a8] sm:$0xff]   ;;  %v3231_v42 = vld [vmem:[%s4638_s0 + $0x90] sm:$0xff]  }
   0xe   :  { %v3232_v43 = vld [vmem:[%s4638_s0 + $0x1b0] sm:$0xff]   ;;  %v3233_v44 = vld [vmem:[%s4638_s0 + $0x98] sm:$0xff]   ;;  %v3235_v46 = vld [vmem:[%s4638_s0 + $0xa0] sm:$0xff]  }
   0xf   :  { %v3234_v45 = vld [vmem:[%s4638_s0 + $0x1b8] sm:$0xff]   ;;  %v3236_v47 = vld [vmem:[%s4638_s0 + $0x1c0] sm:$0xff]   ;;  %v3237_v48 = vld [vmem:[%s4638_s0 + $0xa8] sm:$0xff]  }
  0x10   :  { %v3238_v49 = vld [vmem:[%s4638_s0 + $0x1c8] sm:$0xff]   ;;  %v3239_v50 = vld [vmem:[%s4638_s0 + $0xb0] sm:$0xff]   ;;  %v3241_v52 = vld [vmem:[%s4638_s0 + $0xb8] sm:$0xff]  }
  0x11   :  { %v3240_v51 = vld [vmem:[%s4638_s0 + $0x1d0] sm:$0xff]   ;;  %v3242_v53 = vld [vmem:[%s4638_s0 + $0x1d8] sm:$0xff]   ;;  %v3243_v54 = vld [vmem:[%s4638_s0 + $0xc0] sm:$0xff]  }
  0x12   :  { %3049 = vmatmul.mubr.msk.bf16.gmra.mrb[4].mxu0 %vm541_vm2, %v3201_v12  ;;  %3121 = vmatmul.mubr.msk.bf16.gmra.mrb[4].mxu1 %vm541_vm2, %v3202_v13  ;;  %v3244_v55 = vld [vmem:[%s4638_s0 + $0x1e0] sm:$0xff]   ;;  %v3245_v56 = vld [vmem:[%s4638_s0 + $0xc8] sm:$0xff]   ;;  %v3247_v58 = vld [vmem:[%s4638_s0 + $0xd0] sm:$0xff]  }
  0x13   :  { %3052 = vmatprep.mubr.msk.bf16.mxu0 %vm541_vm2, %v3203_v14  ;;  %3124 = vmatprep.mubr.msk.bf16.mxu1 %vm541_vm2, %v3204_v15  ;;  %v3246_v57 = vld [vmem:[%s4638_s0 + $0x1e8] sm:$0xff]   ;;  %v3248_v59 = vld [vmem:[%s4638_s0 + $0x1f0] sm:$0xff]   ;;  %v3249_v60 = vld [vmem:[%s4638_s0 + $0xd8] sm:$0xff]  }
  0x14   :  { %v3250_v61 = vld [vmem:[%s4638_s0 + $0x1f8] sm:$0xff]   ;;  %v3251_v62 = vld [vmem:[%s4638_s0 + $0xe0] sm:$0xff]   ;;  %v3253_v0 = vld [vmem:[%s4638_s0 + $0xe8] sm:$0xff]  }
  0x15   :  { %v3252_v63 = vld [vmem:[%s4638_s0 + $0x200] sm:$0xff]   ;;  %v3254_v1 = vld [vmem:[%s4638_s0 + $0x208] sm:$0xff]   ;;  %v3255_v2 = vld [vmem:[%s4638_s0 + $0xf0] sm:$0xff]  }
  0x16   :  { %v3256_v3 = vld [vmem:[%s4638_s0 + $0x210] sm:$0xff]   ;;  %v3257_v4 = vld [vmem:[%s4638_s0 + $0xf8] sm:$0xff]   ;;  %v3259_v6 = vld [vmem:[%s4638_s0 + $0x100] sm:$0xff]  }
  0x17   :  { %v3258_v5 = vld [vmem:[%s4638_s0 + $0x218] sm:$0xff]   ;;  %v3260_v7 = vld [vmem:[%s4638_s0 + $0x220] sm:$0xff]   ;;  %v3261_v8 = vld [vmem:[%s4638_s0 + $0x108] sm:$0xff]  }
  0x18   :  { %v3262_v9 = vld [vmem:[%s4638_s0 + $0x228] sm:$0xff]   ;;  %v3263_v10 = vld [vmem:[%s4638_s0 + $0x110] sm:$0xff]   ;;  %v3265_v12 = vld [vmem:[%s4638_s0 + $0x118] sm:$0xff]  }
  0x19   :  { %v3264_v11 = vld [vmem:[%s4638_s0 + $0x230] sm:$0xff]   ;;  %v3266_v13 = vld [vmem:[%s4638_s0 + $0x238] sm:$0xff]   ;;  %v3586_v14 = vld [vmem:[%s4639_s2] ss:$0 sm:$0xff] }
  0x1a   :  { %3053 = vmatmul.mubr.msk.bf16.gmra.mrb[8].mxu0 %vm541_vm2, %v3205_v16  ;;  %3125 = vmatmul.mubr.msk.bf16.gmra.mrb[8].mxu1 %vm541_vm2, %v3206_v17 }
  0x1b   :  { %3056 = vmatprep.mubr.msk.bf16.mxu0 %vm541_vm2, %v3207_v18  ;;  %3128 = vmatprep.mubr.msk.bf16.mxu1 %vm541_vm2, %v3208_v19 }
  0x22   :  { %3057 = vmatmul.mubr.msk.bf16.gmra.mrb[12].mxu0 %vm541_vm2, %v3209_v20  ;;  %3129 = vmatmul.mubr.msk.bf16.gmra.mrb[12].mxu1 %vm541_vm2, %v3210_v21 }
  0x23   :  { %3060 = vmatprep.mubr.msk.bf16.mxu0 %vm541_vm2, %v3211_v22  ;;  %3132 = vmatprep.mubr.msk.bf16.mxu1 %vm541_vm2, %v3212_v23 }
  0x2a   :  { %3061 = vmatmul.mubr.msk.bf16.gmra.mrb[16].mxu0 %vm541_vm2, %v3213_v24  ;;  %3133 = vmatmul.mubr.msk.bf16.gmra.mrb[16].mxu1 %vm541_vm2, %v3214_v25 }
  0x2b   :  { %3064 = vmatprep.mubr.msk.bf16.mxu0 %vm541_vm2, %v3215_v26  ;;  %3136 = vmatprep.mubr.msk.bf16.mxu1 %vm541_vm2, %v3216_v27 }
  0x32   :  { %3065 = vmatmul.mubr.msk.bf16.gmra.mrb[20].mxu0 %vm541_vm2, %v3217_v28  ;;  %3137 = vmatmul.mubr.msk.bf16.gmra.mrb[20].mxu1 %vm541_vm2, %v3218_v29 }
  0x33   :  { %3068 = vmatprep.mubr.msk.bf16.mxu0 %vm541_vm2, %v3219_v30  ;;  %3140 = vmatprep.mubr.msk.bf16.mxu1 %vm541_vm2, %v3220_v31 }
  0x3a   :  { %3069 = vmatmul.mubr.msk.bf16.gmra.mrb[24].mxu0 %vm541_vm2, %v3221_v32  ;;  %3141 = vmatmul.mubr.msk.bf16.gmra.mrb[24].mxu1 %vm541_vm2, %v3222_v33 }
  0x3b   :  { %3072 = vmatprep.mubr.msk.bf16.mxu0 %vm541_vm2, %v3223_v34  ;;  %3144 = vmatprep.mubr.msk.bf16.mxu1 %vm541_vm2, %v3224_v35 }
  0x42   :  { %3073 = vmatmul.mubr.msk.bf16.gmra.mrb[28].mxu0 %vm541_vm2, %v3225_v36  ;;  %3145 = vmatmul.mubr.msk.bf16.gmra.mrb[28].mxu1 %vm541_vm2, %v3226_v37 }
  0x43   :  { %3076 = vmatprep.mubr.msk.bf16.mxu0 %vm541_vm2, %v3227_v38  ;;  %3148 = vmatprep.mubr.msk.bf16.mxu1 %vm541_vm2, %v3228_v39 }
  0x4a   :  { %3077 = vmatmul.mubr.msk.bf16.gmra.mrb[32].mxu0 %vm541_vm2, %v3229_v40  ;;  %3149 = vmatmul.mubr.msk.bf16.gmra.mrb[32].mxu1 %vm541_vm2, %v3230_v41 }
  0x4b   :  { %3080 = vmatprep.mubr.msk.bf16.mxu0 %vm541_vm2, %v3231_v42  ;;  %3152 = vmatprep.mubr.msk.bf16.mxu1 %vm541_vm2, %v3232_v43 }
  0x52   :  { %3081 = vmatmul.mubr.msk.bf16.gmra.mrb[36].mxu0 %vm541_vm2, %v3233_v44  ;;  %3153 = vmatmul.mubr.msk.bf16.gmra.mrb[36].mxu1 %vm541_vm2, %v3234_v45 }
  0x53   :  { %3084 = vmatprep.mubr.msk.bf16.mxu0 %vm541_vm2, %v3235_v46  ;;  %3156 = vmatprep.mubr.msk.bf16.mxu1 %vm541_vm2, %v3236_v47 }
  0x5a   :  { %3085 = vmatmul.mubr.msk.bf16.gmra.mrb[40].mxu0 %vm541_vm2, %v3237_v48  ;;  %3157 = vmatmul.mubr.msk.bf16.gmra.mrb[40].mxu1 %vm541_vm2, %v3238_v49 }
  0x5b   :  { %3088 = vmatprep.mubr.msk.bf16.mxu0 %vm541_vm2, %v3239_v50  ;;  %3160 = vmatprep.mubr.msk.bf16.mxu1 %vm541_vm2, %v3240_v51 }
  0x62   :  { %3089 = vmatmul.mubr.msk.bf16.gmra.mrb[44].mxu0 %vm541_vm2, %v3241_v52  ;;  %3161 = vmatmul.mubr.msk.bf16.gmra.mrb[44].mxu1 %vm541_vm2, %v3242_v53 }
  0x63   :  { %3092 = vmatprep.mubr.msk.bf16.mxu0 %vm541_vm2, %v3243_v54  ;;  %3164 = vmatprep.mubr.msk.bf16.mxu1 %vm541_vm2, %v3244_v55 }
  0x6a   :  { %3093 = vmatmul.mubr.msk.bf16.gmra.mrb[48].mxu0 %vm541_vm2, %v3245_v56  ;;  %3165 = vmatmul.mubr.msk.bf16.gmra.mrb[48].mxu1 %vm541_vm2, %v3246_v57 }
  0x6b   :  { %3096 = vmatprep.mubr.msk.bf16.mxu0 %vm541_vm2, %v3247_v58  ;;  %3168 = vmatprep.mubr.msk.bf16.mxu1 %vm541_vm2, %v3248_v59 }
  0x72   :  { %3097 = vmatmul.mubr.msk.bf16.gmra.mrb[52].mxu0 %vm541_vm2, %v3249_v60  ;;  %3169 = vmatmul.mubr.msk.bf16.gmra.mrb[52].mxu1 %vm541_vm2, %v3250_v61 }
  0x73   :  { %3100 = vmatprep.mubr.msk.bf16.mxu0 %vm541_vm2, %v3251_v62  ;;  %3172 = vmatprep.mubr.msk.bf16.mxu1 %vm541_vm2, %v3252_v63 }
  0x7a   :  { %3101 = vmatmul.mubr.msk.bf16.gmra.mrb[56].mxu0 %vm541_vm2, %v3253_v0  ;;  %3173 = vmatmul.mubr.msk.bf16.gmra.mrb[56].mxu1 %vm541_vm2, %v3254_v1 }
  0x7b   :  { %3104 = vmatprep.mubr.msk.bf16.mxu0 %vm541_vm2, %v3255_v2  ;;  %3176 = vmatprep.mubr.msk.bf16.mxu1 %vm541_vm2, %v3256_v3 }
  0x82   :  { %3105 = vmatmul.mubr.msk.bf16.gmra.mrb[60].mxu0 %vm541_vm2, %v3257_v4  ;;  %3177 = vmatmul.mubr.msk.bf16.gmra.mrb[60].mxu1 %vm541_vm2, %v3258_v5 }
  0x83   :  { %3108 = vmatprep.mubr.msk.bf16.mxu0 %vm541_vm2, %v3259_v6  ;;  %3180 = vmatprep.mubr.msk.bf16.mxu1 %vm541_vm2, %v3260_v7 }
  0x8a   :  { %3109 = vmatmul.mubr.msk.bf16.gmra.mrb[64].mxu0 %vm541_vm2, %v3261_v8  ;;  %3181 = vmatmul.mubr.msk.bf16.gmra.mrb[64].mxu1 %vm541_vm2, %v3262_v9 }
  0x8b   :  { %3112 = vmatprep.mubr.msk.bf16.mxu0 %vm541_vm2, %v3263_v10  ;;  %3184 = vmatprep.mubr.msk.bf16.mxu1 %vm541_vm2, %v3264_v11 }
  0x92   :  { %3113 = vmatmul.mubr.msk.bf16.gmra.mrb[68].mxu0 %vm541_vm2, %v3265_v12  ;;  %3185 = vmatmul.mubr.msk.bf16.gmra.mrb[68].mxu1 %vm541_vm2, %v3266_v13 }
  0xdd   :  { %v3046_v15 = vpop.f32.mrb[0].mxu0  ;;  %v3118_v16 = vpop.f32.mrb[0].mxu1 }
  0xde   :  { %v808_v17 = vadd.f32 %v3046_v15, %v3586_v14  ;;  %v1096_v18 = vadd.f32 %v3118_v16, %v3586_v14  ;;  %v799_v19 = vpop.f32.mrb[1].mxu0  ;;  %v1087_v20 = vpop.f32.mrb[1].mxu1 }
  0xdf   :  { %v800_v21 = vadd.f32 %v3586_v14, %v799_v19  ;;  %v1088_v22 = vadd.f32 %v3586_v14, %v1087_v20  ;;  %v3047_v23 = vpop.f32.mrb[2].mxu0  ;;  %v3119_v24 = vpop.f32.mrb[2].mxu1 }
  0xe0   :  { %vm1376_vm4 = vcmp.ge.f32.partialorder %v808_v17, 0.0  ;;  %v1520_v25 = vmul.f32 0.2, %v808_v17  ;;  %vm1448_vm5 = vcmp.ge.f32.partialorder %v1096_v18, 0.0  ;;  %v1592_v26 = vmul.f32 0.2, %v1096_v18 }
  0xe1   :  { %vm1374_vm6 = vcmp.ge.f32.partialorder %v800_v21, 0.0  ;;  %v1518_v27 = vmul.f32 0.2, %v800_v21  ;;  %vm1446_vm7 = vcmp.ge.f32.partialorder %v1088_v22, 0.0  ;;  %v1590_v28 = vmul.f32 0.2, %v1088_v22 }
  0xe2   :  { %v1664_v29 = vsel %vm1376_vm4, %v808_v17, %v1520_v25  ;;  %v1736_v30 = vsel %vm1448_vm5, %v1096_v18, %v1592_v26  ;;  %v811_v31 = vadd.f32 %v3047_v23, %v3586_v14  ;;  %v1099_v32 = vadd.f32 %v3119_v24, %v3586_v14  ;;  %v802_v33 = vpop.f32.mrb[3].mxu0  ;;  %v1090_v34 = vpop.f32.mrb[3].mxu1 }
  0xe3   :  { %v2824_v35 = vpack.c.bf16 %v1664_v29, %v1664_v29  ;;  %v2896_v36 = vpack.c.bf16 %v1736_v30, %v1736_v30  ;;  %v1662_v37 = vsel %vm1374_vm6, %v800_v21, %v1518_v27  ;;  %v1734_v38 = vsel %vm1446_vm7, %v1088_v22, %v1590_v28 }
  0xe4   :  { %v2822_v39 = vpack.c.bf16 %v1662_v37, %v1662_v37  ;;  %v2894_v40 = vpack.c.bf16 %v1734_v38, %v1734_v38  ;;  %vm1377_vm8 = vcmp.ge.f32.partialorder %v811_v31, 0.0  ;;  %v1521_v41 = vmul.f32 0.2, %v811_v31 }
  0xe5   :  { %2385 = vst.msk [vmem:[%s4640_s3 + $0x8] sm:$0xf] %vm2382_vm3, %v2824_v35  ;;  %2457 = vst.msk [vmem:[%s4640_s3 + $0x128] sm:$0xf] %vm2382_vm3, %v2896_v36  ;;  %vm1449_vm9 = vcmp.ge.f32.partialorder %v1099_v32, 0.0  ;;  %v803_v43 = vadd.f32 %v3586_v14, %v802_v33  ;;  %v1091_v44 = vadd.f32 %v3586_v14, %v1090_v34  ;;  %v3050_v45 = vpop.f32.mrb[4].mxu0 }
  0xe6   :  { %v1593_v42 = vmul.f32 0.2, %v1099_v32  ;;  %v3122_v46 = vpop.f32.mrb[4].mxu1  ;;  %2383 = vst.msk [vmem:[%s4640_s3] sm:$0xf] %vm2382_vm3, %v2822_v39  ;;  %v1665_v47 = vsel %vm1377_vm8, %v811_v31, %v1521_v41  ;;  %v824_v48 = vadd.f32 %v3050_v45, %v3586_v14  ;;  %v815_v50 = vpop.f32.mrb[5].mxu0 }
  0xe7   :  { %2455 = vst.msk [vmem:[%s4640_s3 + $0x120] sm:$0xf] %vm2382_vm3, %v2894_v40  ;;  %v1112_v49 = vadd.f32 %v3122_v46, %v3586_v14  ;;  %v1103_v51 = vpop.f32.mrb[5].mxu1  ;;  %v2825_v52 = vpack.c.bf16 %v1665_v47, %v1665_v47  ;;  %vm1375_vm10 = vcmp.ge.f32.partialorder %v803_v43, 0.0  ;;  %v1519_v54 = vmul.f32 0.2, %v803_v43 }
  0xe8   :  { %v1737_v53 = vsel %vm1449_vm9, %v1099_v32, %v1593_v42  ;;  %v3051_v55 = vpop.f32.mrb[6].mxu0  ;;  %v3123_v56 = vpop.f32.mrb[6].mxu1  ;;  %vm1447_vm11 = vcmp.ge.f32.partialorder %v1091_v44, 0.0  ;;  %v1591_v58 = vmul.f32 0.2, %v1091_v44  ;;  %vm1380_vm12 = vcmp.ge.f32.partialorder %v824_v48, 0.0 }
  0xe9   :  { %v2897_v57 = vpack.c.bf16 %v1737_v53, %v1737_v53  ;;  %v818_v59 = vpop.f32.mrb[7].mxu0  ;;  %v1106_v60 = vpop.f32.mrb[7].mxu1  ;;  %2386 = vst.msk [vmem:[%s4640_s3 + $0xc] sm:$0xf] %vm2382_vm3, %v2825_v52  ;;  %v1663_v61 = vsel %vm1375_vm10, %v803_v43, %v1519_v54  ;;  %v1524_v62 = vmul.f32 0.2, %v824_v48  ;;  %v816_v2 = vadd.f32 %v3586_v14, %v815_v50 }
  0xea   :  { %vm1452_vm13 = vcmp.ge.f32.partialorder %v1112_v49, 0.0  ;;  %v1596_v63 = vmul.f32 0.2, %v1112_v49  ;;  %v2823_v0 = vpack.c.bf16 %v1663_v61, %v1663_v61  ;;  %v1735_v1 = vsel %vm1447_vm11, %v1091_v44, %v1591_v58 }
  0xeb   :  { %2458 = vst.msk [vmem:[%s4640_s3 + $0x12c] sm:$0xf] %vm2382_vm3, %v2897_v57  ;;  %v1104_v3 = vadd.f32 %v3586_v14, %v1103_v51  ;;  %v2895_v4 = vpack.c.bf16 %v1735_v1, %v1735_v1  ;;  %v1668_v5 = vsel %vm1380_vm12, %v824_v48, %v1524_v62  ;;  %v827_v7 = vadd.f32 %v3051_v55, %v3586_v14 }
  0xec   :  { %v1740_v6 = vsel %vm1452_vm13, %v1112_v49, %v1596_v63  ;;  %2384 = vst.msk [vmem:[%s4640_s3 + $0x4] sm:$0xf] %vm2382_vm3, %v2823_v0  ;;  %v2828_v8 = vpack.c.bf16 %v1668_v5, %v1668_v5  ;;  %vm1378_vm14 = vcmp.ge.f32.partialorder %v816_v2, 0.0  ;;  %v1522_v10 = vmul.f32 0.2, %v816_v2 }
  0xed   :  { %v2900_v9 = vpack.c.bf16 %v1740_v6, %v1740_v6  ;;  %2456 = vst.msk [vmem:[%s4640_s3 + $0x124] sm:$0xf] %vm2382_vm3, %v2895_v4  ;;  %vm1450_vm15 = vcmp.ge.f32.partialorder %v1104_v3, 0.0  ;;  %v1594_v11 = vmul.f32 0.2, %v1104_v3  ;;  %vm1381_vm0 = vcmp.ge.f32.partialorder %v827_v7, 0.0 }
  0xee   :  { %v1525_v12 = vmul.f32 0.2, %v827_v7  ;;  %2389 = vst.msk [vmem:[%s4640_s3 + $0x18] sm:$0xf] %vm2382_vm3, %v2828_v8  ;;  %v1666_v13 = vsel %vm1378_vm14, %v816_v2, %v1522_v10  ;;  %v1115_v15 = vadd.f32 %v3123_v56, %v3586_v14  ;;  %v819_v16 = vadd.f32 %v3586_v14, %v818_v59  ;;  %v3054_v18 = vpop.f32.mrb[8].mxu0  ;;  %v3126_v19 = vpop.f32.mrb[8].mxu1 }
  0xef   :  { %2461 = vst.msk [vmem:[%s4640_s3 + $0x138] sm:$0xf] %vm2382_vm3, %v2900_v9  ;;  %v1107_v17 = vadd.f32 %v3586_v14, %v1106_v60  ;;  %v2826_v20 = vpack.c.bf16 %v1666_v13, %v1666_v13  ;;  %v1738_v21 = vsel %vm1450_vm15, %v1104_v3, %v1594_v11  ;;  %v840_v23 = vadd.f32 %v3054_v18, %v3586_v14  ;;  %v831_v24 = vpop.f32.mrb[9].mxu0  ;;  %v1119_v25 = vpop.f32.mrb[9].mxu1 }
  0xf0   :  { %v1669_v22 = vsel %vm1381_vm0, %v827_v7, %v1525_v12  ;;  %v2898_v26 = vpack.c.bf16 %v1738_v21, %v1738_v21  ;;  %vm1453_vm1 = vcmp.ge.f32.partialorder %v1115_v15, 0.0  ;;  %v1597_v28 = vmul.f32 0.2, %v1115_v15  ;;  %v3055_v29 = vpop.f32.mrb[10].mxu0  ;;  %v3127_v30 = vpop.f32.mrb[10].mxu1 }
  0xf1   :  { %v2829_v27 = vpack.c.bf16 %v1669_v22, %v1669_v22  ;;  %2387 = vst.msk [vmem:[%s4640_s3 + $0x10] sm:$0xf] %vm2382_vm3, %v2826_v20  ;;  %vm1379_vm2 = vcmp.ge.f32.partialorder %v819_v16, 0.0  ;;  %v1523_v31 = vmul.f32 0.2, %v819_v16  ;;  %vm1451_vm4 = vcmp.ge.f32.partialorder %v1107_v17, 0.0 }
  0xf2   :  { %v1595_v32 = vmul.f32 0.2, %v1107_v17  ;;  %2459 = vst.msk [vmem:[%s4640_s3 + $0x130] sm:$0xf] %vm2382_vm3, %v2898_v26  ;;  %v1741_v33 = vsel %vm1453_vm1, %v1115_v15, %v1597_v28  ;;  %vm1384_vm5 = vcmp.ge.f32.partialorder %v840_v23, 0.0  ;;  %v1128_v35 = vadd.f32 %v3126_v19, %v3586_v14  ;;  %v834_v36 = vpop.f32.mrb[11].mxu0 }
  0xf3   :  { %2390 = vst.msk [vmem:[%s4640_s3 + $0x1c] sm:$0xf] %vm2382_vm3, %v2829_v27  ;;  %v1528_v34 = vmul.f32 0.2, %v840_v23  ;;  %v1122_v37 = vpop.f32.mrb[11].mxu1  ;;  %v2901_v38 = vpack.c.bf16 %v1741_v33, %v1741_v33  ;;  %v1667_v39 = vsel %vm1379_vm2, %v819_v16, %v1523_v31  ;;  %v832_v41 = vadd.f32 %v3586_v14, %v831_v24 }
  0xf4   :  { %v1739_v40 = vsel %vm1451_vm4, %v1107_v17, %v1595_v32  ;;  %v2827_v42 = vpack.c.bf16 %v1667_v39, %v1667_v39  ;;  %vm1456_vm6 = vcmp.ge.f32.partialorder %v1128_v35, 0.0  ;;  %v1600_v46 = vmul.f32 0.2, %v1128_v35 }
  0xf5   :  { %v2899_v43 = vpack.c.bf16 %v1739_v40, %v1739_v40  ;;  %v1672_v44 = vsel %vm1384_vm5, %v840_v23, %v1528_v34  ;;  %2462 = vst.msk [vmem:[%s4640_s3 + $0x13c] sm:$0xf] %vm2382_vm3, %v2901_v38  ;;  %vm1382_vm7 = vcmp.ge.f32.partialorder %v832_v41, 0.0  ;;  %v1526_v47 = vmul.f32 0.2, %v832_v41  ;;  %v3058_v48 = vpop.f32.mrb[12].mxu0 }
  0xf6   :  { %v2832_v45 = vpack.c.bf16 %v1672_v44, %v1672_v44  ;;  %2388 = vst.msk [vmem:[%s4640_s3 + $0x14] sm:$0xf] %vm2382_vm3, %v2827_v42  ;;  %v1120_v49 = vadd.f32 %v3586_v14, %v1119_v25  ;;  %v843_v50 = vadd.f32 %v3055_v29, %v3586_v14  ;;  %v1131_v51 = vadd.f32 %v3127_v30, %v3586_v14  ;;  %v3130_v53 = vpop.f32.mrb[12].mxu1  ;;  %v847_v54 = vpop.f32.mrb[13].mxu0 }
  0xf7   :  { %2460 = vst.msk [vmem:[%s4640_s3 + $0x134] sm:$0xf] %vm2382_vm3, %v2899_v43  ;;  %v835_v52 = vadd.f32 %v3586_v14, %v834_v36  ;;  %v1744_v55 = vsel %vm1456_vm6, %v1128_v35, %v1600_v46  ;;  %v1670_v56 = vsel %vm1382_vm7, %v832_v41, %v1526_v47  ;;  %v1123_v57 = vadd.f32 %v3586_v14, %v1122_v37  ;;  %v1135_v59 = vpop.f32.mrb[13].mxu1  ;;  %v3059_v60 = vpop.f32.mrb[14].mxu0 }
  0xf8   :  { %2393 = vst.msk [vmem:[%s4640_s3 + $0x28] sm:$0xf] %vm2382_vm3, %v2832_v45  ;;  %v856_v58 = vadd.f32 %v3058_v48, %v3586_v14  ;;  %v2904_v61 = vpack.c.bf16 %v1744_v55, %v1744_v55  ;;  %v2830_v62 = vpack.c.bf16 %v1670_v56, %v1670_v56  ;;  %vm1454_vm8 = vcmp.ge.f32.partialorder %v1120_v49, 0.0  ;;  %v3131_v0 = vpop.f32.mrb[14].mxu1  ;;  %v850_v1 = vpop.f32.mrb[15].mxu0 }
  0xf9   :  { %v1598_v63 = vmul.f32 0.2, %v1120_v49  ;;  %vm1385_vm9 = vcmp.ge.f32.partialorder %v843_v50, 0.0  ;;  %v1529_v2 = vmul.f32 0.2, %v843_v50  ;;  %vm1457_vm10 = vcmp.ge.f32.partialorder %v1131_v51, 0.0 }
  0xfa   :  { %v1601_v3 = vmul.f32 0.2, %v1131_v51  ;;  %2465 = vst.msk [vmem:[%s4640_s3 + $0x148] sm:$0xf] %vm2382_vm3, %v2904_v61  ;;  %2391 = vst.msk [vmem:[%s4640_s3 + $0x20] sm:$0xf] %vm2382_vm3, %v2830_v62  ;;  %v1144_v18 = vadd.f32 %v3130_v53, %v3586_v14  ;;  %v848_v22 = vadd.f32 %v3586_v14, %v847_v54  ;;  %v1136_v23 = vadd.f32 %v3586_v14, %v1135_v59 }
  0xfb   :  { %v1742_v4 = vsel %vm1454_vm8, %v1120_v49, %v1598_v63  ;;  %vm1383_vm11 = vcmp.ge.f32.partialorder %v835_v52, 0.0  ;;  %v1527_v5 = vmul.f32 0.2, %v835_v52  ;;  %vm1455_vm12 = vcmp.ge.f32.partialorder %v1123_v57, 0.0  ;;  %v1138_v6 = vpop.f32.mrb[15].mxu1 }
  0xfc   :  { %v2902_v7 = vpack.c.bf16 %v1742_v4, %v1742_v4  ;;  %v1673_v8 = vsel %vm1385_vm9, %v843_v50, %v1529_v2  ;;  %v1745_v9 = vsel %vm1457_vm10, %v1131_v51, %v1601_v3  ;;  %v1599_v10 = vmul.f32 0.2, %v1123_v57 }
  0xfd   :  { %v2833_v11 = vpack.c.bf16 %v1673_v8, %v1673_v8  ;;  %v2905_v12 = vpack.c.bf16 %v1745_v9, %v1745_v9  ;;  %v1671_v13 = vsel %vm1383_vm11, %v835_v52, %v1527_v5  ;;  %vm1388_vm13 = vcmp.ge.f32.partialorder %v856_v58, 0.0  ;;  %v3062_v19 = vpop.f32.mrb[16].mxu0  ;;  %v3134_v20 = vpop.f32.mrb[16].mxu1 }
  0xfe   :  { %2463 = vst.msk [vmem:[%s4640_s3 + $0x140] sm:$0xf] %vm2382_vm3, %v2902_v7  ;;  %v2831_v15 = vpack.c.bf16 %v1671_v13, %v1671_v13  ;;  %v1743_v16 = vsel %vm1455_vm12, %v1123_v57, %v1599_v10  ;;  %v1532_v17 = vmul.f32 0.2, %v856_v58  ;;  %v859_v24 = vadd.f32 %v3059_v60, %v3586_v14  ;;  %v863_v25 = vpop.f32.mrb[17].mxu0  ;;  %v1151_v26 = vpop.f32.mrb[17].mxu1 }
  0xff   :  { %2394 = vst.msk [vmem:[%s4640_s3 + $0x2c] sm:$0xf] %vm2382_vm3, %v2833_v11  ;;  %2466 = vst.msk [vmem:[%s4640_s3 + $0x14c] sm:$0xf] %vm2382_vm3, %v2905_v12  ;;  %v2903_v21 = vpack.c.bf16 %v1743_v16, %v1743_v16  ;;  %vm1460_vm14 = vcmp.ge.f32.partialorder %v1144_v18, 0.0  ;;  %v1147_v29 = vadd.f32 %v3131_v0, %v3586_v14  ;;  %v3712_v30 = vpop.f32.mrb[18].mxu0  ;;  %v851_v45 = vadd.f32 %v3586_v14, %v850_v1 }
 0x100   :  { %2392 = vst.msk [vmem:[%s4640_s3 + $0x24] sm:$0xf] %vm2382_vm3, %v2831_v15  ;;  %v1676_v27 = vsel %vm1388_vm13, %v856_v58, %v1532_v17  ;;  %v1604_v28 = vmul.f32 0.2, %v1144_v18  ;;  %v3714_v31 = vpop.f32.mrb[18].mxu1  ;;  %vm1386_vm15 = vcmp.ge.f32.partialorder %v848_v22, 0.0  ;;  %v1139_v49 = vadd.f32 %v3586_v14, %v1138_v6 }
 0x101   :  { %2464 = vst.msk [vmem:[%s4640_s3 + $0x144] sm:$0xf] %vm2382_vm3, %v2903_v21  ;;  %v2836_v32 = vpack.c.bf16 %v1676_v27, %v1676_v27  ;;  %v1530_v33 = vmul.f32 0.2, %v848_v22  ;;  %vm1458_vm0 = vcmp.ge.f32.partialorder %v1136_v23, 0.0  ;;  %v3720_v34 = vpop.f32.mrb[19].mxu0  ;;  %v872_v52 = vadd.f32 %v3062_v19, %v3586_v14 }
 0x102   :  { %v3722_v35 = vpop.f32.mrb[19].mxu1  ;;  %v1748_v36 = vsel %vm1460_vm14, %v1144_v18, %v1604_v28  ;;  %v1602_v37 = vmul.f32 0.2, %v1136_v23  ;;  %vm1389_vm1 = vcmp.ge.f32.partialorder %v859_v24, 0.0  ;;  %v1533_v38 = vmul.f32 0.2, %v859_v24 }
 0x103   :  { %2397 = vst.msk [vmem:[%s4640_s3 + $0x38] sm:$0xf] %vm2382_vm3, %v2836_v32  ;;  %v2908_v39 = vpack.c.bf16 %v1748_v36, %v1748_v36  ;;  %v1674_v40 = vsel %vm1386_vm15, %v848_v22, %v1530_v33  ;;  %vm1461_vm2 = vcmp.ge.f32.partialorder %v1147_v29, 0.0  ;;  %v1605_v41 = vmul.f32 0.2, %v1147_v29 }
 0x104   :  { %v2834_v42 = vpack.c.bf16 %v1674_v40, %v1674_v40  ;;  %v1746_v43 = vsel %vm1458_vm0, %v1136_v23, %v1602_v37  ;;  %v1677_v44 = vsel %vm1389_vm1, %v859_v24, %v1533_v38  ;;  %vm1387_vm4 = vcmp.ge.f32.partialorder %v851_v45, 0.0 }
 0x105   :  { %2469 = vst.msk [vmem:[%s4640_s3 + $0x158] sm:$0xf] %vm2382_vm3, %v2908_v39  ;;  %v2906_v46 = vpack.c.bf16 %v1746_v43, %v1746_v43  ;;  %v2837_v47 = vpack.c.bf16 %v1677_v44, %v1677_v44  ;;  %v1749_v48 = vsel %vm1461_vm2, %v1147_v29, %v1605_v41  ;;  %v1531_v51 = vmul.f32 0.2, %v851_v45  ;;  %v3066_v53 = vpop.f32.mrb[20].mxu0  ;;  %v3138_v54 = vpop.f32.mrb[20].mxu1 }
 0x106   :  { %2395 = vst.msk [vmem:[%s4640_s3 + $0x30] sm:$0xf] %vm2382_vm3, %v2834_v42  ;;  %v2909_v50 = vpack.c.bf16 %v1749_v48, %v1749_v48  ;;  %vm1459_vm5 = vcmp.ge.f32.partialorder %v1139_v49, 0.0  ;;  %v1603_v55 = vmul.f32 0.2, %v1139_v49  ;;  %v1160_v56 = vadd.f32 %v3134_v20, %v3586_v14  ;;  %v879_v58 = vpop.f32.mrb[21].mxu0 }
 0x107   :  { %2467 = vst.msk [vmem:[%s4640_s3 + $0x150] sm:$0xf] %vm2382_vm3, %v2906_v46  ;;  %2398 = vst.msk [vmem:[%s4640_s3 + $0x3c] sm:$0xf] %vm2382_vm3, %v2837_v47  ;;  %v864_v57 = vadd.f32 %v3586_v14, %v863_v25  ;;  %v3749_v59 = vpop.f32.mrb[21].mxu1  ;;  %v1675_v60 = vsel %vm1387_vm4, %v851_v45, %v1531_v51  ;;  %vm1392_vm6 = vcmp.ge.f32.partialorder %v872_v52, 0.0  ;;  %v1152_v62 = vadd.f32 %v3586_v14, %v1151_v26 }
 0x108   :  { %2470 = vst.msk [vmem:[%s4640_s3 + $0x15c] sm:$0xf] %vm2382_vm3, %v2909_v50  ;;  %v1536_v61 = vmul.f32 0.2, %v872_v52  ;;  %v3756_v63 = vpop.f32.mrb[22].mxu0  ;;  %v3758_v0 = vpop.f32.mrb[22].mxu1  ;;  %v2835_v1 = vpack.c.bf16 %v1675_v60, %v1675_v60  ;;  %v1747_v2 = vsel %vm1459_vm5, %v1139_v49, %v1603_v55  ;;  %v875_v15 = vadd.f32 %v3712_v30, %v3586_v14 }
 0x109   :  { %vm1464_vm7 = vcmp.ge.f32.partialorder %v1160_v56, 0.0  ;;  %v1608_v3 = vmul.f32 0.2, %v1160_v56  ;;  %v3760_v4 = vpop.f32.mrb[23].mxu0  ;;  %v3762_v5 = vpop.f32.mrb[23].mxu1  ;;  %v2907_v6 = vpack.c.bf16 %v1747_v2, %v1747_v2  ;;  %vm1390_vm8 = vcmp.ge.f32.partialorder %v864_v57, 0.0 }
 0x10a   :  { %v1680_v7 = vsel %vm1392_vm6, %v872_v52, %v1536_v61  ;;  %v1534_v8 = vmul.f32 0.2, %v864_v57  ;;  %2396 = vst.msk [vmem:[%s4640_s3 + $0x34] sm:$0xf] %vm2382_vm3, %v2835_v1  ;;  %vm1462_vm9 = vcmp.ge.f32.partialorder %v1152_v62, 0.0  ;;  %v1163_v16 = vadd.f32 %v3714_v31, %v3586_v14 }
 0x10b   :  { %v2840_v9 = vpack.c.bf16 %v1680_v7, %v1680_v7  ;;  %v1752_v10 = vsel %vm1464_vm7, %v1160_v56, %v1608_v3  ;;  %v1606_v11 = vmul.f32 0.2, %v1152_v62  ;;  %2468 = vst.msk [vmem:[%s4640_s3 + $0x154] sm:$0xf] %vm2382_vm3, %v2907_v6  ;;  %v867_v19 = vadd.f32 %v3586_v14, %v3720_v34 }
 0x10c   :  { %v2912_v12 = vpack.c.bf16 %v1752_v10, %v1752_v10  ;;  %v1678_v13 = vsel %vm1390_vm8, %v864_v57, %v1534_v8  ;;  %v1155_v20 = vadd.f32 %v3586_v14, %v3722_v35  ;;  %vm1393_vm10 = vcmp.ge.f32.partialorder %v875_v15, 0.0 }
 0x10d   :  { %2401 = vst.msk [vmem:[%s4640_s3 + $0x48] sm:$0xf] %vm2382_vm3, %v2840_v9  ;;  %v2838_v17 = vpack.c.bf16 %v1678_v13, %v1678_v13  ;;  %v1750_v18 = vsel %vm1462_vm9, %v1152_v62, %v1606_v11  ;;  %v1537_v22 = vmul.f32 0.2, %v875_v15  ;;  %vm1465_vm11 = vcmp.ge.f32.partialorder %v1163_v16, 0.0  ;;  %v3788_v23 = vpop.f32.mrb[24].mxu0 }
 0x10e   :  { %2473 = vst.msk [vmem:[%s4640_s3 + $0x168] sm:$0xf] %vm2382_vm3, %v2912_v12  ;;  %v2910_v21 = vpack.c.bf16 %v1750_v18, %v1750_v18  ;;  %v3790_v24 = vpop.f32.mrb[24].mxu1  ;;  %v1609_v25 = vmul.f32 0.2, %v1163_v16  ;;  %vm1391_vm12 = vcmp.ge.f32.partialorder %v867_v19, 0.0  ;;  %v888_v29 = vadd.f32 %v3066_v53, %v3586_v14 }
 0x10f   :  { %2399 = vst.msk [vmem:[%s4640_s3 + $0x40] sm:$0xf] %vm2382_vm3, %v2838_v17  ;;  %v1535_v26 = vmul.f32 0.2, %v867_v19  ;;  %vm1463_vm13 = vcmp.ge.f32.partialorder %v1155_v20, 0.0  ;;  %v1681_v27 = vsel %vm1393_vm10, %v875_v15, %v1537_v22  ;;  %v1176_v30 = vadd.f32 %v3138_v54, %v3586_v14  ;;  %v3802_v31 = vpop.f32.mrb[25].mxu0 }
 0x110   :  { %2471 = vst.msk [vmem:[%s4640_s3 + $0x160] sm:$0xf] %vm2382_vm3, %v2910_v21  ;;  %v1607_v28 = vmul.f32 0.2, %v1155_v20  ;;  %v3804_v32 = vpop.f32.mrb[25].mxu1  ;;  %v2841_v33 = vpack.c.bf16 %v1681_v27, %v1681_v27  ;;  %v1753_v34 = vsel %vm1465_vm11, %v1163_v16, %v1609_v25  ;;  %v880_v36 = vadd.f32 %v3586_v14, %v879_v58  ;;  %v3808_v37 = vpop.f32.mrb[26].mxu0 }
 0x111   :  { %v1679_v35 = vsel %vm1391_vm12, %v867_v19, %v1535_v26  ;;  %v3810_v38 = vpop.f32.mrb[26].mxu1  ;;  %v2913_v39 = vpack.c.bf16 %v1753_v34, %v1753_v34  ;;  %vm1396_vm14 = vcmp.ge.f32.partialorder %v888_v29, 0.0  ;;  %v3813_v42 = vpop.f32.mrb[27].mxu0  ;;  %v1540_v45 = vmul.f32 0.2, %v888_v29 }
 0x112   :  { %v2839_v40 = vpack.c.bf16 %v1679_v35, %v1679_v35  ;;  %v1751_v41 = vsel %vm1463_vm13, %v1155_v20, %v1607_v28  ;;  %v3815_v43 = vpop.f32.mrb[27].mxu1  ;;  %2402 = vst.msk [vmem:[%s4640_s3 + $0x4c] sm:$0xf] %vm2382_vm3, %v2841_v33  ;;  %vm1468_vm15 = vcmp.ge.f32.partialorder %v1176_v30, 0.0  ;;  %v1612_v46 = vmul.f32 0.2, %v1176_v30 }
 0x113   :  { %v2911_v44 = vpack.c.bf16 %v1751_v41, %v1751_v41  ;;  %2474 = vst.msk [vmem:[%s4640_s3 + $0x16c] sm:$0xf] %vm2382_vm3, %v2913_v39  ;;  %vm1394_vm0 = vcmp.ge.f32.partialorder %v880_v36, 0.0  ;;  %v1538_v47 = vmul.f32 0.2, %v880_v36  ;;  %v1168_v48 = vadd.f32 %v3586_v14, %v3749_v59 }
 0x114   :  { %2400 = vst.msk [vmem:[%s4640_s3 + $0x44] sm:$0xf] %vm2382_vm3, %v2839_v40  ;;  %v891_v49 = vadd.f32 %v3756_v63, %v3586_v14  ;;  %v1684_v50 = vsel %vm1396_vm14, %v888_v29, %v1540_v45  ;;  %v1756_v51 = vsel %vm1468_vm15, %v1176_v30, %v1612_v46  ;;  %v1179_v52 = vadd.f32 %v3758_v0, %v3586_v14 }
 0x115   :  { %2472 = vst.msk [vmem:[%s4640_s3 + $0x164] sm:$0xf] %vm2382_vm3, %v2911_v44  ;;  %v883_v53 = vadd.f32 %v3586_v14, %v3760_v4  ;;  %v2844_v54 = vpack.c.bf16 %v1684_v50, %v1684_v50  ;;  %v2916_v55 = vpack.c.bf16 %v1756_v51, %v1756_v51  ;;  %v1682_v56 = vsel %vm1394_vm0, %v880_v36, %v1538_v47  ;;  %v3841_v57 = vpop.f32.mrb[28].mxu0  ;;  %v3843_v58 = vpop.f32.mrb[28].mxu1 }
 0x116   :  { %vm1466_vm1 = vcmp.ge.f32.partialorder %v1168_v48, 0.0  ;;  %v2842_v59 = vpack.c.bf16 %v1682_v56, %v1682_v56  ;;  %v1610_v60 = vmul.f32 0.2, %v1168_v48  ;;  %vm1397_vm2 = vcmp.ge.f32.partialorder %v891_v49, 0.0  ;;  %v3845_v62 = vpop.f32.mrb[29].mxu0  ;;  %v3863_v6 = vpop.f32.mrb[29].mxu1 }
 0x117   :  { %v1541_v61 = vmul.f32 0.2, %v891_v49  ;;  %2405 = vst.msk [vmem:[%s4640_s3 + $0x58] sm:$0xf] %vm2382_vm3, %v2844_v54  ;;  %2477 = vst.msk [vmem:[%s4640_s3 + $0x178] sm:$0xf] %vm2382_vm3, %v2916_v55  ;;  %v1171_v3 = vadd.f32 %v3586_v14, %v3762_v5  ;;  %v904_v4 = vadd.f32 %v3788_v23, %v3586_v14  ;;  %v1192_v19 = vadd.f32 %v3790_v24, %v3586_v14 }
 0x118   :  { %vm1469_vm4 = vcmp.ge.f32.partialorder %v1179_v52, 0.0  ;;  %v1613_v63 = vmul.f32 0.2, %v1179_v52  ;;  %vm1395_vm5 = vcmp.ge.f32.partialorder %v883_v53, 0.0  ;;  %v1539_v0 = vmul.f32 0.2, %v883_v53 }
 0x119   :  { %2403 = vst.msk [vmem:[%s4640_s3 + $0x50] sm:$0xf] %vm2382_vm3, %v2842_v59  ;;  %v1754_v1 = vsel %vm1466_vm1, %v1168_v48, %v1610_v60  ;;  %v1685_v2 = vsel %vm1397_vm2, %v891_v49, %v1541_v61  ;;  %v3865_v7 = vpop.f32.mrb[30].mxu0  ;;  %v3867_v12 = vpop.f32.mrb[30].mxu1  ;;  %vm1467_vm6 = vcmp.ge.f32.partialorder %v1171_v3, 0.0  ;;  %vm1400_vm7 = vcmp.ge.f32.partialorder %v904_v4, 0.0 }
 0x11a   :  { %v2914_v8 = vpack.c.bf16 %v1754_v1, %v1754_v1  ;;  %v2845_v9 = vpack.c.bf16 %v1685_v2, %v1685_v2  ;;  %v1757_v10 = vsel %vm1469_vm4, %v1179_v52, %v1613_v63  ;;  %v1683_v11 = vsel %vm1395_vm5, %v883_v53, %v1539_v0  ;;  %v3869_v13 = vpop.f32.mrb[31].mxu0  ;;  %v3871_v5 = vpop.f32.mrb[31].mxu1 }
 0x11b   :  { %v2917_v15 = vpack.c.bf16 %v1757_v10, %v1757_v10  ;;  %v2843_v16 = vpack.c.bf16 %v1683_v11, %v1683_v11  ;;  %v1611_v17 = vmul.f32 0.2, %v1171_v3  ;;  %v1544_v18 = vmul.f32 0.2, %v904_v4 }
 0x11c   :  { %2475 = vst.msk [vmem:[%s4640_s3 + $0x170] sm:$0xf] %vm2382_vm3, %v2914_v8  ;;  %2406 = vst.msk [vmem:[%s4640_s3 + $0x5c] sm:$0xf] %vm2382_vm3, %v2845_v9  ;;  %v896_v20 = vadd.f32 %v3586_v14, %v3802_v31  ;;  %v1184_v22 = vadd.f32 %v3586_v14, %v3804_v32  ;;  %v907_v23 = vadd.f32 %v3808_v37, %v3586_v14  ;;  %vm1472_vm8 = vcmp.ge.f32.partialorder %v1192_v19, 0.0 }
 0x11d   :  { %2478 = vst.msk [vmem:[%s4640_s3 + $0x17c] sm:$0xf] %vm2382_vm3, %v2917_v15  ;;  %2404 = vst.msk [vmem:[%s4640_s3 + $0x54] sm:$0xf] %vm2382_vm3, %v2843_v16  ;;  %v1755_v21 = vsel %vm1467_vm6, %v1171_v3, %v1611_v17  ;;  %v1195_v24 = vadd.f32 %v3810_v38, %v3586_v14  ;;  %v1688_v26 = vsel %vm1400_vm7, %v904_v4, %v1544_v18  ;;  %v1616_v27 = vmul.f32 0.2, %v1192_v19 }
 0x11e   :  { %v2915_v25 = vpack.c.bf16 %v1755_v21, %v1755_v21  ;;  %v3899_v28 = vpop.f32.mrb[32].mxu0  ;;  %v3901_v29 = vpop.f32.mrb[32].mxu1  ;;  %v2848_v30 = vpack.c.bf16 %v1688_v26, %v1688_v26  ;;  %vm1398_vm9 = vcmp.ge.f32.partialorder %v896_v20, 0.0  ;;  %v1542_v31 = vmul.f32 0.2, %v896_v20 }
 0x11f   :  { %vm1470_vm10 = vcmp.ge.f32.partialorder %v1184_v22, 0.0  ;;  %v3903_v33 = vpop.f32.mrb[33].mxu0  ;;  %v3905_v32 = vpop.f32.mrb[33].mxu1  ;;  %v1760_v34 = vsel %vm1472_vm8, %v1192_v19, %v1616_v27  ;;  %v1614_v35 = vmul.f32 0.2, %v1184_v22  ;;  %vm1401_vm11 = vcmp.ge.f32.partialorder %v907_v23, 0.0 }
 0x120   :  { %2476 = vst.msk [vmem:[%s4640_s3 + $0x174] sm:$0xf] %vm2382_vm3, %v2915_v25  ;;  %v1545_v36 = vmul.f32 0.2, %v907_v23  ;;  %v3911_v37 = vpop.f32.mrb[34].mxu0  ;;  %v2920_v38 = vpack.c.bf16 %v1760_v34, %v1760_v34  ;;  %v1686_v39 = vsel %vm1398_vm9, %v896_v20, %v1542_v31  ;;  %vm1473_vm12 = vcmp.ge.f32.partialorder %v1195_v24, 0.0 }
 0x121   :  { %2409 = vst.msk [vmem:[%s4640_s3 + $0x68] sm:$0xf] %vm2382_vm3, %v2848_v30  ;;  %v1617_v40 = vmul.f32 0.2, %v1195_v24  ;;  %v3917_v41 = vpop.f32.mrb[34].mxu1  ;;  %v3919_v44 = vpop.f32.mrb[35].mxu0  ;;  %v2846_v45 = vpack.c.bf16 %v1686_v39, %v1686_v39  ;;  %v1758_v46 = vsel %vm1470_vm10, %v1184_v22, %v1614_v35  ;;  %v899_v48 = vadd.f32 %v3586_v14, %v3813_v42 }
 0x122   :  { %v1689_v47 = vsel %vm1401_vm11, %v907_v23, %v1545_v36  ;;  %v3924_v49 = vpop.f32.mrb[35].mxu1  ;;  %2481 = vst.msk [vmem:[%s4640_s3 + $0x188] sm:$0xf] %vm2382_vm3, %v2920_v38  ;;  %v2918_v50 = vpack.c.bf16 %v1758_v46, %v1758_v46  ;;  %v1187_v53 = vadd.f32 %v3586_v14, %v3815_v43  ;;  %v920_v55 = vadd.f32 %v3841_v57, %v3586_v14 }
 0x123   :  { %v2849_v51 = vpack.c.bf16 %v1689_v47, %v1689_v47  ;;  %v1761_v52 = vsel %vm1473_vm12, %v1195_v24, %v1617_v40  ;;  %2407 = vst.msk [vmem:[%s4640_s3 + $0x60] sm:$0xf] %vm2382_vm3, %v2846_v45  ;;  %vm1399_vm13 = vcmp.ge.f32.partialorder %v899_v48, 0.0  ;;  %v1543_v42 = vmul.f32 0.2, %v899_v48 }
 0x124   :  { %v2921_v54 = vpack.c.bf16 %v1761_v52, %v1761_v52  ;;  %2479 = vst.msk [vmem:[%s4640_s3 + $0x180] sm:$0xf] %vm2382_vm3, %v2918_v50  ;;  %vm1471_vm14 = vcmp.ge.f32.partialorder %v1187_v53, 0.0  ;;  %v1615_v43 = vmul.f32 0.2, %v1187_v53  ;;  %v1208_v56 = vadd.f32 %v3843_v58, %v3586_v14 }
 0x125   :  { %2410 = vst.msk [vmem:[%s4640_s3 + $0x6c] sm:$0xf] %vm2382_vm3, %v2849_v51  ;;  %v912_v59 = vadd.f32 %v3586_v14, %v3845_v62  ;;  %v1687_v57 = vsel %vm1399_vm13, %v899_v48, %v1543_v42  ;;  %vm1404_vm15 = vcmp.ge.f32.partialorder %v920_v55, 0.0  ;;  %v1548_v60 = vmul.f32 0.2, %v920_v55  ;;  %v3956_v63 = vpop.f32.mrb[36].mxu0 }
 0x126   :  { %2482 = vst.msk [vmem:[%s4640_s3 + $0x18c] sm:$0xf] %vm2382_vm3, %v2921_v54  ;;  %v1200_v61 = vadd.f32 %v3586_v14, %v3863_v6  ;;  %v3958_v0 = vpop.f32.mrb[36].mxu1  ;;  %v2847_v1 = vpack.c.bf16 %v1687_v57, %v1687_v57  ;;  %v1759_v58 = vsel %vm1471_vm14, %v1187_v53, %v1615_v43  ;;  %vm1476_vm0 = vcmp.ge.f32.partialorder %v1208_v56, 0.0  ;;  %v3960_v62 = vpop.f32.mrb[37].mxu0 }
 0x127   :  { %v1620_v2 = vmul.f32 0.2, %v1208_v56  ;;  %v3962_v3 = vpop.f32.mrb[37].mxu1  ;;  %v2919_v4 = vpack.c.bf16 %v1759_v58, %v1759_v58  ;;  %v1692_v8 = vsel %vm1404_vm15, %v920_v55, %v1548_v60  ;;  %vm1402_vm1 = vcmp.ge.f32.partialorder %v912_v59, 0.0  ;;  %v3964_v10 = vpop.f32.mrb[38].mxu0 }
 0x128   :  { %v1546_v9 = vmul.f32 0.2, %v912_v59  ;;  %v3966_v11 = vpop.f32.mrb[38].mxu1  ;;  %2408 = vst.msk [vmem:[%s4640_s3 + $0x64] sm:$0xf] %vm2382_vm3, %v2847_v1  ;;  %v2852_v6 = vpack.c.bf16 %v1692_v8, %v1692_v8  ;;  %vm1474_vm2 = vcmp.ge.f32.partialorder %v1200_v61, 0.0  ;;  %v923_v21 = vadd.f32 %v3865_v7, %v3586_v14 }
 0x129   :  { %v1764_v15 = vsel %vm1476_vm0, %v1208_v56, %v1620_v2  ;;  %v1618_v16 = vmul.f32 0.2, %v1200_v61  ;;  %v3972_v17 = vpop.f32.mrb[39].mxu0  ;;  %v3974_v18 = vpop.f32.mrb[39].mxu1  ;;  %2480 = vst.msk [vmem:[%s4640_s3 + $0x184] sm:$0xf] %vm2382_vm3, %v2919_v4  ;;  %v1211_v22 = vadd.f32 %v3867_v12, %v3586_v14  ;;  %v915_v25 = vadd.f32 %v3586_v14, %v3869_v13 }
 0x12a   :  { %v2924_v19 = vpack.c.bf16 %v1764_v15, %v1764_v15  ;;  %v1690_v20 = vsel %vm1402_vm1, %v912_v59, %v1546_v9  ;;  %2413 = vst.msk [vmem:[%s4640_s3 + $0x78] sm:$0xf] %vm2382_vm3, %v2852_v6  ;;  %v1203_v26 = vadd.f32 %v3586_v14, %v3871_v5  ;;  %vm1405_vm4 = vcmp.ge.f32.partialorder %v923_v21, 0.0 }
 0x12b   :  { %v2850_v23 = vpack.c.bf16 %v1690_v20, %v1690_v20  ;;  %v1762_v24 = vsel %vm1474_vm2, %v1200_v61, %v1618_v16  ;;  %v1549_v12 = vmul.f32 0.2, %v923_v21  ;;  %vm1477_vm5 = vcmp.ge.f32.partialorder %v1211_v22, 0.0 }
 0x12c   :  { %2485 = vst.msk [vmem:[%s4640_s3 + $0x198] sm:$0xf] %vm2382_vm3, %v2924_v19  ;;  %v2922_v7 = vpack.c.bf16 %v1762_v24, %v1762_v24  ;;  %v1621_v27 = vmul.f32 0.2, %v1211_v22  ;;  %vm1403_vm6 = vcmp.ge.f32.partialorder %v915_v25, 0.0  ;;  %vm1475_vm7 = vcmp.ge.f32.partialorder %v1203_v26, 0.0 }
 0x12d   :  { %2411 = vst.msk [vmem:[%s4640_s3 + $0x70] sm:$0xf] %vm2382_vm3, %v2850_v23  ;;  %v1547_v13 = vmul.f32 0.2, %v915_v25  ;;  %v1693_v5 = vsel %vm1405_vm4, %v923_v21, %v1549_v12  ;;  %v1619_v30 = vmul.f32 0.2, %v1203_v26  ;;  %v936_v31 = vadd.f32 %v3899_v28, %v3586_v14 }
 0x12e   :  { %2483 = vst.msk [vmem:[%s4640_s3 + $0x190] sm:$0xf] %vm2382_vm3, %v2922_v7  ;;  %v1224_v34 = vadd.f32 %v3901_v29, %v3586_v14  ;;  %v4008_v35 = vpop.f32.mrb[40].mxu0  ;;  %v4010_v36 = vpop.f32.mrb[40].mxu1  ;;  %v2853_v38 = vpack.c.bf16 %v1693_v5, %v1693_v5  ;;  %v1765_v39 = vsel %vm1477_vm5, %v1211_v22, %v1621_v27  ;;  %v928_v45 = vadd.f32 %v3586_v14, %v3903_v33 }
 0x12f   :  { %v1691_v40 = vsel %vm1403_vm6, %v915_v25, %v1547_v13  ;;  %v4014_v46 = vpop.f32.mrb[41].mxu0  ;;  %v4016_v47 = vpop.f32.mrb[41].mxu1  ;;  %v2925_v48 = vpack.c.bf16 %v1765_v39, %v1765_v39  ;;  %v1763_v28 = vsel %vm1475_vm7, %v1203_v26, %v1619_v30  ;;  %vm1408_vm8 = vcmp.ge.f32.partialorder %v936_v31, 0.0 }
 0x130   :  { %v2851_v50 = vpack.c.bf16 %v1691_v40, %v1691_v40  ;;  %v4019_v29 = vpop.f32.mrb[42].mxu0  ;;  %v4021_v51 = vpop.f32.mrb[42].mxu1  ;;  %2414 = vst.msk [vmem:[%s4640_s3 + $0x7c] sm:$0xf] %vm2382_vm3, %v2853_v38  ;;  %v2923_v52 = vpack.c.bf16 %v1763_v28, %v1763_v28  ;;  %v1552_v33 = vmul.f32 0.2, %v936_v31  ;;  %v1216_v55 = vadd.f32 %v3586_v14, %v3905_v32 }
 0x131   :  { %vm1480_vm9 = vcmp.ge.f32.partialorder %v1224_v34, 0.0  ;;  %v1624_v53 = vmul.f32 0.2, %v1224_v34  ;;  %v4027_v54 = vpop.f32.mrb[43].mxu0  ;;  %2486 = vst.msk [vmem:[%s4640_s3 + $0x19c] sm:$0xf] %vm2382_vm3, %v2925_v48  ;;  %v939_v43 = vadd.f32 %v3911_v37, %v3586_v14  ;;  %v1227_v60 = vadd.f32 %v3917_v41, %v3586_v14 }
 0x132   :  { %2412 = vst.msk [vmem:[%s4640_s3 + $0x74] sm:$0xf] %vm2382_vm3, %v2851_v50  ;;  %vm1406_vm10 = vcmp.ge.f32.partialorder %v928_v45, 0.0  ;;  %v1550_v42 = vmul.f32 0.2, %v928_v45  ;;  %v4041_v56 = vpop.f32.mrb[43].mxu1  ;;  %v1696_v59 = vsel %vm1408_vm8, %v936_v31, %v1552_v33  ;;  %v931_v61 = vadd.f32 %v3586_v14, %v3919_v44 }
 0x133   :  { %2484 = vst.msk [vmem:[%s4640_s3 + $0x194] sm:$0xf] %vm2382_vm3, %v2923_v52  ;;  %v1768_v57 = vsel %vm1480_vm9, %v1224_v34, %v1624_v53  ;;  %v2856_v32 = vpack.c.bf16 %v1696_v59, %v1696_v59  ;;  %vm1478_vm11 = vcmp.ge.f32.partialorder %v1216_v55, 0.0  ;;  %v1622_v2 = vmul.f32 0.2, %v1216_v55 }
 0x134   :  { %v2928_v1 = vpack.c.bf16 %v1768_v57, %v1768_v57  ;;  %v1694_v58 = vsel %vm1406_vm10, %v928_v45, %v1550_v42  ;;  %vm1409_vm12 = vcmp.ge.f32.partialorder %v939_v43, 0.0  ;;  %v1553_v4 = vmul.f32 0.2, %v939_v43 }
 0x135   :  { %v2854_v37 = vpack.c.bf16 %v1694_v58, %v1694_v58  ;;  %2417 = vst.msk [vmem:[%s4640_s3 + $0x88] sm:$0xf] %vm2382_vm3, %v2856_v32  ;;  %vm1481_vm13 = vcmp.ge.f32.partialorder %v1227_v60, 0.0  ;;  %v1625_v41 = vmul.f32 0.2, %v1227_v60  ;;  %vm1407_vm14 = vcmp.ge.f32.partialorder %v931_v61, 0.0 }
 0x136   :  { %2489 = vst.msk [vmem:[%s4640_s3 + $0x1a8] sm:$0xf] %vm2382_vm3, %v2928_v1  ;;  %v1551_v44 = vmul.f32 0.2, %v931_v61  ;;  %v1766_v8 = vsel %vm1478_vm11, %v1216_v55, %v1622_v2  ;;  %v1697_v9 = vsel %vm1409_vm12, %v939_v43, %v1553_v4  ;;  %v1219_v6 = vadd.f32 %v3586_v14, %v3924_v49  ;;  %v4068_v16 = vpop.f32.mrb[44].mxu0  ;;  %v4070_v19 = vpop.f32.mrb[44].mxu1 }
 0x137   :  { %2415 = vst.msk [vmem:[%s4640_s3 + $0x80] sm:$0xf] %vm2382_vm3, %v2854_v37  ;;  %v952_v15 = vadd.f32 %v3956_v63, %v3586_v14  ;;  %v2926_v20 = vpack.c.bf16 %v1766_v8, %v1766_v8  ;;  %v2857_v21 = vpack.c.bf16 %v1697_v9, %v1697_v9  ;;  %v1769_v22 = vsel %vm1481_vm13, %v1227_v60, %v1625_v41  ;;  %v4072_v24 = vpop.f32.mrb[45].mxu0  ;;  %v4074_v25 = vpop.f32.mrb[45].mxu1  ;;  %v4091_v63 = vld [vmem:[%s4639_s2] ss:$0 sm:$0xff] }
 0x138   :  { %v1695_v23 = vsel %vm1407_vm14, %v931_v61, %v1551_v44  ;;  %v2929_v26 = vpack.c.bf16 %v1769_v22, %v1769_v22  ;;  %vm1479_vm15 = vcmp.ge.f32.partialorder %v1219_v6, 0.0  ;;  %v1623_v12 = vmul.f32 0.2, %v1219_v6  ;;  %v4076_v49 = vpop.f32.mrb[46].mxu0  ;;  %v4078_v27 = vpop.f32.mrb[46].mxu1 }
 0x139   :  { %v2855_v7 = vpack.c.bf16 %v1695_v23, %v1695_v23  ;;  %2487 = vst.msk [vmem:[%s4640_s3 + $0x1a0] sm:$0xf] %vm2382_vm3, %v2926_v20  ;;  %2418 = vst.msk [vmem:[%s4640_s3 + $0x8c] sm:$0xf] %vm2382_vm3, %v2857_v21  ;;  %vm1412_vm0 = vcmp.ge.f32.partialorder %v952_v15, 0.0  ;;  %v1240_v13 = vadd.f32 %v4091_v63, %v3958_v0  ;;  %v944_v5 = vadd.f32 %v4091_v63, %v3960_v62  ;;  %v4097_v30 = vpop.f32.mrb[47].mxu0 }
 0x13a   :  { %v1556_v14 = vmul.f32 0.2, %v952_v15  ;;  %v4099_v31 = vpop.f32.mrb[47].mxu1  ;;  %2490 = vst.msk [vmem:[%s4640_s3 + $0x1ac] sm:$0xf] %vm2382_vm3, %v2929_v26  ;;  %v1767_v34 = vsel %vm1479_vm15, %v1219_v6, %v1623_v12  ;;  %v1232_v0 = vadd.f32 %v4091_v63, %v3962_v3  ;;  %v955_v62 = vadd.f32 %v4091_v63, %v3964_v10 }
 0x13b   :  { %2416 = vst.msk [vmem:[%s4640_s3 + $0x84] sm:$0xf] %vm2382_vm3, %v2855_v7  ;;  %v1243_v38 = vadd.f32 %v4091_v63, %v3966_v11  ;;  %v2927_v39 = vpack.c.bf16 %v1767_v34, %v1767_v34  ;;  %vm1484_vm1 = vcmp.ge.f32.partialorder %v1240_v13, 0.0  ;;  %v1628_v45 = vmul.f32 0.2, %v1240_v13 }
 0x13c   :  { %v1700_v40 = vsel %vm1412_vm0, %v952_v15, %v1556_v14  ;;  %vm1410_vm2 = vcmp.ge.f32.partialorder %v944_v5, 0.0  ;;  %v1554_v50 = vmul.f32 0.2, %v944_v5  ;;  %vm1482_vm4 = vcmp.ge.f32.partialorder %v1232_v0, 0.0 }
 0x13d   :  { %v2860_v48 = vpack.c.bf16 %v1700_v40, %v1700_v40  ;;  %2488 = vst.msk [vmem:[%s4640_s3 + $0x1a4] sm:$0xf] %vm2382_vm3, %v2927_v39  ;;  %v1772_v3 = vsel %vm1484_vm1, %v1240_v13, %v1628_v45  ;;  %v1626_v28 = vmul.f32 0.2, %v1232_v0  ;;  %vm1413_vm5 = vcmp.ge.f32.partialorder %v955_v62, 0.0  ;;  %v4119_v52 = vpop.f32.mrb[48].mxu0 }
 0x13e   :  { %v1557_v10 = vmul.f32 0.2, %v955_v62  ;;  %v2932_v11 = vpack.c.bf16 %v1772_v3, %v1772_v3  ;;  %v1698_v33 = vsel %vm1410_vm2, %v944_v5, %v1554_v50  ;;  %vm1485_vm6 = vcmp.ge.f32.partialorder %v1243_v38, 0.0  ;;  %v4125_v42 = vpop.f32.mrb[48].mxu1  ;;  %v4127_v55 = vpop.f32.mrb[49].mxu0 }
 0x13f   :  { %2421 = vst.msk [vmem:[%s4640_s3 + $0x98] sm:$0xf] %vm2382_vm3, %v2860_v48  ;;  %v1629_v53 = vmul.f32 0.2, %v1243_v38  ;;  %v2858_v43 = vpack.c.bf16 %v1698_v33, %v1698_v33  ;;  %v1770_v59 = vsel %vm1482_vm4, %v1232_v0, %v1626_v28  ;;  %v947_v60 = vadd.f32 %v4091_v63, %v3972_v17  ;;  %v4131_v61 = vpop.f32.mrb[49].mxu1  ;;  %v4133_v32 = vpop.f32.mrb[50].mxu0 }
 0x140   :  { %v1701_v57 = vsel %vm1413_vm5, %v955_v62, %v1557_v10  ;;  %2493 = vst.msk [vmem:[%s4640_s3 + $0x1b8] sm:$0xf] %vm2382_vm3, %v2932_v11  ;;  %v2930_v1 = vpack.c.bf16 %v1770_v59, %v1770_v59  ;;  %v1235_v2 = vadd.f32 %v4091_v63, %v3974_v18  ;;  %v4141_v4 = vpop.f32.mrb[50].mxu1  ;;  %v4143_v41 = vpop.f32.mrb[51].mxu0  ;;  %v968_v8 = vadd.f32 %v4091_v63, %v4008_v35 }
 0x141   :  { %v2861_v58 = vpack.c.bf16 %v1701_v57, %v1701_v57  ;;  %v1773_v37 = vsel %vm1485_vm6, %v1243_v38, %v1629_v53  ;;  %2419 = vst.msk [vmem:[%s4640_s3 + $0x90] sm:$0xf] %vm2382_vm3, %v2858_v43  ;;  %vm1411_vm7 = vcmp.ge.f32.partialorder %v947_v60, 0.0  ;;  %v1555_v44 = vmul.f32 0.2, %v947_v60  ;;  %v4151_v9 = vpop.f32.mrb[51].mxu1 }
 0x142   :  { %v2933_v17 = vpack.c.bf16 %v1773_v37, %v1773_v37  ;;  %2491 = vst.msk [vmem:[%s4640_s3 + $0x1b0] sm:$0xf] %vm2382_vm3, %v2930_v1  ;;  %vm1483_vm8 = vcmp.ge.f32.partialorder %v1235_v2, 0.0  ;;  %v1627_v18 = vmul.f32 0.2, %v1235_v2  ;;  %v1256_v6 = vadd.f32 %v4091_v63, %v4010_v36 }
 0x143   :  { %2422 = vst.msk [vmem:[%s4640_s3 + $0x9c] sm:$0xf] %vm2382_vm3, %v2861_v58  ;;  %v960_v35 = vadd.f32 %v4091_v63, %v4014_v46  ;;  %v1699_v15 = vsel %vm1411_vm7, %v947_v60, %v1555_v44  ;;  %vm1416_vm9 = vcmp.ge.f32.partialorder %v968_v8, 0.0  ;;  %v1560_v20 = vmul.f32 0.2, %v968_v8 }
 0x144   :  { %2494 = vst.msk [vmem:[%s4640_s3 + $0x1bc] sm:$0xf] %vm2382_vm3, %v2933_v17  ;;  %v1248_v21 = vadd.f32 %v4091_v63, %v4016_v47  ;;  %v2859_v22 = vpack.c.bf16 %v1699_v15, %v1699_v15  ;;  %v1771_v23 = vsel %vm1483_vm8, %v1235_v2, %v1627_v18  ;;  %vm1488_vm10 = vcmp.ge.f32.partialorder %v1256_v6, 0.0 }
 0x145   :  { %v1632_v26 = vmul.f32 0.2, %v1256_v6  ;;  %v2931_v7 = vpack.c.bf16 %v1771_v23, %v1771_v23  ;;  %v1704_v36 = vsel %vm1416_vm9, %v968_v8, %v1560_v20  ;;  %vm1414_vm11 = vcmp.ge.f32.partialorder %v960_v35, 0.0  ;;  %v4171_v46 = vpop.f32.mrb[52].mxu0  ;;  %v4173_v14 = vpop.f32.mrb[52].mxu1 }
 0x146   :  { %v1558_v12 = vmul.f32 0.2, %v960_v35  ;;  %2420 = vst.msk [vmem:[%s4640_s3 + $0x94] sm:$0xf] %vm2382_vm3, %v2859_v22  ;;  %v2864_v13 = vpack.c.bf16 %v1704_v36, %v1704_v36  ;;  %vm1486_vm12 = vcmp.ge.f32.partialorder %v1248_v21, 0.0  ;;  %v4179_v34 = vpop.f32.mrb[53].mxu0  ;;  %v971_v39 = vadd.f32 %v4091_v63, %v4019_v29 }
 0x147   :  { %v1776_v5 = vsel %vm1488_vm10, %v1256_v6, %v1632_v26  ;;  %v1630_v47 = vmul.f32 0.2, %v1248_v21  ;;  %v4181_v0 = vpop.f32.mrb[53].mxu1  ;;  %2492 = vst.msk [vmem:[%s4640_s3 + $0x1b4] sm:$0xf] %vm2382_vm3, %v2931_v7  ;;  %v1259_v40 = vadd.f32 %v4091_v63, %v4021_v51  ;;  %v4191_v45 = vpop.f32.mrb[54].mxu0  ;;  %v963_v28 = vadd.f32 %v4091_v63, %v4027_v54 }
 0x148   :  { %v2936_v62 = vpack.c.bf16 %v1776_v5, %v1776_v5  ;;  %v1702_v38 = vsel %vm1414_vm11, %v960_v35, %v1558_v12  ;;  %v4193_v48 = vpop.f32.mrb[54].mxu1  ;;  %2425 = vst.msk [vmem:[%s4640_s3 + $0xa8] sm:$0xf] %vm2382_vm3, %v2864_v13  ;;  %v1251_v29 = vadd.f32 %v4091_v63, %v4041_v56  ;;  %v4203_v10 = vpop.f32.mrb[55].mxu0  ;;  %vm1417_vm13 = vcmp.ge.f32.partialorder %v971_v39, 0.0 }
 0x149   :  { %v2862_v50 = vpack.c.bf16 %v1702_v38, %v1702_v38  ;;  %v1774_v3 = vsel %vm1486_vm12, %v1248_v21, %v1630_v47  ;;  %v4205_v51 = vpop.f32.mrb[55].mxu1  ;;  %v1561_v33 = vmul.f32 0.2, %v971_v39  ;;  %vm1489_vm14 = vcmp.ge.f32.partialorder %v1259_v40, 0.0 }
 0x14a   :  { %2497 = vst.msk [vmem:[%s4640_s3 + $0x1c8] sm:$0xf] %vm2382_vm3, %v2936_v62  ;;  %v2934_v11 = vpack.c.bf16 %v1774_v3, %v1774_v3  ;;  %v1633_v54 = vmul.f32 0.2, %v1259_v40  ;;  %vm1415_vm15 = vcmp.ge.f32.partialorder %v963_v28, 0.0  ;;  %vm1487_vm0 = vcmp.ge.f32.partialorder %v1251_v29, 0.0 }
 0x14b   :  { %2423 = vst.msk [vmem:[%s4640_s3 + $0xa0] sm:$0xf] %vm2382_vm3, %v2862_v50  ;;  %v1559_v56 = vmul.f32 0.2, %v963_v28  ;;  %v1705_v53 = vsel %vm1417_vm13, %v971_v39, %v1561_v33  ;;  %v1631_v43 = vmul.f32 0.2, %v1251_v29  ;;  %v984_v59 = vadd.f32 %v4091_v63, %v4068_v16 }
 0x14c   :  { %2495 = vst.msk [vmem:[%s4640_s3 + $0x1c0] sm:$0xf] %vm2382_vm3, %v2934_v11  ;;  %v1272_v57 = vadd.f32 %v4091_v63, %v4070_v19  ;;  %v2865_v60 = vpack.c.bf16 %v1705_v53, %v1705_v53  ;;  %v1777_v1 = vsel %vm1489_vm14, %v1259_v40, %v1633_v54  ;;  %v976_v37 = vadd.f32 %v4091_v63, %v4072_v24 }
 0x14d   :  { %v1703_v58 = vsel %vm1415_vm15, %v963_v28, %v1559_v56  ;;  %v2937_v2 = vpack.c.bf16 %v1777_v1, %v1777_v1  ;;  %v1775_v44 = vsel %vm1487_vm0, %v1251_v29, %v1631_v43  ;;  %vm1420_vm1 = vcmp.ge.f32.partialorder %v984_v59, 0.0  ;;  %v4225_v8 = vpop.f32.mrb[56].mxu0  ;;  %v4227_v18 = vpop.f32.mrb[56].mxu1 }
 0x14e   :  { %v2863_v17 = vpack.c.bf16 %v1703_v58, %v1703_v58  ;;  %2426 = vst.msk [vmem:[%s4640_s3 + $0xac] sm:$0xf] %vm2382_vm3, %v2865_v60  ;;  %v2935_v16 = vpack.c.bf16 %v1775_v44, %v1775_v44  ;;  %v1564_v19 = vmul.f32 0.2, %v984_v59  ;;  %vm1492_vm2 = vcmp.ge.f32.partialorder %v1272_v57, 0.0  ;;  %v4233_v35 = vpop.f32.mrb[57].mxu0 }
 0x14f   :  { %v1636_v6 = vmul.f32 0.2, %v1272_v57  ;;  %2498 = vst.msk [vmem:[%s4640_s3 + $0x1cc] sm:$0xf] %vm2382_vm3, %v2937_v2  ;;  %vm1418_vm4 = vcmp.ge.f32.partialorder %v976_v37, 0.0  ;;  %v1264_v15 = vadd.f32 %v4091_v63, %v4074_v25  ;;  %v987_v20 = vadd.f32 %v4091_v63, %v4076_v49  ;;  %v4247_v21 = vpop.f32.mrb[57].mxu1 }
 0x150   :  { %2424 = vst.msk [vmem:[%s4640_s3 + $0xa4] sm:$0xf] %vm2382_vm3, %v2863_v17  ;;  %v1562_v24 = vmul.f32 0.2, %v976_v37  ;;  %v4249_v22 = vpop.f32.mrb[58].mxu0  ;;  %v1708_v23 = vsel %vm1420_vm1, %v984_v59, %v1564_v19  ;;  %v1275_v7 = vadd.f32 %v4091_v63, %v4078_v27  ;;  %v979_v25 = vadd.f32 %v4091_v63, %v4097_v30  ;;  %v4260_v36 = vpop.f32.mrb[58].mxu1 }
 0x151   :  { %2496 = vst.msk [vmem:[%s4640_s3 + $0x1c4] sm:$0xf] %vm2382_vm3, %v2935_v16  ;;  %v1780_v26 = vsel %vm1492_vm2, %v1272_v57, %v1636_v6  ;;  %v4262_v49 = vpop.f32.mrb[59].mxu0  ;;  %v2868_v12 = vpack.c.bf16 %v1708_v23, %v1708_v23  ;;  %vm1490_vm5 = vcmp.ge.f32.partialorder %v1264_v15, 0.0  ;;  %v4264_v47 = vpop.f32.mrb[59].mxu1  ;;  %vm1421_vm6 = vcmp.ge.f32.partialorder %v987_v20, 0.0 }
 0x152   :  { %v2940_v13 = vpack.c.bf16 %v1780_v26, %v1780_v26  ;;  %v1706_v5 = vsel %vm1418_vm4, %v976_v37, %v1562_v24  ;;  %v1634_v38 = vmul.f32 0.2, %v1264_v15  ;;  %v1565_v39 = vmul.f32 0.2, %v987_v20 }
 0x153   :  { %v2866_v62 = vpack.c.bf16 %v1706_v5, %v1706_v5  ;;  %2429 = vst.msk [vmem:[%s4640_s3 + $0xb8] sm:$0xf] %vm2382_vm3, %v2868_v12  ;;  %vm1493_vm7 = vcmp.ge.f32.partialorder %v1275_v7, 0.0  ;;  %v1637_v27 = vmul.f32 0.2, %v1275_v7  ;;  %vm1419_vm8 = vcmp.ge.f32.partialorder %v979_v25, 0.0 }
 0x154   :  { %2501 = vst.msk [vmem:[%s4640_s3 + $0x1d8] sm:$0xf] %vm2382_vm3, %v2940_v13  ;;  %v1563_v30 = vmul.f32 0.2, %v979_v25  ;;  %v1778_v40 = vsel %vm1490_vm5, %v1264_v15, %v1634_v38  ;;  %v1709_v50 = vsel %vm1421_vm6, %v987_v20, %v1565_v39  ;;  %v1267_v3 = vadd.f32 %v4091_v63, %v4099_v31 }
 0x155   :  { %2427 = vst.msk [vmem:[%s4640_s3 + $0xb0] sm:$0xf] %vm2382_vm3, %v2866_v62  ;;  %v1000_v28 = vadd.f32 %v4091_v63, %v4119_v52  ;;  %v2938_v29 = vpack.c.bf16 %v1778_v40, %v1778_v40  ;;  %v2869_v11 = vpack.c.bf16 %v1709_v50, %v1709_v50  ;;  %v1781_v33 = vsel %vm1493_vm7, %v1275_v7, %v1637_v27  ;;  %v4282_v56 = vpop.f32.mrb[60].mxu0  ;;  %v4284_v53 = vpop.f32.mrb[60].mxu1 }
 0x156   :  { %v1707_v54 = vsel %vm1419_vm8, %v979_v25, %v1563_v30  ;;  %v2941_v43 = vpack.c.bf16 %v1781_v33, %v1781_v33  ;;  %vm1491_vm9 = vcmp.ge.f32.partialorder %v1267_v3, 0.0  ;;  %v1635_v57 = vmul.f32 0.2, %v1267_v3  ;;  %v4286_v60 = vpop.f32.mrb[61].mxu0  ;;  %v4288_v1 = vpop.f32.mrb[61].mxu1 }
 0x157   :  { %v2867_v59 = vpack.c.bf16 %v1707_v54, %v1707_v54  ;;  %2499 = vst.msk [vmem:[%s4640_s3 + $0x1d0] sm:$0xf] %vm2382_vm3, %v2938_v29  ;;  %2430 = vst.msk [vmem:[%s4640_s3 + $0xbc] sm:$0xf] %vm2382_vm3, %v2869_v11  ;;  %vm1424_vm10 = vcmp.ge.f32.partialorder %v1000_v28, 0.0  ;;  %v1288_v52 = vadd.f32 %v4091_v63, %v4125_v42  ;;  %v992_v58 = vadd.f32 %v4091_v63, %v4127_v55  ;;  %v4302_v37 = vpop.f32.mrb[62].mxu0 }
 0x158   :  { %v1568_v31 = vmul.f32 0.2, %v1000_v28  ;;  %v4304_v2 = vpop.f32.mrb[62].mxu1  ;;  %2502 = vst.msk [vmem:[%s4640_s3 + $0x1dc] sm:$0xf] %vm2382_vm3, %v2941_v43  ;;  %v1779_v17 = vsel %vm1491_vm9, %v1267_v3, %v1635_v57  ;;  %v1280_v42 = vadd.f32 %v4091_v63, %v4131_v61  ;;  %v1003_v55 = vadd.f32 %v4091_v63, %v4133_v32  ;;  %v4320_v16 = vpop.f32.mrb[63].mxu0 }
 0x159   :  { %2428 = vst.msk [vmem:[%s4640_s3 + $0xb4] sm:$0xf] %vm2382_vm3, %v2867_v59  ;;  %v1291_v44 = vadd.f32 %v4091_v63, %v4141_v4  ;;  %v4322_v19 = vpop.f32.mrb[63].mxu1  ;;  %v2939_v6 = vpack.c.bf16 %v1779_v17, %v1779_v17  ;;  %vm1496_vm11 = vcmp.ge.f32.partialorder %v1288_v52, 0.0  ;;  %v1640_v15 = vmul.f32 0.2, %v1288_v52 }
 0x15a   :  { %v1712_v24 = vsel %vm1424_vm10, %v1000_v28, %v1568_v31  ;;  %vm1422_vm12 = vcmp.ge.f32.partialorder %v992_v58, 0.0  ;;  %v1566_v23 = vmul.f32 0.2, %v992_v58  ;;  %vm1494_vm13 = vcmp.ge.f32.partialorder %v1280_v42, 0.0 }
 0x15b   :  { %v2872_v20 = vpack.c.bf16 %v1712_v24, %v1712_v24  ;;  %2500 = vst.msk [vmem:[%s4640_s3 + $0x1d4] sm:$0xf] %vm2382_vm3, %v2939_v6  ;;  %v1784_v61 = vsel %vm1496_vm11, %v1288_v52, %v1640_v15  ;;  %v1638_v32 = vmul.f32 0.2, %v1280_v42  ;;  %vm1425_vm14 = vcmp.ge.f32.partialorder %v1003_v55, 0.0 }
 0x15c   :  { %v1569_v4 = vmul.f32 0.2, %v1003_v55  ;;  %v2944_v26 = vpack.c.bf16 %v1784_v61, %v1784_v61  ;;  %v1710_v7 = vsel %vm1422_vm12, %v992_v58, %v1566_v23  ;;  %vm1497_vm15 = vcmp.ge.f32.partialorder %v1291_v44, 0.0 }
 0x15d   :  { %2433 = vst.msk [vmem:[%s4640_s3 + $0xc8] sm:$0xf] %vm2382_vm3, %v2872_v20  ;;  %v1641_v25 = vmul.f32 0.2, %v1291_v44  ;;  %v2870_v12 = vpack.c.bf16 %v1710_v7, %v1710_v7  ;;  %v1782_v13 = vsel %vm1494_vm13, %v1280_v42, %v1638_v32  ;;  %v995_v62 = vadd.f32 %v4091_v63, %v4143_v41  ;;  %v4334_v38 = vpop.f32.mrb[64].mxu0  ;;  %v4336_v39 = vpop.f32.mrb[64].mxu1 }
 0x15e   :  { %v1713_v5 = vsel %vm1425_vm14, %v1003_v55, %v1569_v4  ;;  %2505 = vst.msk [vmem:[%s4640_s3 + $0x1e8] sm:$0xf] %vm2382_vm3, %v2944_v26  ;;  %v2942_v27 = vpack.c.bf16 %v1782_v13, %v1782_v13  ;;  %v1283_v50 = vadd.f32 %v4091_v63, %v4151_v9  ;;  %v4344_v3 = vpop.f32.mrb[65].mxu0  ;;  %v4346_v28 = vpop.f32.mrb[65].mxu1  ;;  %v1016_v11 = vadd.f32 %v4091_v63, %v4171_v46 }
 0x15f   :  { %v2873_v30 = vpack.c.bf16 %v1713_v5, %v1713_v5  ;;  %v1785_v40 = vsel %vm1497_vm15, %v1291_v44, %v1641_v25  ;;  %2431 = vst.msk [vmem:[%s4640_s3 + $0xc0] sm:$0xf] %vm2382_vm3, %v2870_v12  ;;  %vm1423_vm0 = vcmp.ge.f32.partialorder %v995_v62, 0.0  ;;  %v1567_v29 = vmul.f32 0.2, %v995_v62  ;;  %v4354_v33 = vpop.f32.mrb[66].mxu0 }
 0x160   :  { %v2945_v41 = vpack.c.bf16 %v1785_v40, %v1785_v40  ;;  %v4356_v54 = vpop.f32.mrb[66].mxu1  ;;  %2503 = vst.msk [vmem:[%s4640_s3 + $0x1e0] sm:$0xf] %vm2382_vm3, %v2942_v27  ;;  %vm1495_vm1 = vcmp.ge.f32.partialorder %v1283_v50, 0.0  ;;  %v1639_v9 = vmul.f32 0.2, %v1283_v50  ;;  %v1304_v43 = vadd.f32 %v4091_v63, %v4173_v14 }
 0x161   :  { %2434 = vst.msk [vmem:[%s4640_s3 + $0xcc] sm:$0xf] %vm2382_vm3, %v2873_v30  ;;  %v1008_v46 = vadd.f32 %v4091_v63, %v4179_v34  ;;  %v4370_v59 = vpop.f32.mrb[67].mxu0  ;;  %v4372_v57 = vpop.f32.mrb[67].mxu1  ;;  %v1711_v31 = vsel %vm1423_vm0, %v995_v62, %v1567_v29  ;;  %vm1428_vm2 = vcmp.ge.f32.partialorder %v1016_v11, 0.0  ;;  %v1296_v58 = vadd.f32 %v4091_v63, %v4181_v0 }
 0x162   :  { %2506 = vst.msk [vmem:[%s4640_s3 + $0x1ec] sm:$0xf] %vm2382_vm3, %v2945_v41  ;;  %v1572_v52 = vmul.f32 0.2, %v1016_v11  ;;  %v2871_v17 = vpack.c.bf16 %v1711_v31, %v1711_v31  ;;  %v1783_v14 = vsel %vm1495_vm1, %v1283_v50, %v1639_v9  ;;  %vm1500_vm4 = vcmp.ge.f32.partialorder %v1304_v43, 0.0 }
 0x163   :  { %v1644_v42 = vmul.f32 0.2, %v1304_v43  ;;  %v2943_v34 = vpack.c.bf16 %v1783_v14, %v1783_v14  ;;  %vm1426_vm5 = vcmp.ge.f32.partialorder %v1008_v46, 0.0  ;;  %v1570_v44 = vmul.f32 0.2, %v1008_v46 }
 0x164   :  { %v1716_v55 = vsel %vm1428_vm2, %v1016_v11, %v1572_v52  ;;  %2432 = vst.msk [vmem:[%s4640_s3 + $0xc4] sm:$0xf] %vm2382_vm3, %v2871_v17  ;;  %vm1498_vm6 = vcmp.ge.f32.partialorder %v1296_v58, 0.0  ;;  %v1642_v15 = vmul.f32 0.2, %v1296_v58  ;;  %v1019_v23 = vadd.f32 %v4091_v63, %v4191_v45 }
 0x165   :  { %v2876_v6 = vpack.c.bf16 %v1716_v55, %v1716_v55  ;;  %v1788_v24 = vsel %vm1500_vm4, %v1304_v43, %v1644_v42  ;;  %2504 = vst.msk [vmem:[%s4640_s3 + $0x1e4] sm:$0xf] %vm2382_vm3, %v2943_v34  ;;  %v1714_v20 = vsel %vm1426_vm5, %v1008_v46, %v1570_v44  ;;  %v1307_v61 = vadd.f32 %v4091_v63, %v4193_v48  ;;  %v4392_v32 = vpop.f32.mrb[68].mxu0  ;;  %v4394_v4 = vpop.f32.mrb[68].mxu1 }
 0x166   :  { %v2948_v0 = vpack.c.bf16 %v1788_v24, %v1788_v24  ;;  %v2874_v26 = vpack.c.bf16 %v1714_v20, %v1714_v20  ;;  %v1786_v7 = vsel %vm1498_vm6, %v1296_v58, %v1642_v15  ;;  %v1011_v25 = vadd.f32 %v4091_v63, %v4203_v10  ;;  %v4404_v12 = vpop.f32.mrb[69].mxu0  ;;  %v4406_v48 = vpop.f32.mrb[69].mxu1 }
 0x167   :  { %2437 = vst.msk [vmem:[%s4640_s3 + $0xd8] sm:$0xf] %vm2382_vm3, %v2876_v6  ;;  %v1299_v45 = vadd.f32 %v4091_v63, %v4205_v51  ;;  %v2946_v13 = vpack.c.bf16 %v1786_v7, %v1786_v7  ;;  %vm1429_vm7 = vcmp.ge.f32.partialorder %v1019_v23, 0.0  ;;  %v1573_v5 = vmul.f32 0.2, %v1019_v23  ;;  %v4412_v62 = vpop.f32.mrb[70].mxu0 }
 0x168   :  { %2509 = vst.msk [vmem:[%s4640_s3 + $0x1f8] sm:$0xf] %vm2382_vm3, %v2948_v0  ;;  %vm1501_vm8 = vcmp.ge.f32.partialorder %v1307_v61, 0.0  ;;  %v4414_v27 = vpop.f32.mrb[70].mxu1  ;;  %2435 = vst.msk [vmem:[%s4640_s3 + $0xd0] sm:$0xf] %vm2382_vm3, %v2874_v26  ;;  %v1032_v50 = vadd.f32 %v4091_v63, %v4225_v8  ;;  %v1320_v41 = vadd.f32 %v4091_v63, %v4227_v18  ;;  %v1024_v31 = vadd.f32 %v4091_v63, %v4233_v35 }
 0x169   :  { %v1645_v10 = vmul.f32 0.2, %v1307_v61  ;;  %vm1427_vm9 = vcmp.ge.f32.partialorder %v1011_v25, 0.0  ;;  %v1571_v51 = vmul.f32 0.2, %v1011_v25  ;;  %vm1499_vm10 = vcmp.ge.f32.partialorder %v1299_v45, 0.0 }
 0x16a   :  { %2507 = vst.msk [vmem:[%s4640_s3 + $0x1f0] sm:$0xf] %vm2382_vm3, %v2946_v13  ;;  %v1717_v30 = vsel %vm1429_vm7, %v1019_v23, %v1573_v5  ;;  %v1643_v40 = vmul.f32 0.2, %v1299_v45  ;;  %v4428_v29 = vpop.f32.mrb[71].mxu0  ;;  %v4430_v11 = vpop.f32.mrb[71].mxu1  ;;  %v1312_v42 = vadd.f32 %v4091_v63, %v4247_v21  ;;  %v1035_v34 = vadd.f32 %v4091_v63, %v4249_v22 }
 0x16b   :  { %v2877_v9 = vpack.c.bf16 %v1717_v30, %v1717_v30  ;;  %v1789_v43 = vsel %vm1501_vm8, %v1307_v61, %v1645_v10  ;;  %v1715_v46 = vsel %vm1427_vm9, %v1011_v25, %v1571_v51  ;;  %vm1432_vm11 = vcmp.ge.f32.partialorder %v1032_v50, 0.0 }
 0x16c   :  { %v2949_v52 = vpack.c.bf16 %v1789_v43, %v1789_v43  ;;  %v2875_v58 = vpack.c.bf16 %v1715_v46, %v1715_v46  ;;  %v1787_v17 = vsel %vm1499_vm10, %v1299_v45, %v1643_v40  ;;  %v1576_v18 = vmul.f32 0.2, %v1032_v50 }
 0x16d   :  { %2438 = vst.msk [vmem:[%s4640_s3 + $0xdc] sm:$0xf] %vm2382_vm3, %v2877_v9  ;;  %v2947_v8 = vpack.c.bf16 %v1787_v17, %v1787_v17  ;;  %vm1504_vm12 = vcmp.ge.f32.partialorder %v1320_v41, 0.0  ;;  %v1648_v14 = vmul.f32 0.2, %v1320_v41  ;;  %vm1430_vm13 = vcmp.ge.f32.partialorder %v1024_v31, 0.0 }
 0x16e   :  { %2510 = vst.msk [vmem:[%s4640_s3 + $0x1fc] sm:$0xf] %vm2382_vm3, %v2949_v52  ;;  %2436 = vst.msk [vmem:[%s4640_s3 + $0xd4] sm:$0xf] %vm2382_vm3, %v2875_v58  ;;  %v1574_v35 = vmul.f32 0.2, %v1024_v31  ;;  %v1720_v55 = vsel %vm1432_vm11, %v1032_v50, %v1576_v18  ;;  %v1323_v6 = vadd.f32 %v4091_v63, %v4260_v36  ;;  %v1027_v24 = vadd.f32 %v4091_v63, %v4262_v49 }
 0x16f   :  { %2508 = vst.msk [vmem:[%s4640_s3 + $0x1f4] sm:$0xf] %vm2382_vm3, %v2947_v8  ;;  %v1792_v44 = vsel %vm1504_vm12, %v1320_v41, %v1648_v14  ;;  %v2880_v15 = vpack.c.bf16 %v1720_v55, %v1720_v55  ;;  %vm1502_vm14 = vcmp.ge.f32.partialorder %v1312_v42, 0.0  ;;  %v1646_v23 = vmul.f32 0.2, %v1312_v42 }
 0x170   :  { %v2952_v0 = vpack.c.bf16 %v1792_v44, %v1792_v44  ;;  %v1718_v20 = vsel %vm1430_vm13, %v1024_v31, %v1574_v35  ;;  %vm1433_vm15 = vcmp.ge.f32.partialorder %v1035_v34, 0.0  ;;  %v1577_v22 = vmul.f32 0.2, %v1035_v34 }
 0x171   :  { %v2878_v21 = vpack.c.bf16 %v1718_v20, %v1718_v20  ;;  %2441 = vst.msk [vmem:[%s4640_s3 + $0xe8] sm:$0xf] %vm2382_vm3, %v2880_v15  ;;  %vm1505_vm0 = vcmp.ge.f32.partialorder %v1323_v6, 0.0  ;;  %v1649_v36 = vmul.f32 0.2, %v1323_v6  ;;  %vm1431_vm1 = vcmp.ge.f32.partialorder %v1027_v24, 0.0 }
 0x172   :  { %2513 = vst.msk [vmem:[%s4640_s3 + $0x208] sm:$0xf] %vm2382_vm3, %v2952_v0  ;;  %v1575_v49 = vmul.f32 0.2, %v1027_v24  ;;  %v1790_v61 = vsel %vm1502_vm14, %v1312_v42, %v1646_v23  ;;  %v1721_v26 = vsel %vm1433_vm15, %v1035_v34, %v1577_v22  ;;  %v1315_v7 = vadd.f32 %v4091_v63, %v4264_v47 }
 0x173   :  { %2439 = vst.msk [vmem:[%s4640_s3 + $0xe0] sm:$0xf] %vm2382_vm3, %v2878_v21  ;;  %v1048_v25 = vadd.f32 %v4091_v63, %v4282_v56  ;;  %v2950_v45 = vpack.c.bf16 %v1790_v61, %v1790_v61  ;;  %v2881_v13 = vpack.c.bf16 %v1721_v26, %v1721_v26  ;;  %v1793_v5 = vsel %vm1505_vm0, %v1323_v6, %v1649_v36 }
 0x174   :  { %v1719_v10 = vsel %vm1431_vm1, %v1027_v24, %v1575_v49  ;;  %v2953_v51 = vpack.c.bf16 %v1793_v5, %v1793_v5  ;;  %vm1503_vm2 = vcmp.ge.f32.partialorder %v1315_v7, 0.0  ;;  %v1647_v40 = vmul.f32 0.2, %v1315_v7 }
 0x175   :  { %v2879_v30 = vpack.c.bf16 %v1719_v10, %v1719_v10  ;;  %2511 = vst.msk [vmem:[%s4640_s3 + $0x200] sm:$0xf] %vm2382_vm3, %v2950_v45  ;;  %2442 = vst.msk [vmem:[%s4640_s3 + $0xec] sm:$0xf] %vm2382_vm3, %v2881_v13  ;;  %vm1436_vm4 = vcmp.ge.f32.partialorder %v1048_v25, 0.0  ;;  %v1336_v56 = vadd.f32 %v4091_v63, %v4284_v53  ;;  %v1040_v50 = vadd.f32 %v4091_v63, %v4286_v60 }
 0x176   :  { %v1580_v47 = vmul.f32 0.2, %v1048_v25  ;;  %2514 = vst.msk [vmem:[%s4640_s3 + $0x20c] sm:$0xf] %vm2382_vm3, %v2953_v51  ;;  %v1791_v41 = vsel %vm1503_vm2, %v1315_v7, %v1647_v40  ;;  %v1328_v9 = vadd.f32 %v4091_v63, %v4288_v1  ;;  %v1051_v53 = vadd.f32 %v4091_v63, %v4302_v37 }
 0x177   :  { %2440 = vst.msk [vmem:[%s4640_s3 + $0xe4] sm:$0xf] %vm2382_vm3, %v2879_v30  ;;  %v1339_v60 = vadd.f32 %v4091_v63, %v4304_v2  ;;  %v2951_v43 = vpack.c.bf16 %v1791_v41, %v1791_v41  ;;  %vm1508_vm5 = vcmp.ge.f32.partialorder %v1336_v56, 0.0  ;;  %v1652_v31 = vmul.f32 0.2, %v1336_v56 }
 0x178   :  { %v1724_v46 = vsel %vm1436_vm4, %v1048_v25, %v1580_v47  ;;  %vm1434_vm6 = vcmp.ge.f32.partialorder %v1040_v50, 0.0  ;;  %v1578_v58 = vmul.f32 0.2, %v1040_v50  ;;  %vm1506_vm7 = vcmp.ge.f32.partialorder %v1328_v9, 0.0 }
 0x179   :  { %v2884_v52 = vpack.c.bf16 %v1724_v46, %v1724_v46  ;;  %2512 = vst.msk [vmem:[%s4640_s3 + $0x204] sm:$0xf] %vm2382_vm3, %v2951_v43  ;;  %v1796_v1 = vsel %vm1508_vm5, %v1336_v56, %v1652_v31  ;;  %v1650_v17 = vmul.f32 0.2, %v1328_v9  ;;  %vm1437_vm8 = vcmp.ge.f32.partialorder %v1051_v53, 0.0 }
 0x17a   :  { %v1581_v37 = vmul.f32 0.2, %v1051_v53  ;;  %v2956_v2 = vpack.c.bf16 %v1796_v1, %v1796_v1  ;;  %v1722_v8 = vsel %vm1434_vm6, %v1040_v50, %v1578_v58  ;;  %vm1509_vm9 = vcmp.ge.f32.partialorder %v1339_v60, 0.0 }
 0x17b   :  { %2445 = vst.msk [vmem:[%s4640_s3 + $0xf8] sm:$0xf] %vm2382_vm3, %v2884_v52  ;;  %v1653_v18 = vmul.f32 0.2, %v1339_v60  ;;  %v2882_v14 = vpack.c.bf16 %v1722_v8, %v1722_v8  ;;  %v1794_v35 = vsel %vm1506_vm7, %v1328_v9, %v1650_v17  ;;  %v1043_v34 = vadd.f32 %v4091_v63, %v4320_v16 }
 0x17c   :  { %v1725_v42 = vsel %vm1437_vm8, %v1051_v53, %v1581_v37  ;;  %2517 = vst.msk [vmem:[%s4640_s3 + $0x218] sm:$0xf] %vm2382_vm3, %v2956_v2  ;;  %v2954_v55 = vpack.c.bf16 %v1794_v35, %v1794_v35  ;;  %v1331_v24 = vadd.f32 %v4091_v63, %v4322_v19  ;;  %v1064_v16 = vadd.f32 %v4091_v63, %v4334_v38 }
 0x17d   :  { %v2885_v44 = vpack.c.bf16 %v1725_v42, %v1725_v42  ;;  %v1797_v6 = vsel %vm1509_vm9, %v1339_v60, %v1653_v18  ;;  %2443 = vst.msk [vmem:[%s4640_s3 + $0xf0] sm:$0xf] %vm2382_vm3, %v2882_v14  ;;  %vm1435_vm10 = vcmp.ge.f32.partialorder %v1043_v34, 0.0  ;;  %v1579_v0 = vmul.f32 0.2, %v1043_v34 }
 0x17e   :  { %v2957_v15 = vpack.c.bf16 %v1797_v6, %v1797_v6  ;;  %2515 = vst.msk [vmem:[%s4640_s3 + $0x210] sm:$0xf] %vm2382_vm3, %v2954_v55  ;;  %vm1507_vm11 = vcmp.ge.f32.partialorder %v1331_v24, 0.0  ;;  %v1651_v19 = vmul.f32 0.2, %v1331_v24  ;;  %v1352_v20 = vadd.f32 %v4091_v63, %v4336_v39 }
 0x17f   :  { %2446 = vst.msk [vmem:[%s4640_s3 + $0xfc] sm:$0xf] %vm2382_vm3, %v2885_v44  ;;  %v1056_v21 = vadd.f32 %v4091_v63, %v4344_v3  ;;  %v1723_v38 = vsel %vm1435_vm10, %v1043_v34, %v1579_v0  ;;  %vm1440_vm12 = vcmp.ge.f32.partialorder %v1064_v16, 0.0  ;;  %v1584_v23 = vmul.f32 0.2, %v1064_v16 }
 0x180   :  { %2518 = vst.msk [vmem:[%s4640_s3 + $0x21c] sm:$0xf] %vm2382_vm3, %v2957_v15  ;;  %v1344_v22 = vadd.f32 %v4091_v63, %v4346_v28  ;;  %v2883_v36 = vpack.c.bf16 %v1723_v38, %v1723_v38  ;;  %v1795_v49 = vsel %vm1507_vm11, %v1331_v24, %v1651_v19  ;;  %vm1512_vm13 = vcmp.ge.f32.partialorder %v1352_v20, 0.0 }
 0x181   :  { %v1656_v61 = vmul.f32 0.2, %v1352_v20  ;;  %v2955_v26 = vpack.c.bf16 %v1795_v49, %v1795_v49  ;;  %v1728_v39 = vsel %vm1440_vm12, %v1064_v16, %v1584_v23  ;;  %vm1438_vm14 = vcmp.ge.f32.partialorder %v1056_v21, 0.0 }
 0x182   :  { %v1582_v7 = vmul.f32 0.2, %v1056_v21  ;;  %2444 = vst.msk [vmem:[%s4640_s3 + $0xf4] sm:$0xf] %vm2382_vm3, %v2883_v36  ;;  %v2888_v3 = vpack.c.bf16 %v1728_v39, %v1728_v39  ;;  %vm1510_vm15 = vcmp.ge.f32.partialorder %v1344_v22, 0.0  ;;  %v1067_v5 = vadd.f32 %v4091_v63, %v4354_v33 }
 0x183   :  { %v1800_v25 = vsel %vm1512_vm13, %v1352_v20, %v1656_v61  ;;  %v1654_v45 = vmul.f32 0.2, %v1344_v22  ;;  %2516 = vst.msk [vmem:[%s4640_s3 + $0x214] sm:$0xf] %vm2382_vm3, %v2955_v26  ;;  %v1355_v10 = vadd.f32 %v4091_v63, %v4356_v54  ;;  %v1059_v40 = vadd.f32 %v4091_v63, %v4370_v59 }
 0x184   :  { %v2960_v28 = vpack.c.bf16 %v1800_v25, %v1800_v25  ;;  %v1726_v13 = vsel %vm1438_vm14, %v1056_v21, %v1582_v7  ;;  %2449 = vst.msk [vmem:[%s4640_s3 + $0x108] sm:$0xf] %vm2382_vm3, %v2888_v3  ;;  %v1347_v47 = vadd.f32 %v4091_v63, %v4372_v57  ;;  %vm1441_vm0 = vcmp.ge.f32.partialorder %v1067_v5, 0.0 }
 0x185   :  { %v2886_v51 = vpack.c.bf16 %v1726_v13, %v1726_v13  ;;  %v1798_v30 = vsel %vm1510_vm15, %v1344_v22, %v1654_v45  ;;  %v1585_v54 = vmul.f32 0.2, %v1067_v5  ;;  %vm1513_vm1 = vcmp.ge.f32.partialorder %v1355_v10, 0.0 }
 0x186   :  { %2521 = vst.msk [vmem:[%s4640_s3 + $0x228] sm:$0xf] %vm2382_vm3, %v2960_v28  ;;  %v2958_v33 = vpack.c.bf16 %v1798_v30, %v1798_v30  ;;  %v1657_v56 = vmul.f32 0.2, %v1355_v10  ;;  %vm1439_vm2 = vcmp.ge.f32.partialorder %v1059_v40, 0.0  ;;  %vm1511_vm4 = vcmp.ge.f32.partialorder %v1347_v47, 0.0 }
 0x187   :  { %2447 = vst.msk [vmem:[%s4640_s3 + $0x100] sm:$0xf] %vm2382_vm3, %v2886_v51  ;;  %v1583_v59 = vmul.f32 0.2, %v1059_v40  ;;  %v1729_v57 = vsel %vm1441_vm0, %v1067_v5, %v1585_v54  ;;  %v1655_v50 = vmul.f32 0.2, %v1347_v47  ;;  %v1080_v41 = vadd.f32 %v4091_v63, %v4392_v32 }
 0x188   :  { %2519 = vst.msk [vmem:[%s4640_s3 + $0x220] sm:$0xf] %vm2382_vm3, %v2958_v33  ;;  %v1368_v9 = vadd.f32 %v4091_v63, %v4394_v4  ;;  %v2889_v53 = vpack.c.bf16 %v1729_v57, %v1729_v57  ;;  %v1801_v60 = vsel %vm1513_vm1, %v1355_v10, %v1657_v56  ;;  %v1072_v46 = vadd.f32 %v4091_v63, %v4404_v12 }
 0x189   :  { %v1727_v43 = vsel %vm1439_vm2, %v1059_v40, %v1583_v59  ;;  %v2961_v31 = vpack.c.bf16 %v1801_v60, %v1801_v60  ;;  %v1799_v58 = vsel %vm1511_vm4, %v1347_v47, %v1655_v50  ;;  %vm1444_vm5 = vcmp.ge.f32.partialorder %v1080_v41, 0.0 }
 0x18a   :  { %v2887_v52 = vpack.c.bf16 %v1727_v43, %v1727_v43  ;;  %2450 = vst.msk [vmem:[%s4640_s3 + $0x10c] sm:$0xf] %vm2382_vm3, %v2889_v53  ;;  %v2959_v1 = vpack.c.bf16 %v1799_v58, %v1799_v58  ;;  %v1588_v32 = vmul.f32 0.2, %v1080_v41  ;;  %vm1516_vm6 = vcmp.ge.f32.partialorder %v1368_v9, 0.0 }
 0x18b   :  { %v1660_v17 = vmul.f32 0.2, %v1368_v9  ;;  %2522 = vst.msk [vmem:[%s4640_s3 + $0x22c] sm:$0xf] %vm2382_vm3, %v2961_v31  ;;  %vm1442_vm7 = vcmp.ge.f32.partialorder %v1072_v46, 0.0  ;;  %v1360_v12 = vadd.f32 %v4091_v63, %v4406_v48  ;;  %v1083_v37 = vadd.f32 %v4091_v63, %v4412_v62 }
 0x18c   :  { %2448 = vst.msk [vmem:[%s4640_s3 + $0x104] sm:$0xf] %vm2382_vm3, %v2887_v52  ;;  %v1586_v4 = vmul.f32 0.2, %v1072_v46  ;;  %2520 = vst.msk [vmem:[%s4640_s3 + $0x224] sm:$0xf] %vm2382_vm3, %v2959_v1  ;;  %v1732_v2 = vsel %vm1444_vm5, %v1080_v41, %v1588_v32  ;;  %v1371_v18 = vadd.f32 %v4091_v63, %v4414_v27  ;;  %v1075_v14 = vadd.f32 %v4091_v63, %v4428_v29 }
 0x18d   :  { %v1804_v8 = vsel %vm1516_vm6, %v1368_v9, %v1660_v17  ;;  %v2892_v35 = vpack.c.bf16 %v1732_v2, %v1732_v2  ;;  %vm1514_vm8 = vcmp.ge.f32.partialorder %v1360_v12, 0.0  ;;  %v1658_v55 = vmul.f32 0.2, %v1360_v12 }
 0x18e   :  { %v2964_v42 = vpack.c.bf16 %v1804_v8, %v1804_v8  ;;  %v1730_v34 = vsel %vm1442_vm7, %v1072_v46, %v1586_v4  ;;  %vm1445_vm9 = vcmp.ge.f32.partialorder %v1083_v37, 0.0  ;;  %v1589_v62 = vmul.f32 0.2, %v1083_v37 }
 0x18f   :  { %v2890_v48 = vpack.c.bf16 %v1730_v34, %v1730_v34  ;;  %2453 = vst.msk [vmem:[%s4640_s3 + $0x118] sm:$0xf] %vm2382_vm3, %v2892_v35  ;;  %vm1517_vm10 = vcmp.ge.f32.partialorder %v1371_v18, 0.0  ;;  %v1661_v27 = vmul.f32 0.2, %v1371_v18  ;;  %vm1443_vm11 = vcmp.ge.f32.partialorder %v1075_v14, 0.0 }
 0x190   :  { %2525 = vst.msk [vmem:[%s4640_s3 + $0x238] sm:$0xf] %vm2382_vm3, %v2964_v42  ;;  %v1587_v29 = vmul.f32 0.2, %v1075_v14  ;;  %v1802_v44 = vsel %vm1514_vm8, %v1360_v12, %v1658_v55  ;;  %v1733_v6 = vsel %vm1445_vm9, %v1083_v37, %v1589_v62  ;;  %v1363_v24 = vadd.f32 %v4091_v63, %v4430_v11 }
 0x191   :  { %2451 = vst.msk [vmem:[%s4640_s3 + $0x110] sm:$0xf] %vm2382_vm3, %v2890_v48  ;;  %v2962_v15 = vpack.c.bf16 %v1802_v44, %v1802_v44  ;;  %v2893_v0 = vpack.c.bf16 %v1733_v6, %v1733_v6  ;;  %v1805_v16 = vsel %vm1517_vm10, %v1371_v18, %v1661_v27 }
 0x192   :  { %v1731_v19 = vsel %vm1443_vm11, %v1075_v14, %v1587_v29  ;;  %v2965_v20 = vpack.c.bf16 %v1805_v16, %v1805_v16  ;;  %vm1515_vm12 = vcmp.ge.f32.partialorder %v1363_v24, 0.0  ;;  %v1659_v38 = vmul.f32 0.2, %v1363_v24 }
 0x193   :  { %v2891_v21 = vpack.c.bf16 %v1731_v19, %v1731_v19  ;;  %2523 = vst.msk [vmem:[%s4640_s3 + $0x230] sm:$0xf] %vm2382_vm3, %v2962_v15  ;;  %2454 = vst.msk [vmem:[%s4640_s3 + $0x11c] sm:$0xf] %vm2382_vm3, %v2893_v0 }
 0x194   :  { %2526 = vst.msk [vmem:[%s4640_s3 + $0x23c] sm:$0xf] %vm2382_vm3, %v2965_v20  ;;  %v1803_v63 = vsel %vm1515_vm12, %v1363_v24, %v1659_v38 }
 0x195   :  { %2452 = vst.msk [vmem:[%s4640_s3 + $0x114] sm:$0xf] %vm2382_vm3, %v2891_v21  ;;  %v2963_v11 = vpack.c.bf16 %v1803_v63, %v1803_v63 }
 0x197   :  { %2524 = vst.msk [vmem:[%s4640_s3 + $0x234] sm:$0xf] %vm2382_vm3, %v2963_v11 }

// kernel: dis_forward.8
= control target key start
LH: loop header
LB: loop body
LE: loop exit
PB: predicated region body
PF: predicated region fallthrough
CT: control target
= control target key end

     0   :  { %vm562_vm0 = vcmask 588800   ;;  %vm779_vm1 = vcmask 1043456   ;;  %vm2400_vm2 = vcmask 60416   ;;  %s4685_s1 = inlined_call_operand.vmem [shape: bf16[72,8], index: 1, kind: input, shape index: {}]   ;;  %s4686_s0 = inlined_call_operand.vmem [shape: bf16[1152,72], index: 0, kind: input, shape index: {}]   ;;  %s4687_s2 = inlined_call_operand.vmem [shape: f32[1,8], index: 2, kind: input, shape index: {}]   ;;  %s4688_s3 = inlined_call_operand.vmem [shape: bf16[1152,8], index: 3, kind: output, shape index: {}]  }
   0x1   :  { %v3230_v0 = vld [vmem:[%s4685_s1] sm:$0xff]   ;;  %v3231_v1 = vld [vmem:[%s4685_s1 + $0x8] sm:$0xff]   ;;  %v3232_v2 = vld [vmem:[%s4685_s1 + $0x10] sm:$0xff]  }
   0x2   :  { %3064 = vmatprep.subr.bf16.mxu0 %v3230_v0  ;;  %3218 = vmatprep.subr.bf16.mxu1 %v3230_v0  ;;  %v3235_v3 = vld [vmem:[%s4686_s0] sm:$0xff]   ;;  %v3233_v5 = vld [vmem:[%s4685_s1 + $0x18] sm:$0xff]   ;;  %v3237_v8 = vld [vmem:[%s4686_s0 + $0x8] sm:$0xff]  }
   0x3   :  { %3065 = vmatpush3.bf16.msra.mxu0 %v3230_v0  ;;  %3223 = vmatpush3.bf16.msra.mxu1 %v3230_v0  ;;  %v3236_v4 = vld [vmem:[%s4686_s0 + $0x120] sm:$0xff]   ;;  %v3238_v9 = vld [vmem:[%s4686_s0 + $0x128] sm:$0xff]   ;;  %v3239_v10 = vld [vmem:[%s4686_s0 + $0x10] sm:$0xff]  }
   0x4   :  { %3066 = vmatprep.subr.bf16.mxu0 %v3231_v1  ;;  %3219 = vmatprep.subr.bf16.mxu1 %v3231_v1  ;;  %v3234_v6 = vld [vmem:[%s4685_s1 + $0x20] ss:$0 sps:$4 sm:$0xff]   ;;  %v3240_v11 = vld [vmem:[%s4686_s0 + $0x130] sm:$0xff]   ;;  %v3241_v12 = vld [vmem:[%s4686_s0 + $0x18] sm:$0xff]  }
   0x5   :  { %3074 = vmatprep.mubr.msk.bf16.mxu0 %vm562_vm0, %v3235_v3  ;;  %3146 = vmatprep.mubr.msk.bf16.mxu1 %vm562_vm0, %v3236_v4  ;;  %v781_v7 = vsel %vm779_vm1, %v3234_v6, 0  ;;  %v3242_v13 = vld [vmem:[%s4686_s0 + $0x138] sm:$0xff]   ;;  %v3243_v14 = vld [vmem:[%s4686_s0 + $0x20] sm:$0xff]   ;;  %v3245_v16 = vld [vmem:[%s4686_s0 + $0x28] sm:$0xff]  }
   0x6   :  { %v3244_v15 = vld [vmem:[%s4686_s0 + $0x140] sm:$0xff]   ;;  %v3246_v17 = vld [vmem:[%s4686_s0 + $0x148] sm:$0xff]   ;;  %v3247_v18 = vld [vmem:[%s4686_s0 + $0x30] sm:$0xff]  }
   0x7   :  { %3067 = vmatpush3.bf16.msra.mxu0 %v3231_v1  ;;  %3224 = vmatpush3.bf16.msra.mxu1 %v3231_v1  ;;  %v3248_v19 = vld [vmem:[%s4686_s0 + $0x150] sm:$0xff]   ;;  %v3249_v20 = vld [vmem:[%s4686_s0 + $0x38] sm:$0xff]   ;;  %v3251_v22 = vld [vmem:[%s4686_s0 + $0x40] sm:$0xff]  }
   0x8   :  { %3068 = vmatprep.subr.bf16.mxu0 %v3232_v2  ;;  %3220 = vmatprep.subr.bf16.mxu1 %v3232_v2  ;;  %v3250_v21 = vld [vmem:[%s4686_s0 + $0x158] sm:$0xff]   ;;  %v3252_v23 = vld [vmem:[%s4686_s0 + $0x160] sm:$0xff]   ;;  %v3253_v24 = vld [vmem:[%s4686_s0 + $0x48] sm:$0xff]  }
   0x9   :  { %v3254_v25 = vld [vmem:[%s4686_s0 + $0x168] sm:$0xff]   ;;  %v3255_v26 = vld [vmem:[%s4686_s0 + $0x50] sm:$0xff]   ;;  %v3257_v28 = vld [vmem:[%s4686_s0 + $0x58] sm:$0xff]  }
   0xa   :  { %v3256_v27 = vld [vmem:[%s4686_s0 + $0x170] sm:$0xff]   ;;  %v3258_v29 = vld [vmem:[%s4686_s0 + $0x178] sm:$0xff]   ;;  %v3259_v30 = vld [vmem:[%s4686_s0 + $0x60] sm:$0xff]  }
   0xb   :  { %3069 = vmatpush3.bf16.msra.mxu0 %v3232_v2  ;;  %3225 = vmatpush3.bf16.msra.mxu1 %v3232_v2  ;;  %v3260_v31 = vld [vmem:[%s4686_s0 + $0x180] sm:$0xff]   ;;  %v3261_v32 = vld [vmem:[%s4686_s0 + $0x68] sm:$0xff]   ;;  %v3263_v34 = vld [vmem:[%s4686_s0 + $0x70] sm:$0xff]  }
   0xc   :  { %3070 = vmatprep.subr.bf16.mxu0 %v3233_v5  ;;  %3221 = vmatprep.subr.bf16.mxu1 %v3233_v5  ;;  %v3262_v33 = vld [vmem:[%s4686_s0 + $0x188] sm:$0xff]   ;;  %v3264_v35 = vld [vmem:[%s4686_s0 + $0x190] sm:$0xff]   ;;  %v3265_v36 = vld [vmem:[%s4686_s0 + $0x78] sm:$0xff]  }
   0xd   :  { %v3266_v37 = vld [vmem:[%s4686_s0 + $0x198] sm:$0xff]   ;;  %v3267_v38 = vld [vmem:[%s4686_s0 + $0x80] sm:$0xff]   ;;  %v3269_v40 = vld [vmem:[%s4686_s0 + $0x88] sm:$0xff]  }
   0xe   :  { %v3268_v39 = vld [vmem:[%s4686_s0 + $0x1a0] sm:$0xff]   ;;  %v3270_v41 = vld [vmem:[%s4686_s0 + $0x1a8] sm:$0xff]   ;;  %v3271_v42 = vld [vmem:[%s4686_s0 + $0x90] sm:$0xff]  }
   0xf   :  { %3071 = vmatpush3.bf16.msra.mxu0 %v3233_v5  ;;  %3226 = vmatpush3.bf16.msra.mxu1 %v3233_v5  ;;  %v3272_v43 = vld [vmem:[%s4686_s0 + $0x1b0] sm:$0xff]   ;;  %v3273_v44 = vld [vmem:[%s4686_s0 + $0x98] sm:$0xff]   ;;  %v3275_v46 = vld [vmem:[%s4686_s0 + $0xa0] sm:$0xff]  }
  0x10   :  { %3228 = vmatprep.subr.msk.bf16.mxu0 %vm779_vm1, %v3234_v6  ;;  %3229 = vmatprep.subr.msk.bf16.mxu1 %vm779_vm1, %v3234_v6  ;;  %v3274_v45 = vld [vmem:[%s4686_s0 + $0x1b8] sm:$0xff]   ;;  %v3276_v47 = vld [vmem:[%s4686_s0 + $0x1c0] sm:$0xff]   ;;  %v3277_v48 = vld [vmem:[%s4686_s0 + $0xa8] sm:$0xff]  }
  0x11   :  { %v3278_v49 = vld [vmem:[%s4686_s0 + $0x1c8] sm:$0xff]   ;;  %v3279_v50 = vld [vmem:[%s4686_s0 + $0xb0] sm:$0xff]   ;;  %v3281_v52 = vld [vmem:[%s4686_s0 + $0xb8] sm:$0xff]  }
  0x12   :  { %v3280_v51 = vld [vmem:[%s4686_s0 + $0x1d0] sm:$0xff]   ;;  %v3282_v53 = vld [vmem:[%s4686_s0 + $0x1d8] sm:$0xff]   ;;  %v3283_v54 = vld [vmem:[%s4686_s0 + $0xc0] sm:$0xff]  }
  0x13   :  { %3073 = vmatpush3.bf16.msra.mxu0 %v781_v7  ;;  %3227 = vmatpush3.bf16.msra.mxu1 %v781_v7  ;;  %v3284_v55 = vld [vmem:[%s4686_s0 + $0x1e0] sm:$0xff]   ;;  %v3285_v56 = vld [vmem:[%s4686_s0 + $0xc8] sm:$0xff]   ;;  %v3287_v58 = vld [vmem:[%s4686_s0 + $0xd0] sm:$0xff]  }
  0x14   :  { %v3286_v57 = vld [vmem:[%s4686_s0 + $0x1e8] sm:$0xff]   ;;  %v3288_v59 = vld [vmem:[%s4686_s0 + $0x1f0] sm:$0xff]   ;;  %v3289_v60 = vld [vmem:[%s4686_s0 + $0xd8] sm:$0xff]  }
  0x15   :  { %v3290_v61 = vld [vmem:[%s4686_s0 + $0x1f8] sm:$0xff]   ;;  %v3291_v62 = vld [vmem:[%s4686_s0 + $0xe0] sm:$0xff]   ;;  %v3293_v0 = vld [vmem:[%s4686_s0 + $0xe8] sm:$0xff]  }
  0x16   :  { %3075 = vmatmul.mubr.msk.bf16.vlgmr.msra.gmra.mrb[0].mxu0 %vm562_vm0, %v3237_v8  ;;  %3147 = vmatmul.mubr.msk.bf16.vlgmr.msra.gmra.mrb[0].mxu1 %vm562_vm0, %v3238_v9  ;;  %v3292_v63 = vld [vmem:[%s4686_s0 + $0x200] sm:$0xff]   ;;  %v3294_v1 = vld [vmem:[%s4686_s0 + $0x208] sm:$0xff]   ;;  %v3295_v2 = vld [vmem:[%s4686_s0 + $0xf0] sm:$0xff]  }
  0x17   :  { %3078 = vmatprep.mubr.msk.bf16.mxu0 %vm562_vm0, %v3239_v10  ;;  %3150 = vmatprep.mubr.msk.bf16.mxu1 %vm562_vm0, %v3240_v11  ;;  %v3296_v3 = vld [vmem:[%s4686_s0 + $0x210] sm:$0xff]   ;;  %v3297_v4 = vld [vmem:[%s4686_s0 + $0xf8] sm:$0xff]   ;;  %v3299_v6 = vld [vmem:[%s4686_s0 + $0x100] sm:$0xff]  }
  0x18   :  { %v3298_v5 = vld [vmem:[%s4686_s0 + $0x218] sm:$0xff]   ;;  %v3300_v7 = vld [vmem:[%s4686_s0 + $0x220] sm:$0xff]   ;;  %v3301_v8 = vld [vmem:[%s4686_s0 + $0x108] sm:$0xff]  }
  0x19   :  { %v3302_v9 = vld [vmem:[%s4686_s0 + $0x228] sm:$0xff]   ;;  %v3303_v10 = vld [vmem:[%s4686_s0 + $0x110] sm:$0xff]  }
  0x1a   :  { %v3304_v11 = vld [vmem:[%s4686_s0 + $0x230] sm:$0xff]  }
  0x1e   :  { %3079 = vmatmul.mubr.msk.bf16.gmra.mrb[4].mxu0 %vm562_vm0, %v3241_v12  ;;  %3151 = vmatmul.mubr.msk.bf16.gmra.mrb[4].mxu1 %vm562_vm0, %v3242_v13  ;;  %v3305_v12 = vld [vmem:[%s4686_s0 + $0x118] sm:$0xff]  }
  0x1f   :  { %3082 = vmatprep.mubr.msk.bf16.mxu0 %vm562_vm0, %v3243_v14  ;;  %3154 = vmatprep.mubr.msk.bf16.mxu1 %vm562_vm0, %v3244_v15  ;;  %v3306_v13 = vld [vmem:[%s4686_s0 + $0x238] sm:$0xff]   ;;  %v3634_v14 = vld [vmem:[%s4687_s2] ss:$0 sm:$0xff] }
  0x26   :  { %3083 = vmatmul.mubr.msk.bf16.gmra.mrb[8].mxu0 %vm562_vm0, %v3245_v16  ;;  %3155 = vmatmul.mubr.msk.bf16.gmra.mrb[8].mxu1 %vm562_vm0, %v3246_v17 }
  0x27   :  { %3086 = vmatprep.mubr.msk.bf16.mxu0 %vm562_vm0, %v3247_v18  ;;  %3158 = vmatprep.mubr.msk.bf16.mxu1 %vm562_vm0, %v3248_v19 }
  0x2e   :  { %3087 = vmatmul.mubr.msk.bf16.gmra.mrb[12].mxu0 %vm562_vm0, %v3249_v20  ;;  %3159 = vmatmul.mubr.msk.bf16.gmra.mrb[12].mxu1 %vm562_vm0, %v3250_v21 }
  0x2f   :  { %3090 = vmatprep.mubr.msk.bf16.mxu0 %vm562_vm0, %v3251_v22  ;;  %3162 = vmatprep.mubr.msk.bf16.mxu1 %vm562_vm0, %v3252_v23 }
  0x36   :  { %3091 = vmatmul.mubr.msk.bf16.gmra.mrb[16].mxu0 %vm562_vm0, %v3253_v24  ;;  %3163 = vmatmul.mubr.msk.bf16.gmra.mrb[16].mxu1 %vm562_vm0, %v3254_v25 }
  0x37   :  { %3094 = vmatprep.mubr.msk.bf16.mxu0 %vm562_vm0, %v3255_v26  ;;  %3166 = vmatprep.mubr.msk.bf16.mxu1 %vm562_vm0, %v3256_v27 }
  0x3e   :  { %3095 = vmatmul.mubr.msk.bf16.gmra.mrb[20].mxu0 %vm562_vm0, %v3257_v28  ;;  %3167 = vmatmul.mubr.msk.bf16.gmra.mrb[20].mxu1 %vm562_vm0, %v3258_v29 }
  0x3f   :  { %3098 = vmatprep.mubr.msk.bf16.mxu0 %vm562_vm0, %v3259_v30  ;;  %3170 = vmatprep.mubr.msk.bf16.mxu1 %vm562_vm0, %v3260_v31 }
  0x46   :  { %3099 = vmatmul.mubr.msk.bf16.gmra.mrb[24].mxu0 %vm562_vm0, %v3261_v32  ;;  %3171 = vmatmul.mubr.msk.bf16.gmra.mrb[24].mxu1 %vm562_vm0, %v3262_v33 }
  0x47   :  { %3102 = vmatprep.mubr.msk.bf16.mxu0 %vm562_vm0, %v3263_v34  ;;  %3174 = vmatprep.mubr.msk.bf16.mxu1 %vm562_vm0, %v3264_v35 }
  0x4e   :  { %3103 = vmatmul.mubr.msk.bf16.gmra.mrb[28].mxu0 %vm562_vm0, %v3265_v36  ;;  %3175 = vmatmul.mubr.msk.bf16.gmra.mrb[28].mxu1 %vm562_vm0, %v3266_v37 }
  0x4f   :  { %3106 = vmatprep.mubr.msk.bf16.mxu0 %vm562_vm0, %v3267_v38  ;;  %3178 = vmatprep.mubr.msk.bf16.mxu1 %vm562_vm0, %v3268_v39 }
  0x56   :  { %3107 = vmatmul.mubr.msk.bf16.gmra.mrb[32].mxu0 %vm562_vm0, %v3269_v40  ;;  %3179 = vmatmul.mubr.msk.bf16.gmra.mrb[32].mxu1 %vm562_vm0, %v3270_v41 }
  0x57   :  { %3110 = vmatprep.mubr.msk.bf16.mxu0 %vm562_vm0, %v3271_v42  ;;  %3182 = vmatprep.mubr.msk.bf16.mxu1 %vm562_vm0, %v3272_v43 }
  0x5e   :  { %3111 = vmatmul.mubr.msk.bf16.gmra.mrb[36].mxu0 %vm562_vm0, %v3273_v44  ;;  %3183 = vmatmul.mubr.msk.bf16.gmra.mrb[36].mxu1 %vm562_vm0, %v3274_v45 }
  0x5f   :  { %3114 = vmatprep.mubr.msk.bf16.mxu0 %vm562_vm0, %v3275_v46  ;;  %3186 = vmatprep.mubr.msk.bf16.mxu1 %vm562_vm0, %v3276_v47 }
  0x66   :  { %3115 = vmatmul.mubr.msk.bf16.gmra.mrb[40].mxu0 %vm562_vm0, %v3277_v48  ;;  %3187 = vmatmul.mubr.msk.bf16.gmra.mrb[40].mxu1 %vm562_vm0, %v3278_v49 }
  0x67   :  { %3118 = vmatprep.mubr.msk.bf16.mxu0 %vm562_vm0, %v3279_v50  ;;  %3190 = vmatprep.mubr.msk.bf16.mxu1 %vm562_vm0, %v3280_v51 }
  0x6e   :  { %3119 = vmatmul.mubr.msk.bf16.gmra.mrb[44].mxu0 %vm562_vm0, %v3281_v52  ;;  %3191 = vmatmul.mubr.msk.bf16.gmra.mrb[44].mxu1 %vm562_vm0, %v3282_v53 }
  0x6f   :  { %3122 = vmatprep.mubr.msk.bf16.mxu0 %vm562_vm0, %v3283_v54  ;;  %3194 = vmatprep.mubr.msk.bf16.mxu1 %vm562_vm0, %v3284_v55 }
  0x76   :  { %3123 = vmatmul.mubr.msk.bf16.gmra.mrb[48].mxu0 %vm562_vm0, %v3285_v56  ;;  %3195 = vmatmul.mubr.msk.bf16.gmra.mrb[48].mxu1 %vm562_vm0, %v3286_v57 }
  0x77   :  { %3126 = vmatprep.mubr.msk.bf16.mxu0 %vm562_vm0, %v3287_v58  ;;  %3198 = vmatprep.mubr.msk.bf16.mxu1 %vm562_vm0, %v3288_v59 }
  0x7e   :  { %3127 = vmatmul.mubr.msk.bf16.gmra.mrb[52].mxu0 %vm562_vm0, %v3289_v60  ;;  %3199 = vmatmul.mubr.msk.bf16.gmra.mrb[52].mxu1 %vm562_vm0, %v3290_v61 }
  0x7f   :  { %3130 = vmatprep.mubr.msk.bf16.mxu0 %vm562_vm0, %v3291_v62  ;;  %3202 = vmatprep.mubr.msk.bf16.mxu1 %vm562_vm0, %v3292_v63 }
  0x86   :  { %3131 = vmatmul.mubr.msk.bf16.gmra.mrb[56].mxu0 %vm562_vm0, %v3293_v0  ;;  %3203 = vmatmul.mubr.msk.bf16.gmra.mrb[56].mxu1 %vm562_vm0, %v3294_v1 }
  0x87   :  { %3134 = vmatprep.mubr.msk.bf16.mxu0 %vm562_vm0, %v3295_v2  ;;  %3206 = vmatprep.mubr.msk.bf16.mxu1 %vm562_vm0, %v3296_v3 }
  0x8e   :  { %3135 = vmatmul.mubr.msk.bf16.gmra.mrb[60].mxu0 %vm562_vm0, %v3297_v4  ;;  %3207 = vmatmul.mubr.msk.bf16.gmra.mrb[60].mxu1 %vm562_vm0, %v3298_v5 }
  0x8f   :  { %3138 = vmatprep.mubr.msk.bf16.mxu0 %vm562_vm0, %v3299_v6  ;;  %3210 = vmatprep.mubr.msk.bf16.mxu1 %vm562_vm0, %v3300_v7 }
  0x96   :  { %3139 = vmatmul.mubr.msk.bf16.gmra.mrb[64].mxu0 %vm562_vm0, %v3301_v8  ;;  %3211 = vmatmul.mubr.msk.bf16.gmra.mrb[64].mxu1 %vm562_vm0, %v3302_v9 }
  0x97   :  { %3142 = vmatprep.mubr.msk.bf16.mxu0 %vm562_vm0, %v3303_v10  ;;  %3214 = vmatprep.mubr.msk.bf16.mxu1 %vm562_vm0, %v3304_v11 }
  0x9e   :  { %3143 = vmatmul.mubr.msk.bf16.gmra.mrb[68].mxu0 %vm562_vm0, %v3305_v12  ;;  %3215 = vmatmul.mubr.msk.bf16.gmra.mrb[68].mxu1 %vm562_vm0, %v3306_v13 }
  0xe9   :  { %v3076_v15 = vpop.f32.mrb[0].mxu0  ;;  %v3148_v16 = vpop.f32.mrb[0].mxu1 }
  0xea   :  { %v826_v17 = vadd.f32 %v3076_v15, %v3634_v14  ;;  %v1114_v18 = vadd.f32 %v3148_v16, %v3634_v14  ;;  %v817_v19 = vpop.f32.mrb[1].mxu0  ;;  %v1105_v20 = vpop.f32.mrb[1].mxu1 }
  0xeb   :  { %v818_v21 = vadd.f32 %v3634_v14, %v817_v19  ;;  %v1106_v22 = vadd.f32 %v3634_v14, %v1105_v20  ;;  %v3077_v23 = vpop.f32.mrb[2].mxu0  ;;  %v3149_v24 = vpop.f32.mrb[2].mxu1 }
  0xec   :  { %vm1394_vm3 = vcmp.ge.f32.partialorder %v826_v17, 0.0  ;;  %v1538_v25 = vmul.f32 0.2, %v826_v17  ;;  %vm1466_vm4 = vcmp.ge.f32.partialorder %v1114_v18, 0.0  ;;  %v1610_v26 = vmul.f32 0.2, %v1114_v18 }
  0xed   :  { %vm1392_vm5 = vcmp.ge.f32.partialorder %v818_v21, 0.0  ;;  %v1536_v27 = vmul.f32 0.2, %v818_v21  ;;  %vm1464_vm6 = vcmp.ge.f32.partialorder %v1106_v22, 0.0  ;;  %v1608_v28 = vmul.f32 0.2, %v1106_v22 }
  0xee   :  { %v1682_v29 = vsel %vm1394_vm3, %v826_v17, %v1538_v25  ;;  %v1754_v30 = vsel %vm1466_vm4, %v1114_v18, %v1610_v26  ;;  %v829_v31 = vadd.f32 %v3077_v23, %v3634_v14  ;;  %v1117_v32 = vadd.f32 %v3149_v24, %v3634_v14  ;;  %v820_v33 = vpop.f32.mrb[3].mxu0  ;;  %v1108_v34 = vpop.f32.mrb[3].mxu1 }
  0xef   :  { %v2845_v35 = vpack.c.bf16 %v1682_v29, %v1682_v29  ;;  %v2917_v36 = vpack.c.bf16 %v1754_v30, %v1754_v30  ;;  %v1680_v37 = vsel %vm1392_vm5, %v818_v21, %v1536_v27  ;;  %v1752_v38 = vsel %vm1464_vm6, %v1106_v22, %v1608_v28 }
  0xf0   :  { %v2843_v39 = vpack.c.bf16 %v1680_v37, %v1680_v37  ;;  %v2915_v40 = vpack.c.bf16 %v1752_v38, %v1752_v38  ;;  %vm1395_vm7 = vcmp.ge.f32.partialorder %v829_v31, 0.0  ;;  %v1539_v41 = vmul.f32 0.2, %v829_v31 }
  0xf1   :  { %2403 = vst.msk [vmem:[%s4688_s3 + $0x8] sm:$0xf] %vm2400_vm2, %v2845_v35  ;;  %2475 = vst.msk [vmem:[%s4688_s3 + $0x128] sm:$0xf] %vm2400_vm2, %v2917_v36  ;;  %vm1467_vm8 = vcmp.ge.f32.partialorder %v1117_v32, 0.0  ;;  %v821_v43 = vadd.f32 %v3634_v14, %v820_v33  ;;  %v1109_v44 = vadd.f32 %v3634_v14, %v1108_v34  ;;  %v3080_v45 = vpop.f32.mrb[4].mxu0 }
  0xf2   :  { %v1611_v42 = vmul.f32 0.2, %v1117_v32  ;;  %v3152_v46 = vpop.f32.mrb[4].mxu1  ;;  %2401 = vst.msk [vmem:[%s4688_s3] sm:$0xf] %vm2400_vm2, %v2843_v39  ;;  %v1683_v47 = vsel %vm1395_vm7, %v829_v31, %v1539_v41  ;;  %v842_v48 = vadd.f32 %v3080_v45, %v3634_v14  ;;  %v833_v50 = vpop.f32.mrb[5].mxu0 }
  0xf3   :  { %2473 = vst.msk [vmem:[%s4688_s3 + $0x120] sm:$0xf] %vm2400_vm2, %v2915_v40  ;;  %v1130_v49 = vadd.f32 %v3152_v46, %v3634_v14  ;;  %v1121_v51 = vpop.f32.mrb[5].mxu1  ;;  %v2846_v52 = vpack.c.bf16 %v1683_v47, %v1683_v47  ;;  %vm1393_vm9 = vcmp.ge.f32.partialorder %v821_v43, 0.0  ;;  %v1537_v54 = vmul.f32 0.2, %v821_v43 }
  0xf4   :  { %v1755_v53 = vsel %vm1467_vm8, %v1117_v32, %v1611_v42  ;;  %v3081_v55 = vpop.f32.mrb[6].mxu0  ;;  %v3153_v56 = vpop.f32.mrb[6].mxu1  ;;  %vm1465_vm10 = vcmp.ge.f32.partialorder %v1109_v44, 0.0  ;;  %v1609_v58 = vmul.f32 0.2, %v1109_v44  ;;  %vm1398_vm11 = vcmp.ge.f32.partialorder %v842_v48, 0.0 }
  0xf5   :  { %v2918_v57 = vpack.c.bf16 %v1755_v53, %v1755_v53  ;;  %v836_v59 = vpop.f32.mrb[7].mxu0  ;;  %v1124_v60 = vpop.f32.mrb[7].mxu1  ;;  %2404 = vst.msk [vmem:[%s4688_s3 + $0xc] sm:$0xf] %vm2400_vm2, %v2846_v52  ;;  %v1681_v61 = vsel %vm1393_vm9, %v821_v43, %v1537_v54  ;;  %v1542_v62 = vmul.f32 0.2, %v842_v48  ;;  %v834_v2 = vadd.f32 %v3634_v14, %v833_v50 }
  0xf6   :  { %vm1470_vm12 = vcmp.ge.f32.partialorder %v1130_v49, 0.0  ;;  %v1614_v63 = vmul.f32 0.2, %v1130_v49  ;;  %v2844_v0 = vpack.c.bf16 %v1681_v61, %v1681_v61  ;;  %v1753_v1 = vsel %vm1465_vm10, %v1109_v44, %v1609_v58 }
  0xf7   :  { %2476 = vst.msk [vmem:[%s4688_s3 + $0x12c] sm:$0xf] %vm2400_vm2, %v2918_v57  ;;  %v1122_v3 = vadd.f32 %v3634_v14, %v1121_v51  ;;  %v2916_v4 = vpack.c.bf16 %v1753_v1, %v1753_v1  ;;  %v1686_v5 = vsel %vm1398_vm11, %v842_v48, %v1542_v62  ;;  %v845_v7 = vadd.f32 %v3081_v55, %v3634_v14 }
  0xf8   :  { %v1758_v6 = vsel %vm1470_vm12, %v1130_v49, %v1614_v63  ;;  %2402 = vst.msk [vmem:[%s4688_s3 + $0x4] sm:$0xf] %vm2400_vm2, %v2844_v0  ;;  %v2849_v8 = vpack.c.bf16 %v1686_v5, %v1686_v5  ;;  %vm1396_vm13 = vcmp.ge.f32.partialorder %v834_v2, 0.0  ;;  %v1540_v10 = vmul.f32 0.2, %v834_v2 }
  0xf9   :  { %v2921_v9 = vpack.c.bf16 %v1758_v6, %v1758_v6  ;;  %2474 = vst.msk [vmem:[%s4688_s3 + $0x124] sm:$0xf] %vm2400_vm2, %v2916_v4  ;;  %vm1468_vm14 = vcmp.ge.f32.partialorder %v1122_v3, 0.0  ;;  %v1612_v11 = vmul.f32 0.2, %v1122_v3  ;;  %vm1399_vm15 = vcmp.ge.f32.partialorder %v845_v7, 0.0 }
  0xfa   :  { %v1543_v12 = vmul.f32 0.2, %v845_v7  ;;  %2407 = vst.msk [vmem:[%s4688_s3 + $0x18] sm:$0xf] %vm2400_vm2, %v2849_v8  ;;  %v1684_v13 = vsel %vm1396_vm13, %v834_v2, %v1540_v10  ;;  %v1133_v15 = vadd.f32 %v3153_v56, %v3634_v14  ;;  %v837_v16 = vadd.f32 %v3634_v14, %v836_v59  ;;  %v3084_v18 = vpop.f32.mrb[8].mxu0  ;;  %v3156_v19 = vpop.f32.mrb[8].mxu1 }
  0xfb   :  { %2479 = vst.msk [vmem:[%s4688_s3 + $0x138] sm:$0xf] %vm2400_vm2, %v2921_v9  ;;  %v1125_v17 = vadd.f32 %v3634_v14, %v1124_v60  ;;  %v2847_v20 = vpack.c.bf16 %v1684_v13, %v1684_v13  ;;  %v1756_v21 = vsel %vm1468_vm14, %v1122_v3, %v1612_v11  ;;  %v858_v23 = vadd.f32 %v3084_v18, %v3634_v14  ;;  %v849_v24 = vpop.f32.mrb[9].mxu0  ;;  %v1137_v25 = vpop.f32.mrb[9].mxu1 }
  0xfc   :  { %v1687_v22 = vsel %vm1399_vm15, %v845_v7, %v1543_v12  ;;  %v2919_v26 = vpack.c.bf16 %v1756_v21, %v1756_v21  ;;  %vm1471_vm0 = vcmp.ge.f32.partialorder %v1133_v15, 0.0  ;;  %v1615_v28 = vmul.f32 0.2, %v1133_v15  ;;  %v3085_v29 = vpop.f32.mrb[10].mxu0  ;;  %v3157_v30 = vpop.f32.mrb[10].mxu1 }
  0xfd   :  { %v2850_v27 = vpack.c.bf16 %v1687_v22, %v1687_v22  ;;  %2405 = vst.msk [vmem:[%s4688_s3 + $0x10] sm:$0xf] %vm2400_vm2, %v2847_v20  ;;  %vm1397_vm1 = vcmp.ge.f32.partialorder %v837_v16, 0.0  ;;  %v1541_v31 = vmul.f32 0.2, %v837_v16  ;;  %vm1469_vm3 = vcmp.ge.f32.partialorder %v1125_v17, 0.0 }
  0xfe   :  { %v1613_v32 = vmul.f32 0.2, %v1125_v17  ;;  %2477 = vst.msk [vmem:[%s4688_s3 + $0x130] sm:$0xf] %vm2400_vm2, %v2919_v26  ;;  %v1759_v33 = vsel %vm1471_vm0, %v1133_v15, %v1615_v28  ;;  %vm1402_vm4 = vcmp.ge.f32.partialorder %v858_v23, 0.0  ;;  %v1146_v35 = vadd.f32 %v3156_v19, %v3634_v14  ;;  %v852_v36 = vpop.f32.mrb[11].mxu0 }
  0xff   :  { %2408 = vst.msk [vmem:[%s4688_s3 + $0x1c] sm:$0xf] %vm2400_vm2, %v2850_v27  ;;  %v1546_v34 = vmul.f32 0.2, %v858_v23  ;;  %v1140_v37 = vpop.f32.mrb[11].mxu1  ;;  %v2922_v38 = vpack.c.bf16 %v1759_v33, %v1759_v33  ;;  %v1685_v39 = vsel %vm1397_vm1, %v837_v16, %v1541_v31  ;;  %v850_v41 = vadd.f32 %v3634_v14, %v849_v24 }
 0x100   :  { %v1757_v40 = vsel %vm1469_vm3, %v1125_v17, %v1613_v32  ;;  %v2848_v42 = vpack.c.bf16 %v1685_v39, %v1685_v39  ;;  %vm1474_vm5 = vcmp.ge.f32.partialorder %v1146_v35, 0.0  ;;  %v1618_v46 = vmul.f32 0.2, %v1146_v35 }
 0x101   :  { %v2920_v43 = vpack.c.bf16 %v1757_v40, %v1757_v40  ;;  %v1690_v44 = vsel %vm1402_vm4, %v858_v23, %v1546_v34  ;;  %2480 = vst.msk [vmem:[%s4688_s3 + $0x13c] sm:$0xf] %vm2400_vm2, %v2922_v38  ;;  %vm1400_vm6 = vcmp.ge.f32.partialorder %v850_v41, 0.0  ;;  %v1544_v47 = vmul.f32 0.2, %v850_v41  ;;  %v3088_v48 = vpop.f32.mrb[12].mxu0 }
 0x102   :  { %v2853_v45 = vpack.c.bf16 %v1690_v44, %v1690_v44  ;;  %2406 = vst.msk [vmem:[%s4688_s3 + $0x14] sm:$0xf] %vm2400_vm2, %v2848_v42  ;;  %v1138_v49 = vadd.f32 %v3634_v14, %v1137_v25  ;;  %v861_v50 = vadd.f32 %v3085_v29, %v3634_v14  ;;  %v1149_v51 = vadd.f32 %v3157_v30, %v3634_v14  ;;  %v3160_v53 = vpop.f32.mrb[12].mxu1  ;;  %v865_v54 = vpop.f32.mrb[13].mxu0 }
 0x103   :  { %2478 = vst.msk [vmem:[%s4688_s3 + $0x134] sm:$0xf] %vm2400_vm2, %v2920_v43  ;;  %v853_v52 = vadd.f32 %v3634_v14, %v852_v36  ;;  %v1762_v55 = vsel %vm1474_vm5, %v1146_v35, %v1618_v46  ;;  %v1688_v56 = vsel %vm1400_vm6, %v850_v41, %v1544_v47  ;;  %v1141_v57 = vadd.f32 %v3634_v14, %v1140_v37  ;;  %v1153_v59 = vpop.f32.mrb[13].mxu1  ;;  %v3089_v60 = vpop.f32.mrb[14].mxu0 }
 0x104   :  { %2411 = vst.msk [vmem:[%s4688_s3 + $0x28] sm:$0xf] %vm2400_vm2, %v2853_v45  ;;  %v874_v58 = vadd.f32 %v3088_v48, %v3634_v14  ;;  %v2925_v61 = vpack.c.bf16 %v1762_v55, %v1762_v55  ;;  %v2851_v62 = vpack.c.bf16 %v1688_v56, %v1688_v56  ;;  %vm1472_vm7 = vcmp.ge.f32.partialorder %v1138_v49, 0.0  ;;  %v3161_v0 = vpop.f32.mrb[14].mxu1  ;;  %v868_v1 = vpop.f32.mrb[15].mxu0 }
 0x105   :  { %v1616_v63 = vmul.f32 0.2, %v1138_v49  ;;  %vm1403_vm8 = vcmp.ge.f32.partialorder %v861_v50, 0.0  ;;  %v1547_v2 = vmul.f32 0.2, %v861_v50  ;;  %vm1475_vm9 = vcmp.ge.f32.partialorder %v1149_v51, 0.0 }
 0x106   :  { %v1619_v3 = vmul.f32 0.2, %v1149_v51  ;;  %2483 = vst.msk [vmem:[%s4688_s3 + $0x148] sm:$0xf] %vm2400_vm2, %v2925_v61  ;;  %2409 = vst.msk [vmem:[%s4688_s3 + $0x20] sm:$0xf] %vm2400_vm2, %v2851_v62  ;;  %v1162_v18 = vadd.f32 %v3160_v53, %v3634_v14  ;;  %v866_v22 = vadd.f32 %v3634_v14, %v865_v54  ;;  %v1154_v23 = vadd.f32 %v3634_v14, %v1153_v59 }
 0x107   :  { %v1760_v4 = vsel %vm1472_vm7, %v1138_v49, %v1616_v63  ;;  %vm1401_vm10 = vcmp.ge.f32.partialorder %v853_v52, 0.0  ;;  %v1545_v5 = vmul.f32 0.2, %v853_v52  ;;  %vm1473_vm11 = vcmp.ge.f32.partialorder %v1141_v57, 0.0  ;;  %v1156_v6 = vpop.f32.mrb[15].mxu1 }
 0x108   :  { %v2923_v7 = vpack.c.bf16 %v1760_v4, %v1760_v4  ;;  %v1691_v8 = vsel %vm1403_vm8, %v861_v50, %v1547_v2  ;;  %v1763_v9 = vsel %vm1475_vm9, %v1149_v51, %v1619_v3  ;;  %v1617_v10 = vmul.f32 0.2, %v1141_v57 }
 0x109   :  { %v2854_v11 = vpack.c.bf16 %v1691_v8, %v1691_v8  ;;  %v2926_v12 = vpack.c.bf16 %v1763_v9, %v1763_v9  ;;  %v1689_v13 = vsel %vm1401_vm10, %v853_v52, %v1545_v5  ;;  %vm1406_vm12 = vcmp.ge.f32.partialorder %v874_v58, 0.0  ;;  %v3092_v19 = vpop.f32.mrb[16].mxu0  ;;  %v3164_v20 = vpop.f32.mrb[16].mxu1 }
 0x10a   :  { %2481 = vst.msk [vmem:[%s4688_s3 + $0x140] sm:$0xf] %vm2400_vm2, %v2923_v7  ;;  %v2852_v15 = vpack.c.bf16 %v1689_v13, %v1689_v13  ;;  %v1761_v16 = vsel %vm1473_vm11, %v1141_v57, %v1617_v10  ;;  %v1550_v17 = vmul.f32 0.2, %v874_v58  ;;  %v877_v24 = vadd.f32 %v3089_v60, %v3634_v14  ;;  %v881_v25 = vpop.f32.mrb[17].mxu0  ;;  %v1169_v26 = vpop.f32.mrb[17].mxu1 }
 0x10b   :  { %2412 = vst.msk [vmem:[%s4688_s3 + $0x2c] sm:$0xf] %vm2400_vm2, %v2854_v11  ;;  %2484 = vst.msk [vmem:[%s4688_s3 + $0x14c] sm:$0xf] %vm2400_vm2, %v2926_v12  ;;  %v2924_v21 = vpack.c.bf16 %v1761_v16, %v1761_v16  ;;  %vm1478_vm13 = vcmp.ge.f32.partialorder %v1162_v18, 0.0  ;;  %v1165_v29 = vadd.f32 %v3161_v0, %v3634_v14  ;;  %v3760_v30 = vpop.f32.mrb[18].mxu0  ;;  %v869_v45 = vadd.f32 %v3634_v14, %v868_v1 }
 0x10c   :  { %2410 = vst.msk [vmem:[%s4688_s3 + $0x24] sm:$0xf] %vm2400_vm2, %v2852_v15  ;;  %v1694_v27 = vsel %vm1406_vm12, %v874_v58, %v1550_v17  ;;  %v1622_v28 = vmul.f32 0.2, %v1162_v18  ;;  %v3762_v31 = vpop.f32.mrb[18].mxu1  ;;  %vm1404_vm14 = vcmp.ge.f32.partialorder %v866_v22, 0.0  ;;  %v1157_v49 = vadd.f32 %v3634_v14, %v1156_v6 }
 0x10d   :  { %2482 = vst.msk [vmem:[%s4688_s3 + $0x144] sm:$0xf] %vm2400_vm2, %v2924_v21  ;;  %v2857_v32 = vpack.c.bf16 %v1694_v27, %v1694_v27  ;;  %v1548_v33 = vmul.f32 0.2, %v866_v22  ;;  %vm1476_vm15 = vcmp.ge.f32.partialorder %v1154_v23, 0.0  ;;  %v3768_v34 = vpop.f32.mrb[19].mxu0  ;;  %v890_v52 = vadd.f32 %v3092_v19, %v3634_v14 }
 0x10e   :  { %v3770_v35 = vpop.f32.mrb[19].mxu1  ;;  %v1766_v36 = vsel %vm1478_vm13, %v1162_v18, %v1622_v28  ;;  %v1620_v37 = vmul.f32 0.2, %v1154_v23  ;;  %vm1407_vm0 = vcmp.ge.f32.partialorder %v877_v24, 0.0  ;;  %v1551_v38 = vmul.f32 0.2, %v877_v24 }
 0x10f   :  { %2415 = vst.msk [vmem:[%s4688_s3 + $0x38] sm:$0xf] %vm2400_vm2, %v2857_v32  ;;  %v2929_v39 = vpack.c.bf16 %v1766_v36, %v1766_v36  ;;  %v1692_v40 = vsel %vm1404_vm14, %v866_v22, %v1548_v33  ;;  %vm1479_vm1 = vcmp.ge.f32.partialorder %v1165_v29, 0.0  ;;  %v1623_v41 = vmul.f32 0.2, %v1165_v29 }
 0x110   :  { %v2855_v42 = vpack.c.bf16 %v1692_v40, %v1692_v40  ;;  %v1764_v43 = vsel %vm1476_vm15, %v1154_v23, %v1620_v37  ;;  %v1695_v44 = vsel %vm1407_vm0, %v877_v24, %v1551_v38  ;;  %vm1405_vm3 = vcmp.ge.f32.partialorder %v869_v45, 0.0 }
 0x111   :  { %2487 = vst.msk [vmem:[%s4688_s3 + $0x158] sm:$0xf] %vm2400_vm2, %v2929_v39  ;;  %v2927_v46 = vpack.c.bf16 %v1764_v43, %v1764_v43  ;;  %v2858_v47 = vpack.c.bf16 %v1695_v44, %v1695_v44  ;;  %v1767_v48 = vsel %vm1479_vm1, %v1165_v29, %v1623_v41  ;;  %v1549_v51 = vmul.f32 0.2, %v869_v45  ;;  %v3096_v53 = vpop.f32.mrb[20].mxu0  ;;  %v3168_v54 = vpop.f32.mrb[20].mxu1 }
 0x112   :  { %2413 = vst.msk [vmem:[%s4688_s3 + $0x30] sm:$0xf] %vm2400_vm2, %v2855_v42  ;;  %v2930_v50 = vpack.c.bf16 %v1767_v48, %v1767_v48  ;;  %vm1477_vm4 = vcmp.ge.f32.partialorder %v1157_v49, 0.0  ;;  %v1621_v55 = vmul.f32 0.2, %v1157_v49  ;;  %v1178_v56 = vadd.f32 %v3164_v20, %v3634_v14  ;;  %v897_v58 = vpop.f32.mrb[21].mxu0 }
 0x113   :  { %2485 = vst.msk [vmem:[%s4688_s3 + $0x150] sm:$0xf] %vm2400_vm2, %v2927_v46  ;;  %2416 = vst.msk [vmem:[%s4688_s3 + $0x3c] sm:$0xf] %vm2400_vm2, %v2858_v47  ;;  %v882_v57 = vadd.f32 %v3634_v14, %v881_v25  ;;  %v3797_v59 = vpop.f32.mrb[21].mxu1  ;;  %v1693_v60 = vsel %vm1405_vm3, %v869_v45, %v1549_v51  ;;  %vm1410_vm5 = vcmp.ge.f32.partialorder %v890_v52, 0.0  ;;  %v1170_v62 = vadd.f32 %v3634_v14, %v1169_v26 }
 0x114   :  { %2488 = vst.msk [vmem:[%s4688_s3 + $0x15c] sm:$0xf] %vm2400_vm2, %v2930_v50  ;;  %v1554_v61 = vmul.f32 0.2, %v890_v52  ;;  %v3804_v63 = vpop.f32.mrb[22].mxu0  ;;  %v3806_v0 = vpop.f32.mrb[22].mxu1  ;;  %v2856_v1 = vpack.c.bf16 %v1693_v60, %v1693_v60  ;;  %v1765_v2 = vsel %vm1477_vm4, %v1157_v49, %v1621_v55  ;;  %v893_v15 = vadd.f32 %v3760_v30, %v3634_v14 }
 0x115   :  { %vm1482_vm6 = vcmp.ge.f32.partialorder %v1178_v56, 0.0  ;;  %v1626_v3 = vmul.f32 0.2, %v1178_v56  ;;  %v3808_v4 = vpop.f32.mrb[23].mxu0  ;;  %v3810_v5 = vpop.f32.mrb[23].mxu1  ;;  %v2928_v6 = vpack.c.bf16 %v1765_v2, %v1765_v2  ;;  %vm1408_vm7 = vcmp.ge.f32.partialorder %v882_v57, 0.0 }
 0x116   :  { %v1698_v7 = vsel %vm1410_vm5, %v890_v52, %v1554_v61  ;;  %v1552_v8 = vmul.f32 0.2, %v882_v57  ;;  %2414 = vst.msk [vmem:[%s4688_s3 + $0x34] sm:$0xf] %vm2400_vm2, %v2856_v1  ;;  %vm1480_vm8 = vcmp.ge.f32.partialorder %v1170_v62, 0.0  ;;  %v1181_v16 = vadd.f32 %v3762_v31, %v3634_v14 }
 0x117   :  { %v2861_v9 = vpack.c.bf16 %v1698_v7, %v1698_v7  ;;  %v1770_v10 = vsel %vm1482_vm6, %v1178_v56, %v1626_v3  ;;  %v1624_v11 = vmul.f32 0.2, %v1170_v62  ;;  %2486 = vst.msk [vmem:[%s4688_s3 + $0x154] sm:$0xf] %vm2400_vm2, %v2928_v6  ;;  %v885_v19 = vadd.f32 %v3634_v14, %v3768_v34 }
 0x118   :  { %v2933_v12 = vpack.c.bf16 %v1770_v10, %v1770_v10  ;;  %v1696_v13 = vsel %vm1408_vm7, %v882_v57, %v1552_v8  ;;  %v1173_v20 = vadd.f32 %v3634_v14, %v3770_v35  ;;  %vm1411_vm9 = vcmp.ge.f32.partialorder %v893_v15, 0.0 }
 0x119   :  { %2419 = vst.msk [vmem:[%s4688_s3 + $0x48] sm:$0xf] %vm2400_vm2, %v2861_v9  ;;  %v2859_v17 = vpack.c.bf16 %v1696_v13, %v1696_v13  ;;  %v1768_v18 = vsel %vm1480_vm8, %v1170_v62, %v1624_v11  ;;  %v1555_v22 = vmul.f32 0.2, %v893_v15  ;;  %vm1483_vm10 = vcmp.ge.f32.partialorder %v1181_v16, 0.0  ;;  %v3836_v23 = vpop.f32.mrb[24].mxu0 }
 0x11a   :  { %2491 = vst.msk [vmem:[%s4688_s3 + $0x168] sm:$0xf] %vm2400_vm2, %v2933_v12  ;;  %v2931_v21 = vpack.c.bf16 %v1768_v18, %v1768_v18  ;;  %v3838_v24 = vpop.f32.mrb[24].mxu1  ;;  %v1627_v25 = vmul.f32 0.2, %v1181_v16  ;;  %vm1409_vm11 = vcmp.ge.f32.partialorder %v885_v19, 0.0  ;;  %v906_v29 = vadd.f32 %v3096_v53, %v3634_v14 }
 0x11b   :  { %2417 = vst.msk [vmem:[%s4688_s3 + $0x40] sm:$0xf] %vm2400_vm2, %v2859_v17  ;;  %v1553_v26 = vmul.f32 0.2, %v885_v19  ;;  %vm1481_vm12 = vcmp.ge.f32.partialorder %v1173_v20, 0.0  ;;  %v1699_v27 = vsel %vm1411_vm9, %v893_v15, %v1555_v22  ;;  %v1194_v30 = vadd.f32 %v3168_v54, %v3634_v14  ;;  %v3850_v31 = vpop.f32.mrb[25].mxu0 }
 0x11c   :  { %2489 = vst.msk [vmem:[%s4688_s3 + $0x160] sm:$0xf] %vm2400_vm2, %v2931_v21  ;;  %v1625_v28 = vmul.f32 0.2, %v1173_v20  ;;  %v3852_v32 = vpop.f32.mrb[25].mxu1  ;;  %v2862_v33 = vpack.c.bf16 %v1699_v27, %v1699_v27  ;;  %v1771_v34 = vsel %vm1483_vm10, %v1181_v16, %v1627_v25  ;;  %v898_v36 = vadd.f32 %v3634_v14, %v897_v58  ;;  %v3856_v37 = vpop.f32.mrb[26].mxu0 }
 0x11d   :  { %v1697_v35 = vsel %vm1409_vm11, %v885_v19, %v1553_v26  ;;  %v3858_v38 = vpop.f32.mrb[26].mxu1  ;;  %v2934_v39 = vpack.c.bf16 %v1771_v34, %v1771_v34  ;;  %vm1414_vm13 = vcmp.ge.f32.partialorder %v906_v29, 0.0  ;;  %v3861_v42 = vpop.f32.mrb[27].mxu0  ;;  %v1558_v45 = vmul.f32 0.2, %v906_v29 }
 0x11e   :  { %v2860_v40 = vpack.c.bf16 %v1697_v35, %v1697_v35  ;;  %v1769_v41 = vsel %vm1481_vm12, %v1173_v20, %v1625_v28  ;;  %v3863_v43 = vpop.f32.mrb[27].mxu1  ;;  %2420 = vst.msk [vmem:[%s4688_s3 + $0x4c] sm:$0xf] %vm2400_vm2, %v2862_v33  ;;  %vm1486_vm14 = vcmp.ge.f32.partialorder %v1194_v30, 0.0  ;;  %v1630_v46 = vmul.f32 0.2, %v1194_v30 }
 0x11f   :  { %v2932_v44 = vpack.c.bf16 %v1769_v41, %v1769_v41  ;;  %2492 = vst.msk [vmem:[%s4688_s3 + $0x16c] sm:$0xf] %vm2400_vm2, %v2934_v39  ;;  %vm1412_vm15 = vcmp.ge.f32.partialorder %v898_v36, 0.0  ;;  %v1556_v47 = vmul.f32 0.2, %v898_v36  ;;  %v1186_v48 = vadd.f32 %v3634_v14, %v3797_v59 }
 0x120   :  { %2418 = vst.msk [vmem:[%s4688_s3 + $0x44] sm:$0xf] %vm2400_vm2, %v2860_v40  ;;  %v909_v49 = vadd.f32 %v3804_v63, %v3634_v14  ;;  %v1702_v50 = vsel %vm1414_vm13, %v906_v29, %v1558_v45  ;;  %v1774_v51 = vsel %vm1486_vm14, %v1194_v30, %v1630_v46  ;;  %v1197_v52 = vadd.f32 %v3806_v0, %v3634_v14 }
 0x121   :  { %2490 = vst.msk [vmem:[%s4688_s3 + $0x164] sm:$0xf] %vm2400_vm2, %v2932_v44  ;;  %v901_v53 = vadd.f32 %v3634_v14, %v3808_v4  ;;  %v2865_v54 = vpack.c.bf16 %v1702_v50, %v1702_v50  ;;  %v2937_v55 = vpack.c.bf16 %v1774_v51, %v1774_v51  ;;  %v1700_v56 = vsel %vm1412_vm15, %v898_v36, %v1556_v47  ;;  %v3889_v57 = vpop.f32.mrb[28].mxu0  ;;  %v3891_v58 = vpop.f32.mrb[28].mxu1 }
 0x122   :  { %vm1484_vm0 = vcmp.ge.f32.partialorder %v1186_v48, 0.0  ;;  %v2863_v59 = vpack.c.bf16 %v1700_v56, %v1700_v56  ;;  %v1628_v60 = vmul.f32 0.2, %v1186_v48  ;;  %vm1415_vm1 = vcmp.ge.f32.partialorder %v909_v49, 0.0  ;;  %v3893_v62 = vpop.f32.mrb[29].mxu0  ;;  %v3911_v6 = vpop.f32.mrb[29].mxu1 }
 0x123   :  { %v1559_v61 = vmul.f32 0.2, %v909_v49  ;;  %2423 = vst.msk [vmem:[%s4688_s3 + $0x58] sm:$0xf] %vm2400_vm2, %v2865_v54  ;;  %2495 = vst.msk [vmem:[%s4688_s3 + $0x178] sm:$0xf] %vm2400_vm2, %v2937_v55  ;;  %v1189_v3 = vadd.f32 %v3634_v14, %v3810_v5  ;;  %v922_v4 = vadd.f32 %v3836_v23, %v3634_v14  ;;  %v1210_v19 = vadd.f32 %v3838_v24, %v3634_v14 }
 0x124   :  { %vm1487_vm3 = vcmp.ge.f32.partialorder %v1197_v52, 0.0  ;;  %v1631_v63 = vmul.f32 0.2, %v1197_v52  ;;  %vm1413_vm4 = vcmp.ge.f32.partialorder %v901_v53, 0.0  ;;  %v1557_v0 = vmul.f32 0.2, %v901_v53 }
 0x125   :  { %2421 = vst.msk [vmem:[%s4688_s3 + $0x50] sm:$0xf] %vm2400_vm2, %v2863_v59  ;;  %v1772_v1 = vsel %vm1484_vm0, %v1186_v48, %v1628_v60  ;;  %v1703_v2 = vsel %vm1415_vm1, %v909_v49, %v1559_v61  ;;  %v3913_v7 = vpop.f32.mrb[30].mxu0  ;;  %v3915_v12 = vpop.f32.mrb[30].mxu1  ;;  %vm1485_vm5 = vcmp.ge.f32.partialorder %v1189_v3, 0.0  ;;  %vm1418_vm6 = vcmp.ge.f32.partialorder %v922_v4, 0.0 }
 0x126   :  { %v2935_v8 = vpack.c.bf16 %v1772_v1, %v1772_v1  ;;  %v2866_v9 = vpack.c.bf16 %v1703_v2, %v1703_v2  ;;  %v1775_v10 = vsel %vm1487_vm3, %v1197_v52, %v1631_v63  ;;  %v1701_v11 = vsel %vm1413_vm4, %v901_v53, %v1557_v0  ;;  %v3917_v13 = vpop.f32.mrb[31].mxu0  ;;  %v3919_v5 = vpop.f32.mrb[31].mxu1 }
 0x127   :  { %v2938_v15 = vpack.c.bf16 %v1775_v10, %v1775_v10  ;;  %v2864_v16 = vpack.c.bf16 %v1701_v11, %v1701_v11  ;;  %v1629_v17 = vmul.f32 0.2, %v1189_v3  ;;  %v1562_v18 = vmul.f32 0.2, %v922_v4 }
 0x128   :  { %2493 = vst.msk [vmem:[%s4688_s3 + $0x170] sm:$0xf] %vm2400_vm2, %v2935_v8  ;;  %2424 = vst.msk [vmem:[%s4688_s3 + $0x5c] sm:$0xf] %vm2400_vm2, %v2866_v9  ;;  %v914_v20 = vadd.f32 %v3634_v14, %v3850_v31  ;;  %v1202_v22 = vadd.f32 %v3634_v14, %v3852_v32  ;;  %v925_v23 = vadd.f32 %v3856_v37, %v3634_v14  ;;  %vm1490_vm7 = vcmp.ge.f32.partialorder %v1210_v19, 0.0 }
 0x129   :  { %2496 = vst.msk [vmem:[%s4688_s3 + $0x17c] sm:$0xf] %vm2400_vm2, %v2938_v15  ;;  %2422 = vst.msk [vmem:[%s4688_s3 + $0x54] sm:$0xf] %vm2400_vm2, %v2864_v16  ;;  %v1773_v21 = vsel %vm1485_vm5, %v1189_v3, %v1629_v17  ;;  %v1213_v24 = vadd.f32 %v3858_v38, %v3634_v14  ;;  %v1706_v26 = vsel %vm1418_vm6, %v922_v4, %v1562_v18  ;;  %v1634_v27 = vmul.f32 0.2, %v1210_v19 }
 0x12a   :  { %v2936_v25 = vpack.c.bf16 %v1773_v21, %v1773_v21  ;;  %v3947_v28 = vpop.f32.mrb[32].mxu0  ;;  %v3949_v29 = vpop.f32.mrb[32].mxu1  ;;  %v2869_v30 = vpack.c.bf16 %v1706_v26, %v1706_v26  ;;  %vm1416_vm8 = vcmp.ge.f32.partialorder %v914_v20, 0.0  ;;  %v1560_v31 = vmul.f32 0.2, %v914_v20 }
 0x12b   :  { %vm1488_vm9 = vcmp.ge.f32.partialorder %v1202_v22, 0.0  ;;  %v3951_v33 = vpop.f32.mrb[33].mxu0  ;;  %v3953_v32 = vpop.f32.mrb[33].mxu1  ;;  %v1778_v34 = vsel %vm1490_vm7, %v1210_v19, %v1634_v27  ;;  %v1632_v35 = vmul.f32 0.2, %v1202_v22  ;;  %vm1419_vm10 = vcmp.ge.f32.partialorder %v925_v23, 0.0 }
 0x12c   :  { %2494 = vst.msk [vmem:[%s4688_s3 + $0x174] sm:$0xf] %vm2400_vm2, %v2936_v25  ;;  %v1563_v36 = vmul.f32 0.2, %v925_v23  ;;  %v3959_v37 = vpop.f32.mrb[34].mxu0  ;;  %v2941_v38 = vpack.c.bf16 %v1778_v34, %v1778_v34  ;;  %v1704_v39 = vsel %vm1416_vm8, %v914_v20, %v1560_v31  ;;  %vm1491_vm11 = vcmp.ge.f32.partialorder %v1213_v24, 0.0 }
 0x12d   :  { %2427 = vst.msk [vmem:[%s4688_s3 + $0x68] sm:$0xf] %vm2400_vm2, %v2869_v30  ;;  %v1635_v40 = vmul.f32 0.2, %v1213_v24  ;;  %v3965_v41 = vpop.f32.mrb[34].mxu1  ;;  %v3967_v44 = vpop.f32.mrb[35].mxu0  ;;  %v2867_v45 = vpack.c.bf16 %v1704_v39, %v1704_v39  ;;  %v1776_v46 = vsel %vm1488_vm9, %v1202_v22, %v1632_v35  ;;  %v917_v48 = vadd.f32 %v3634_v14, %v3861_v42 }
 0x12e   :  { %v1707_v47 = vsel %vm1419_vm10, %v925_v23, %v1563_v36  ;;  %v3972_v49 = vpop.f32.mrb[35].mxu1  ;;  %2499 = vst.msk [vmem:[%s4688_s3 + $0x188] sm:$0xf] %vm2400_vm2, %v2941_v38  ;;  %v2939_v50 = vpack.c.bf16 %v1776_v46, %v1776_v46  ;;  %v1205_v53 = vadd.f32 %v3634_v14, %v3863_v43  ;;  %v938_v55 = vadd.f32 %v3889_v57, %v3634_v14 }
 0x12f   :  { %v2870_v51 = vpack.c.bf16 %v1707_v47, %v1707_v47  ;;  %v1779_v52 = vsel %vm1491_vm11, %v1213_v24, %v1635_v40  ;;  %2425 = vst.msk [vmem:[%s4688_s3 + $0x60] sm:$0xf] %vm2400_vm2, %v2867_v45  ;;  %vm1417_vm12 = vcmp.ge.f32.partialorder %v917_v48, 0.0  ;;  %v1561_v42 = vmul.f32 0.2, %v917_v48 }
 0x130   :  { %v2942_v54 = vpack.c.bf16 %v1779_v52, %v1779_v52  ;;  %2497 = vst.msk [vmem:[%s4688_s3 + $0x180] sm:$0xf] %vm2400_vm2, %v2939_v50  ;;  %vm1489_vm13 = vcmp.ge.f32.partialorder %v1205_v53, 0.0  ;;  %v1633_v43 = vmul.f32 0.2, %v1205_v53  ;;  %v1226_v56 = vadd.f32 %v3891_v58, %v3634_v14 }
 0x131   :  { %2428 = vst.msk [vmem:[%s4688_s3 + $0x6c] sm:$0xf] %vm2400_vm2, %v2870_v51  ;;  %v930_v59 = vadd.f32 %v3634_v14, %v3893_v62  ;;  %v1705_v57 = vsel %vm1417_vm12, %v917_v48, %v1561_v42  ;;  %vm1422_vm14 = vcmp.ge.f32.partialorder %v938_v55, 0.0  ;;  %v1566_v60 = vmul.f32 0.2, %v938_v55  ;;  %v4004_v63 = vpop.f32.mrb[36].mxu0 }
 0x132   :  { %2500 = vst.msk [vmem:[%s4688_s3 + $0x18c] sm:$0xf] %vm2400_vm2, %v2942_v54  ;;  %v1218_v61 = vadd.f32 %v3634_v14, %v3911_v6  ;;  %v4006_v0 = vpop.f32.mrb[36].mxu1  ;;  %v2868_v1 = vpack.c.bf16 %v1705_v57, %v1705_v57  ;;  %v1777_v58 = vsel %vm1489_vm13, %v1205_v53, %v1633_v43  ;;  %vm1494_vm15 = vcmp.ge.f32.partialorder %v1226_v56, 0.0  ;;  %v4008_v62 = vpop.f32.mrb[37].mxu0 }
 0x133   :  { %v1638_v2 = vmul.f32 0.2, %v1226_v56  ;;  %v4010_v3 = vpop.f32.mrb[37].mxu1  ;;  %v2940_v4 = vpack.c.bf16 %v1777_v58, %v1777_v58  ;;  %v1710_v8 = vsel %vm1422_vm14, %v938_v55, %v1566_v60  ;;  %vm1420_vm0 = vcmp.ge.f32.partialorder %v930_v59, 0.0  ;;  %v4012_v10 = vpop.f32.mrb[38].mxu0 }
 0x134   :  { %v1564_v9 = vmul.f32 0.2, %v930_v59  ;;  %v4014_v11 = vpop.f32.mrb[38].mxu1  ;;  %2426 = vst.msk [vmem:[%s4688_s3 + $0x64] sm:$0xf] %vm2400_vm2, %v2868_v1  ;;  %v2873_v6 = vpack.c.bf16 %v1710_v8, %v1710_v8  ;;  %vm1492_vm1 = vcmp.ge.f32.partialorder %v1218_v61, 0.0  ;;  %v941_v21 = vadd.f32 %v3913_v7, %v3634_v14 }
 0x135   :  { %v1782_v15 = vsel %vm1494_vm15, %v1226_v56, %v1638_v2  ;;  %v1636_v16 = vmul.f32 0.2, %v1218_v61  ;;  %v4020_v17 = vpop.f32.mrb[39].mxu0  ;;  %v4022_v18 = vpop.f32.mrb[39].mxu1  ;;  %2498 = vst.msk [vmem:[%s4688_s3 + $0x184] sm:$0xf] %vm2400_vm2, %v2940_v4  ;;  %v1229_v22 = vadd.f32 %v3915_v12, %v3634_v14  ;;  %v933_v25 = vadd.f32 %v3634_v14, %v3917_v13 }
 0x136   :  { %v2945_v19 = vpack.c.bf16 %v1782_v15, %v1782_v15  ;;  %v1708_v20 = vsel %vm1420_vm0, %v930_v59, %v1564_v9  ;;  %2431 = vst.msk [vmem:[%s4688_s3 + $0x78] sm:$0xf] %vm2400_vm2, %v2873_v6  ;;  %v1221_v26 = vadd.f32 %v3634_v14, %v3919_v5  ;;  %vm1423_vm3 = vcmp.ge.f32.partialorder %v941_v21, 0.0 }
 0x137   :  { %v2871_v23 = vpack.c.bf16 %v1708_v20, %v1708_v20  ;;  %v1780_v24 = vsel %vm1492_vm1, %v1218_v61, %v1636_v16  ;;  %v1567_v12 = vmul.f32 0.2, %v941_v21  ;;  %vm1495_vm4 = vcmp.ge.f32.partialorder %v1229_v22, 0.0 }
 0x138   :  { %2503 = vst.msk [vmem:[%s4688_s3 + $0x198] sm:$0xf] %vm2400_vm2, %v2945_v19  ;;  %v2943_v7 = vpack.c.bf16 %v1780_v24, %v1780_v24  ;;  %v1639_v27 = vmul.f32 0.2, %v1229_v22  ;;  %vm1421_vm5 = vcmp.ge.f32.partialorder %v933_v25, 0.0  ;;  %vm1493_vm6 = vcmp.ge.f32.partialorder %v1221_v26, 0.0 }
 0x139   :  { %2429 = vst.msk [vmem:[%s4688_s3 + $0x70] sm:$0xf] %vm2400_vm2, %v2871_v23  ;;  %v1565_v13 = vmul.f32 0.2, %v933_v25  ;;  %v1711_v5 = vsel %vm1423_vm3, %v941_v21, %v1567_v12  ;;  %v1637_v30 = vmul.f32 0.2, %v1221_v26  ;;  %v954_v31 = vadd.f32 %v3947_v28, %v3634_v14 }
 0x13a   :  { %2501 = vst.msk [vmem:[%s4688_s3 + $0x190] sm:$0xf] %vm2400_vm2, %v2943_v7  ;;  %v1242_v34 = vadd.f32 %v3949_v29, %v3634_v14  ;;  %v4056_v35 = vpop.f32.mrb[40].mxu0  ;;  %v4058_v36 = vpop.f32.mrb[40].mxu1  ;;  %v2874_v38 = vpack.c.bf16 %v1711_v5, %v1711_v5  ;;  %v1783_v39 = vsel %vm1495_vm4, %v1229_v22, %v1639_v27  ;;  %v946_v45 = vadd.f32 %v3634_v14, %v3951_v33 }
 0x13b   :  { %v1709_v40 = vsel %vm1421_vm5, %v933_v25, %v1565_v13  ;;  %v4062_v46 = vpop.f32.mrb[41].mxu0  ;;  %v4064_v47 = vpop.f32.mrb[41].mxu1  ;;  %v2946_v48 = vpack.c.bf16 %v1783_v39, %v1783_v39  ;;  %v1781_v28 = vsel %vm1493_vm6, %v1221_v26, %v1637_v30  ;;  %vm1426_vm7 = vcmp.ge.f32.partialorder %v954_v31, 0.0 }
 0x13c   :  { %v2872_v50 = vpack.c.bf16 %v1709_v40, %v1709_v40  ;;  %v4067_v29 = vpop.f32.mrb[42].mxu0  ;;  %v4069_v51 = vpop.f32.mrb[42].mxu1  ;;  %2432 = vst.msk [vmem:[%s4688_s3 + $0x7c] sm:$0xf] %vm2400_vm2, %v2874_v38  ;;  %v2944_v52 = vpack.c.bf16 %v1781_v28, %v1781_v28  ;;  %v1570_v33 = vmul.f32 0.2, %v954_v31  ;;  %v1234_v55 = vadd.f32 %v3634_v14, %v3953_v32 }
 0x13d   :  { %vm1498_vm8 = vcmp.ge.f32.partialorder %v1242_v34, 0.0  ;;  %v1642_v53 = vmul.f32 0.2, %v1242_v34  ;;  %v4075_v54 = vpop.f32.mrb[43].mxu0  ;;  %2504 = vst.msk [vmem:[%s4688_s3 + $0x19c] sm:$0xf] %vm2400_vm2, %v2946_v48  ;;  %v957_v43 = vadd.f32 %v3959_v37, %v3634_v14  ;;  %v1245_v60 = vadd.f32 %v3965_v41, %v3634_v14 }
 0x13e   :  { %2430 = vst.msk [vmem:[%s4688_s3 + $0x74] sm:$0xf] %vm2400_vm2, %v2872_v50  ;;  %vm1424_vm9 = vcmp.ge.f32.partialorder %v946_v45, 0.0  ;;  %v1568_v42 = vmul.f32 0.2, %v946_v45  ;;  %v4089_v56 = vpop.f32.mrb[43].mxu1  ;;  %v1714_v59 = vsel %vm1426_vm7, %v954_v31, %v1570_v33  ;;  %v949_v61 = vadd.f32 %v3634_v14, %v3967_v44 }
 0x13f   :  { %2502 = vst.msk [vmem:[%s4688_s3 + $0x194] sm:$0xf] %vm2400_vm2, %v2944_v52  ;;  %v1786_v57 = vsel %vm1498_vm8, %v1242_v34, %v1642_v53  ;;  %v2877_v32 = vpack.c.bf16 %v1714_v59, %v1714_v59  ;;  %vm1496_vm10 = vcmp.ge.f32.partialorder %v1234_v55, 0.0  ;;  %v1640_v2 = vmul.f32 0.2, %v1234_v55 }
 0x140   :  { %v2949_v1 = vpack.c.bf16 %v1786_v57, %v1786_v57  ;;  %v1712_v58 = vsel %vm1424_vm9, %v946_v45, %v1568_v42  ;;  %vm1427_vm11 = vcmp.ge.f32.partialorder %v957_v43, 0.0  ;;  %v1571_v4 = vmul.f32 0.2, %v957_v43 }
 0x141   :  { %v2875_v37 = vpack.c.bf16 %v1712_v58, %v1712_v58  ;;  %2435 = vst.msk [vmem:[%s4688_s3 + $0x88] sm:$0xf] %vm2400_vm2, %v2877_v32  ;;  %vm1499_vm12 = vcmp.ge.f32.partialorder %v1245_v60, 0.0  ;;  %v1643_v41 = vmul.f32 0.2, %v1245_v60  ;;  %vm1425_vm13 = vcmp.ge.f32.partialorder %v949_v61, 0.0 }
 0x142   :  { %2507 = vst.msk [vmem:[%s4688_s3 + $0x1a8] sm:$0xf] %vm2400_vm2, %v2949_v1  ;;  %v1569_v44 = vmul.f32 0.2, %v949_v61  ;;  %v1784_v8 = vsel %vm1496_vm10, %v1234_v55, %v1640_v2  ;;  %v1715_v9 = vsel %vm1427_vm11, %v957_v43, %v1571_v4  ;;  %v1237_v6 = vadd.f32 %v3634_v14, %v3972_v49  ;;  %v4116_v16 = vpop.f32.mrb[44].mxu0  ;;  %v4118_v19 = vpop.f32.mrb[44].mxu1 }
 0x143   :  { %2433 = vst.msk [vmem:[%s4688_s3 + $0x80] sm:$0xf] %vm2400_vm2, %v2875_v37  ;;  %v970_v15 = vadd.f32 %v4004_v63, %v3634_v14  ;;  %v2947_v20 = vpack.c.bf16 %v1784_v8, %v1784_v8  ;;  %v2878_v21 = vpack.c.bf16 %v1715_v9, %v1715_v9  ;;  %v1787_v22 = vsel %vm1499_vm12, %v1245_v60, %v1643_v41  ;;  %v4120_v24 = vpop.f32.mrb[45].mxu0  ;;  %v4122_v25 = vpop.f32.mrb[45].mxu1  ;;  %v4139_v63 = vld [vmem:[%s4687_s2] ss:$0 sm:$0xff] }
 0x144   :  { %v1713_v23 = vsel %vm1425_vm13, %v949_v61, %v1569_v44  ;;  %v2950_v26 = vpack.c.bf16 %v1787_v22, %v1787_v22  ;;  %vm1497_vm14 = vcmp.ge.f32.partialorder %v1237_v6, 0.0  ;;  %v1641_v12 = vmul.f32 0.2, %v1237_v6  ;;  %v4124_v49 = vpop.f32.mrb[46].mxu0  ;;  %v4126_v27 = vpop.f32.mrb[46].mxu1 }
 0x145   :  { %v2876_v7 = vpack.c.bf16 %v1713_v23, %v1713_v23  ;;  %2505 = vst.msk [vmem:[%s4688_s3 + $0x1a0] sm:$0xf] %vm2400_vm2, %v2947_v20  ;;  %2436 = vst.msk [vmem:[%s4688_s3 + $0x8c] sm:$0xf] %vm2400_vm2, %v2878_v21  ;;  %vm1430_vm15 = vcmp.ge.f32.partialorder %v970_v15, 0.0  ;;  %v1258_v13 = vadd.f32 %v4139_v63, %v4006_v0  ;;  %v962_v5 = vadd.f32 %v4139_v63, %v4008_v62  ;;  %v4145_v30 = vpop.f32.mrb[47].mxu0 }
 0x146   :  { %v1574_v14 = vmul.f32 0.2, %v970_v15  ;;  %v4147_v31 = vpop.f32.mrb[47].mxu1  ;;  %2508 = vst.msk [vmem:[%s4688_s3 + $0x1ac] sm:$0xf] %vm2400_vm2, %v2950_v26  ;;  %v1785_v34 = vsel %vm1497_vm14, %v1237_v6, %v1641_v12  ;;  %v1250_v0 = vadd.f32 %v4139_v63, %v4010_v3  ;;  %v973_v62 = vadd.f32 %v4139_v63, %v4012_v10 }
 0x147   :  { %2434 = vst.msk [vmem:[%s4688_s3 + $0x84] sm:$0xf] %vm2400_vm2, %v2876_v7  ;;  %v1261_v38 = vadd.f32 %v4139_v63, %v4014_v11  ;;  %v2948_v39 = vpack.c.bf16 %v1785_v34, %v1785_v34  ;;  %vm1502_vm0 = vcmp.ge.f32.partialorder %v1258_v13, 0.0  ;;  %v1646_v45 = vmul.f32 0.2, %v1258_v13 }
 0x148   :  { %v1718_v40 = vsel %vm1430_vm15, %v970_v15, %v1574_v14  ;;  %vm1428_vm1 = vcmp.ge.f32.partialorder %v962_v5, 0.0  ;;  %v1572_v50 = vmul.f32 0.2, %v962_v5  ;;  %vm1500_vm3 = vcmp.ge.f32.partialorder %v1250_v0, 0.0 }
 0x149   :  { %v2881_v48 = vpack.c.bf16 %v1718_v40, %v1718_v40  ;;  %2506 = vst.msk [vmem:[%s4688_s3 + $0x1a4] sm:$0xf] %vm2400_vm2, %v2948_v39  ;;  %v1790_v3 = vsel %vm1502_vm0, %v1258_v13, %v1646_v45  ;;  %v1644_v28 = vmul.f32 0.2, %v1250_v0  ;;  %vm1431_vm4 = vcmp.ge.f32.partialorder %v973_v62, 0.0  ;;  %v4167_v52 = vpop.f32.mrb[48].mxu0 }
 0x14a   :  { %v1575_v10 = vmul.f32 0.2, %v973_v62  ;;  %v2953_v11 = vpack.c.bf16 %v1790_v3, %v1790_v3  ;;  %v1716_v33 = vsel %vm1428_vm1, %v962_v5, %v1572_v50  ;;  %vm1503_vm5 = vcmp.ge.f32.partialorder %v1261_v38, 0.0  ;;  %v4173_v42 = vpop.f32.mrb[48].mxu1  ;;  %v4175_v55 = vpop.f32.mrb[49].mxu0 }
 0x14b   :  { %2439 = vst.msk [vmem:[%s4688_s3 + $0x98] sm:$0xf] %vm2400_vm2, %v2881_v48  ;;  %v1647_v53 = vmul.f32 0.2, %v1261_v38  ;;  %v2879_v43 = vpack.c.bf16 %v1716_v33, %v1716_v33  ;;  %v1788_v59 = vsel %vm1500_vm3, %v1250_v0, %v1644_v28  ;;  %v965_v60 = vadd.f32 %v4139_v63, %v4020_v17  ;;  %v4179_v61 = vpop.f32.mrb[49].mxu1  ;;  %v4181_v32 = vpop.f32.mrb[50].mxu0 }
 0x14c   :  { %v1719_v57 = vsel %vm1431_vm4, %v973_v62, %v1575_v10  ;;  %2511 = vst.msk [vmem:[%s4688_s3 + $0x1b8] sm:$0xf] %vm2400_vm2, %v2953_v11  ;;  %v2951_v1 = vpack.c.bf16 %v1788_v59, %v1788_v59  ;;  %v1253_v2 = vadd.f32 %v4139_v63, %v4022_v18  ;;  %v4189_v4 = vpop.f32.mrb[50].mxu1  ;;  %v4191_v41 = vpop.f32.mrb[51].mxu0  ;;  %v986_v8 = vadd.f32 %v4139_v63, %v4056_v35 }
 0x14d   :  { %v2882_v58 = vpack.c.bf16 %v1719_v57, %v1719_v57  ;;  %v1791_v37 = vsel %vm1503_vm5, %v1261_v38, %v1647_v53  ;;  %2437 = vst.msk [vmem:[%s4688_s3 + $0x90] sm:$0xf] %vm2400_vm2, %v2879_v43  ;;  %vm1429_vm6 = vcmp.ge.f32.partialorder %v965_v60, 0.0  ;;  %v1573_v44 = vmul.f32 0.2, %v965_v60  ;;  %v4199_v9 = vpop.f32.mrb[51].mxu1 }
 0x14e   :  { %v2954_v17 = vpack.c.bf16 %v1791_v37, %v1791_v37  ;;  %2509 = vst.msk [vmem:[%s4688_s3 + $0x1b0] sm:$0xf] %vm2400_vm2, %v2951_v1  ;;  %vm1501_vm7 = vcmp.ge.f32.partialorder %v1253_v2, 0.0  ;;  %v1645_v18 = vmul.f32 0.2, %v1253_v2  ;;  %v1274_v6 = vadd.f32 %v4139_v63, %v4058_v36 }
 0x14f   :  { %2440 = vst.msk [vmem:[%s4688_s3 + $0x9c] sm:$0xf] %vm2400_vm2, %v2882_v58  ;;  %v978_v35 = vadd.f32 %v4139_v63, %v4062_v46  ;;  %v1717_v15 = vsel %vm1429_vm6, %v965_v60, %v1573_v44  ;;  %vm1434_vm8 = vcmp.ge.f32.partialorder %v986_v8, 0.0  ;;  %v1578_v20 = vmul.f32 0.2, %v986_v8 }
 0x150   :  { %2512 = vst.msk [vmem:[%s4688_s3 + $0x1bc] sm:$0xf] %vm2400_vm2, %v2954_v17  ;;  %v1266_v21 = vadd.f32 %v4139_v63, %v4064_v47  ;;  %v2880_v22 = vpack.c.bf16 %v1717_v15, %v1717_v15  ;;  %v1789_v23 = vsel %vm1501_vm7, %v1253_v2, %v1645_v18  ;;  %vm1506_vm9 = vcmp.ge.f32.partialorder %v1274_v6, 0.0 }
 0x151   :  { %v1650_v26 = vmul.f32 0.2, %v1274_v6  ;;  %v2952_v7 = vpack.c.bf16 %v1789_v23, %v1789_v23  ;;  %v1722_v36 = vsel %vm1434_vm8, %v986_v8, %v1578_v20  ;;  %vm1432_vm10 = vcmp.ge.f32.partialorder %v978_v35, 0.0  ;;  %v4219_v46 = vpop.f32.mrb[52].mxu0  ;;  %v4221_v14 = vpop.f32.mrb[52].mxu1 }
 0x152   :  { %v1576_v12 = vmul.f32 0.2, %v978_v35  ;;  %2438 = vst.msk [vmem:[%s4688_s3 + $0x94] sm:$0xf] %vm2400_vm2, %v2880_v22  ;;  %v2885_v13 = vpack.c.bf16 %v1722_v36, %v1722_v36  ;;  %vm1504_vm11 = vcmp.ge.f32.partialorder %v1266_v21, 0.0  ;;  %v4227_v34 = vpop.f32.mrb[53].mxu0  ;;  %v989_v39 = vadd.f32 %v4139_v63, %v4067_v29 }
 0x153   :  { %v1794_v5 = vsel %vm1506_vm9, %v1274_v6, %v1650_v26  ;;  %v1648_v47 = vmul.f32 0.2, %v1266_v21  ;;  %v4229_v0 = vpop.f32.mrb[53].mxu1  ;;  %2510 = vst.msk [vmem:[%s4688_s3 + $0x1b4] sm:$0xf] %vm2400_vm2, %v2952_v7  ;;  %v1277_v40 = vadd.f32 %v4139_v63, %v4069_v51  ;;  %v4239_v45 = vpop.f32.mrb[54].mxu0  ;;  %v981_v28 = vadd.f32 %v4139_v63, %v4075_v54 }
 0x154   :  { %v2957_v62 = vpack.c.bf16 %v1794_v5, %v1794_v5  ;;  %v1720_v38 = vsel %vm1432_vm10, %v978_v35, %v1576_v12  ;;  %v4241_v48 = vpop.f32.mrb[54].mxu1  ;;  %2443 = vst.msk [vmem:[%s4688_s3 + $0xa8] sm:$0xf] %vm2400_vm2, %v2885_v13  ;;  %v1269_v29 = vadd.f32 %v4139_v63, %v4089_v56  ;;  %v4251_v10 = vpop.f32.mrb[55].mxu0  ;;  %vm1435_vm12 = vcmp.ge.f32.partialorder %v989_v39, 0.0 }
 0x155   :  { %v2883_v50 = vpack.c.bf16 %v1720_v38, %v1720_v38  ;;  %v1792_v3 = vsel %vm1504_vm11, %v1266_v21, %v1648_v47  ;;  %v4253_v51 = vpop.f32.mrb[55].mxu1  ;;  %v1579_v33 = vmul.f32 0.2, %v989_v39  ;;  %vm1507_vm13 = vcmp.ge.f32.partialorder %v1277_v40, 0.0 }
 0x156   :  { %2515 = vst.msk [vmem:[%s4688_s3 + $0x1c8] sm:$0xf] %vm2400_vm2, %v2957_v62  ;;  %v2955_v11 = vpack.c.bf16 %v1792_v3, %v1792_v3  ;;  %v1651_v54 = vmul.f32 0.2, %v1277_v40  ;;  %vm1433_vm14 = vcmp.ge.f32.partialorder %v981_v28, 0.0  ;;  %vm1505_vm15 = vcmp.ge.f32.partialorder %v1269_v29, 0.0 }
 0x157   :  { %2441 = vst.msk [vmem:[%s4688_s3 + $0xa0] sm:$0xf] %vm2400_vm2, %v2883_v50  ;;  %v1577_v56 = vmul.f32 0.2, %v981_v28  ;;  %v1723_v53 = vsel %vm1435_vm12, %v989_v39, %v1579_v33  ;;  %v1649_v43 = vmul.f32 0.2, %v1269_v29  ;;  %v1002_v59 = vadd.f32 %v4139_v63, %v4116_v16 }
 0x158   :  { %2513 = vst.msk [vmem:[%s4688_s3 + $0x1c0] sm:$0xf] %vm2400_vm2, %v2955_v11  ;;  %v1290_v57 = vadd.f32 %v4139_v63, %v4118_v19  ;;  %v2886_v60 = vpack.c.bf16 %v1723_v53, %v1723_v53  ;;  %v1795_v1 = vsel %vm1507_vm13, %v1277_v40, %v1651_v54  ;;  %v994_v37 = vadd.f32 %v4139_v63, %v4120_v24 }
 0x159   :  { %v1721_v58 = vsel %vm1433_vm14, %v981_v28, %v1577_v56  ;;  %v2958_v2 = vpack.c.bf16 %v1795_v1, %v1795_v1  ;;  %v1793_v44 = vsel %vm1505_vm15, %v1269_v29, %v1649_v43  ;;  %vm1438_vm0 = vcmp.ge.f32.partialorder %v1002_v59, 0.0  ;;  %v4273_v8 = vpop.f32.mrb[56].mxu0  ;;  %v4275_v18 = vpop.f32.mrb[56].mxu1 }
 0x15a   :  { %v2884_v17 = vpack.c.bf16 %v1721_v58, %v1721_v58  ;;  %2444 = vst.msk [vmem:[%s4688_s3 + $0xac] sm:$0xf] %vm2400_vm2, %v2886_v60  ;;  %v2956_v16 = vpack.c.bf16 %v1793_v44, %v1793_v44  ;;  %v1582_v19 = vmul.f32 0.2, %v1002_v59  ;;  %vm1510_vm1 = vcmp.ge.f32.partialorder %v1290_v57, 0.0  ;;  %v4281_v35 = vpop.f32.mrb[57].mxu0 }
 0x15b   :  { %v1654_v6 = vmul.f32 0.2, %v1290_v57  ;;  %2516 = vst.msk [vmem:[%s4688_s3 + $0x1cc] sm:$0xf] %vm2400_vm2, %v2958_v2  ;;  %vm1436_vm3 = vcmp.ge.f32.partialorder %v994_v37, 0.0  ;;  %v1282_v15 = vadd.f32 %v4139_v63, %v4122_v25  ;;  %v1005_v20 = vadd.f32 %v4139_v63, %v4124_v49  ;;  %v4295_v21 = vpop.f32.mrb[57].mxu1 }
 0x15c   :  { %2442 = vst.msk [vmem:[%s4688_s3 + $0xa4] sm:$0xf] %vm2400_vm2, %v2884_v17  ;;  %v1580_v24 = vmul.f32 0.2, %v994_v37  ;;  %v4297_v22 = vpop.f32.mrb[58].mxu0  ;;  %v1726_v23 = vsel %vm1438_vm0, %v1002_v59, %v1582_v19  ;;  %v1293_v7 = vadd.f32 %v4139_v63, %v4126_v27  ;;  %v997_v25 = vadd.f32 %v4139_v63, %v4145_v30  ;;  %v4308_v36 = vpop.f32.mrb[58].mxu1 }
 0x15d   :  { %2514 = vst.msk [vmem:[%s4688_s3 + $0x1c4] sm:$0xf] %vm2400_vm2, %v2956_v16  ;;  %v1798_v26 = vsel %vm1510_vm1, %v1290_v57, %v1654_v6  ;;  %v4310_v49 = vpop.f32.mrb[59].mxu0  ;;  %v2889_v12 = vpack.c.bf16 %v1726_v23, %v1726_v23  ;;  %vm1508_vm4 = vcmp.ge.f32.partialorder %v1282_v15, 0.0  ;;  %v4312_v47 = vpop.f32.mrb[59].mxu1  ;;  %vm1439_vm5 = vcmp.ge.f32.partialorder %v1005_v20, 0.0 }
 0x15e   :  { %v2961_v13 = vpack.c.bf16 %v1798_v26, %v1798_v26  ;;  %v1724_v5 = vsel %vm1436_vm3, %v994_v37, %v1580_v24  ;;  %v1652_v38 = vmul.f32 0.2, %v1282_v15  ;;  %v1583_v39 = vmul.f32 0.2, %v1005_v20 }
 0x15f   :  { %v2887_v62 = vpack.c.bf16 %v1724_v5, %v1724_v5  ;;  %2447 = vst.msk [vmem:[%s4688_s3 + $0xb8] sm:$0xf] %vm2400_vm2, %v2889_v12  ;;  %vm1511_vm6 = vcmp.ge.f32.partialorder %v1293_v7, 0.0  ;;  %v1655_v27 = vmul.f32 0.2, %v1293_v7  ;;  %vm1437_vm7 = vcmp.ge.f32.partialorder %v997_v25, 0.0 }
 0x160   :  { %2519 = vst.msk [vmem:[%s4688_s3 + $0x1d8] sm:$0xf] %vm2400_vm2, %v2961_v13  ;;  %v1581_v30 = vmul.f32 0.2, %v997_v25  ;;  %v1796_v40 = vsel %vm1508_vm4, %v1282_v15, %v1652_v38  ;;  %v1727_v50 = vsel %vm1439_vm5, %v1005_v20, %v1583_v39  ;;  %v1285_v3 = vadd.f32 %v4139_v63, %v4147_v31 }
 0x161   :  { %2445 = vst.msk [vmem:[%s4688_s3 + $0xb0] sm:$0xf] %vm2400_vm2, %v2887_v62  ;;  %v1018_v28 = vadd.f32 %v4139_v63, %v4167_v52  ;;  %v2959_v29 = vpack.c.bf16 %v1796_v40, %v1796_v40  ;;  %v2890_v11 = vpack.c.bf16 %v1727_v50, %v1727_v50  ;;  %v1799_v33 = vsel %vm1511_vm6, %v1293_v7, %v1655_v27  ;;  %v4330_v56 = vpop.f32.mrb[60].mxu0  ;;  %v4332_v53 = vpop.f32.mrb[60].mxu1 }
 0x162   :  { %v1725_v54 = vsel %vm1437_vm7, %v997_v25, %v1581_v30  ;;  %v2962_v43 = vpack.c.bf16 %v1799_v33, %v1799_v33  ;;  %vm1509_vm8 = vcmp.ge.f32.partialorder %v1285_v3, 0.0  ;;  %v1653_v57 = vmul.f32 0.2, %v1285_v3  ;;  %v4334_v60 = vpop.f32.mrb[61].mxu0  ;;  %v4336_v1 = vpop.f32.mrb[61].mxu1 }
 0x163   :  { %v2888_v59 = vpack.c.bf16 %v1725_v54, %v1725_v54  ;;  %2517 = vst.msk [vmem:[%s4688_s3 + $0x1d0] sm:$0xf] %vm2400_vm2, %v2959_v29  ;;  %2448 = vst.msk [vmem:[%s4688_s3 + $0xbc] sm:$0xf] %vm2400_vm2, %v2890_v11  ;;  %vm1442_vm9 = vcmp.ge.f32.partialorder %v1018_v28, 0.0  ;;  %v1306_v52 = vadd.f32 %v4139_v63, %v4173_v42  ;;  %v1010_v58 = vadd.f32 %v4139_v63, %v4175_v55  ;;  %v4350_v37 = vpop.f32.mrb[62].mxu0 }
 0x164   :  { %v1586_v31 = vmul.f32 0.2, %v1018_v28  ;;  %v4352_v2 = vpop.f32.mrb[62].mxu1  ;;  %2520 = vst.msk [vmem:[%s4688_s3 + $0x1dc] sm:$0xf] %vm2400_vm2, %v2962_v43  ;;  %v1797_v17 = vsel %vm1509_vm8, %v1285_v3, %v1653_v57  ;;  %v1298_v42 = vadd.f32 %v4139_v63, %v4179_v61  ;;  %v1021_v55 = vadd.f32 %v4139_v63, %v4181_v32  ;;  %v4368_v16 = vpop.f32.mrb[63].mxu0 }
 0x165   :  { %2446 = vst.msk [vmem:[%s4688_s3 + $0xb4] sm:$0xf] %vm2400_vm2, %v2888_v59  ;;  %v1309_v44 = vadd.f32 %v4139_v63, %v4189_v4  ;;  %v4370_v19 = vpop.f32.mrb[63].mxu1  ;;  %v2960_v6 = vpack.c.bf16 %v1797_v17, %v1797_v17  ;;  %vm1514_vm10 = vcmp.ge.f32.partialorder %v1306_v52, 0.0  ;;  %v1658_v15 = vmul.f32 0.2, %v1306_v52 }
 0x166   :  { %v1730_v24 = vsel %vm1442_vm9, %v1018_v28, %v1586_v31  ;;  %vm1440_vm11 = vcmp.ge.f32.partialorder %v1010_v58, 0.0  ;;  %v1584_v23 = vmul.f32 0.2, %v1010_v58  ;;  %vm1512_vm12 = vcmp.ge.f32.partialorder %v1298_v42, 0.0 }
 0x167   :  { %v2893_v20 = vpack.c.bf16 %v1730_v24, %v1730_v24  ;;  %2518 = vst.msk [vmem:[%s4688_s3 + $0x1d4] sm:$0xf] %vm2400_vm2, %v2960_v6  ;;  %v1802_v61 = vsel %vm1514_vm10, %v1306_v52, %v1658_v15  ;;  %v1656_v32 = vmul.f32 0.2, %v1298_v42  ;;  %vm1443_vm13 = vcmp.ge.f32.partialorder %v1021_v55, 0.0 }
 0x168   :  { %v1587_v4 = vmul.f32 0.2, %v1021_v55  ;;  %v2965_v26 = vpack.c.bf16 %v1802_v61, %v1802_v61  ;;  %v1728_v7 = vsel %vm1440_vm11, %v1010_v58, %v1584_v23  ;;  %vm1515_vm14 = vcmp.ge.f32.partialorder %v1309_v44, 0.0 }
 0x169   :  { %2451 = vst.msk [vmem:[%s4688_s3 + $0xc8] sm:$0xf] %vm2400_vm2, %v2893_v20  ;;  %v1659_v25 = vmul.f32 0.2, %v1309_v44  ;;  %v2891_v12 = vpack.c.bf16 %v1728_v7, %v1728_v7  ;;  %v1800_v13 = vsel %vm1512_vm12, %v1298_v42, %v1656_v32  ;;  %v1013_v62 = vadd.f32 %v4139_v63, %v4191_v41  ;;  %v4382_v38 = vpop.f32.mrb[64].mxu0  ;;  %v4384_v39 = vpop.f32.mrb[64].mxu1 }
 0x16a   :  { %v1731_v5 = vsel %vm1443_vm13, %v1021_v55, %v1587_v4  ;;  %2523 = vst.msk [vmem:[%s4688_s3 + $0x1e8] sm:$0xf] %vm2400_vm2, %v2965_v26  ;;  %v2963_v27 = vpack.c.bf16 %v1800_v13, %v1800_v13  ;;  %v1301_v50 = vadd.f32 %v4139_v63, %v4199_v9  ;;  %v4392_v3 = vpop.f32.mrb[65].mxu0  ;;  %v4394_v28 = vpop.f32.mrb[65].mxu1  ;;  %v1034_v11 = vadd.f32 %v4139_v63, %v4219_v46 }
 0x16b   :  { %v2894_v30 = vpack.c.bf16 %v1731_v5, %v1731_v5  ;;  %v1803_v40 = vsel %vm1515_vm14, %v1309_v44, %v1659_v25  ;;  %2449 = vst.msk [vmem:[%s4688_s3 + $0xc0] sm:$0xf] %vm2400_vm2, %v2891_v12  ;;  %vm1441_vm15 = vcmp.ge.f32.partialorder %v1013_v62, 0.0  ;;  %v1585_v29 = vmul.f32 0.2, %v1013_v62  ;;  %v4402_v33 = vpop.f32.mrb[66].mxu0 }
 0x16c   :  { %v2966_v41 = vpack.c.bf16 %v1803_v40, %v1803_v40  ;;  %v4404_v54 = vpop.f32.mrb[66].mxu1  ;;  %2521 = vst.msk [vmem:[%s4688_s3 + $0x1e0] sm:$0xf] %vm2400_vm2, %v2963_v27  ;;  %vm1513_vm0 = vcmp.ge.f32.partialorder %v1301_v50, 0.0  ;;  %v1657_v9 = vmul.f32 0.2, %v1301_v50  ;;  %v1322_v43 = vadd.f32 %v4139_v63, %v4221_v14 }
 0x16d   :  { %2452 = vst.msk [vmem:[%s4688_s3 + $0xcc] sm:$0xf] %vm2400_vm2, %v2894_v30  ;;  %v1026_v46 = vadd.f32 %v4139_v63, %v4227_v34  ;;  %v4418_v59 = vpop.f32.mrb[67].mxu0  ;;  %v4420_v57 = vpop.f32.mrb[67].mxu1  ;;  %v1729_v31 = vsel %vm1441_vm15, %v1013_v62, %v1585_v29  ;;  %vm1446_vm1 = vcmp.ge.f32.partialorder %v1034_v11, 0.0  ;;  %v1314_v58 = vadd.f32 %v4139_v63, %v4229_v0 }
 0x16e   :  { %2524 = vst.msk [vmem:[%s4688_s3 + $0x1ec] sm:$0xf] %vm2400_vm2, %v2966_v41  ;;  %v1590_v52 = vmul.f32 0.2, %v1034_v11  ;;  %v2892_v17 = vpack.c.bf16 %v1729_v31, %v1729_v31  ;;  %v1801_v14 = vsel %vm1513_vm0, %v1301_v50, %v1657_v9  ;;  %vm1518_vm3 = vcmp.ge.f32.partialorder %v1322_v43, 0.0 }
 0x16f   :  { %v1662_v42 = vmul.f32 0.2, %v1322_v43  ;;  %v2964_v34 = vpack.c.bf16 %v1801_v14, %v1801_v14  ;;  %vm1444_vm4 = vcmp.ge.f32.partialorder %v1026_v46, 0.0  ;;  %v1588_v44 = vmul.f32 0.2, %v1026_v46 }
 0x170   :  { %v1734_v55 = vsel %vm1446_vm1, %v1034_v11, %v1590_v52  ;;  %2450 = vst.msk [vmem:[%s4688_s3 + $0xc4] sm:$0xf] %vm2400_vm2, %v2892_v17  ;;  %vm1516_vm5 = vcmp.ge.f32.partialorder %v1314_v58, 0.0  ;;  %v1660_v15 = vmul.f32 0.2, %v1314_v58  ;;  %v1037_v23 = vadd.f32 %v4139_v63, %v4239_v45 }
 0x171   :  { %v2897_v6 = vpack.c.bf16 %v1734_v55, %v1734_v55  ;;  %v1806_v24 = vsel %vm1518_vm3, %v1322_v43, %v1662_v42  ;;  %2522 = vst.msk [vmem:[%s4688_s3 + $0x1e4] sm:$0xf] %vm2400_vm2, %v2964_v34  ;;  %v1732_v20 = vsel %vm1444_vm4, %v1026_v46, %v1588_v44  ;;  %v1325_v61 = vadd.f32 %v4139_v63, %v4241_v48  ;;  %v4440_v32 = vpop.f32.mrb[68].mxu0  ;;  %v4442_v4 = vpop.f32.mrb[68].mxu1 }
 0x172   :  { %v2969_v0 = vpack.c.bf16 %v1806_v24, %v1806_v24  ;;  %v2895_v26 = vpack.c.bf16 %v1732_v20, %v1732_v20  ;;  %v1804_v7 = vsel %vm1516_vm5, %v1314_v58, %v1660_v15  ;;  %v1029_v25 = vadd.f32 %v4139_v63, %v4251_v10  ;;  %v4452_v12 = vpop.f32.mrb[69].mxu0  ;;  %v4454_v48 = vpop.f32.mrb[69].mxu1 }
 0x173   :  { %2455 = vst.msk [vmem:[%s4688_s3 + $0xd8] sm:$0xf] %vm2400_vm2, %v2897_v6  ;;  %v1317_v45 = vadd.f32 %v4139_v63, %v4253_v51  ;;  %v2967_v13 = vpack.c.bf16 %v1804_v7, %v1804_v7  ;;  %vm1447_vm6 = vcmp.ge.f32.partialorder %v1037_v23, 0.0  ;;  %v1591_v5 = vmul.f32 0.2, %v1037_v23  ;;  %v4460_v62 = vpop.f32.mrb[70].mxu0 }
 0x174   :  { %2527 = vst.msk [vmem:[%s4688_s3 + $0x1f8] sm:$0xf] %vm2400_vm2, %v2969_v0  ;;  %vm1519_vm7 = vcmp.ge.f32.partialorder %v1325_v61, 0.0  ;;  %v4462_v27 = vpop.f32.mrb[70].mxu1  ;;  %2453 = vst.msk [vmem:[%s4688_s3 + $0xd0] sm:$0xf] %vm2400_vm2, %v2895_v26  ;;  %v1050_v50 = vadd.f32 %v4139_v63, %v4273_v8  ;;  %v1338_v41 = vadd.f32 %v4139_v63, %v4275_v18  ;;  %v1042_v31 = vadd.f32 %v4139_v63, %v4281_v35 }
 0x175   :  { %v1663_v10 = vmul.f32 0.2, %v1325_v61  ;;  %vm1445_vm8 = vcmp.ge.f32.partialorder %v1029_v25, 0.0  ;;  %v1589_v51 = vmul.f32 0.2, %v1029_v25  ;;  %vm1517_vm9 = vcmp.ge.f32.partialorder %v1317_v45, 0.0 }
 0x176   :  { %2525 = vst.msk [vmem:[%s4688_s3 + $0x1f0] sm:$0xf] %vm2400_vm2, %v2967_v13  ;;  %v1735_v30 = vsel %vm1447_vm6, %v1037_v23, %v1591_v5  ;;  %v1661_v40 = vmul.f32 0.2, %v1317_v45  ;;  %v4476_v29 = vpop.f32.mrb[71].mxu0  ;;  %v4478_v11 = vpop.f32.mrb[71].mxu1  ;;  %v1330_v42 = vadd.f32 %v4139_v63, %v4295_v21  ;;  %v1053_v34 = vadd.f32 %v4139_v63, %v4297_v22 }
 0x177   :  { %v2898_v9 = vpack.c.bf16 %v1735_v30, %v1735_v30  ;;  %v1807_v43 = vsel %vm1519_vm7, %v1325_v61, %v1663_v10  ;;  %v1733_v46 = vsel %vm1445_vm8, %v1029_v25, %v1589_v51  ;;  %vm1450_vm10 = vcmp.ge.f32.partialorder %v1050_v50, 0.0 }
 0x178   :  { %v2970_v52 = vpack.c.bf16 %v1807_v43, %v1807_v43  ;;  %v2896_v58 = vpack.c.bf16 %v1733_v46, %v1733_v46  ;;  %v1805_v17 = vsel %vm1517_vm9, %v1317_v45, %v1661_v40  ;;  %v1594_v18 = vmul.f32 0.2, %v1050_v50 }
 0x179   :  { %2456 = vst.msk [vmem:[%s4688_s3 + $0xdc] sm:$0xf] %vm2400_vm2, %v2898_v9  ;;  %v2968_v8 = vpack.c.bf16 %v1805_v17, %v1805_v17  ;;  %vm1522_vm11 = vcmp.ge.f32.partialorder %v1338_v41, 0.0  ;;  %v1666_v14 = vmul.f32 0.2, %v1338_v41  ;;  %vm1448_vm12 = vcmp.ge.f32.partialorder %v1042_v31, 0.0 }
 0x17a   :  { %2528 = vst.msk [vmem:[%s4688_s3 + $0x1fc] sm:$0xf] %vm2400_vm2, %v2970_v52  ;;  %2454 = vst.msk [vmem:[%s4688_s3 + $0xd4] sm:$0xf] %vm2400_vm2, %v2896_v58  ;;  %v1592_v35 = vmul.f32 0.2, %v1042_v31  ;;  %v1738_v55 = vsel %vm1450_vm10, %v1050_v50, %v1594_v18  ;;  %v1341_v6 = vadd.f32 %v4139_v63, %v4308_v36  ;;  %v1045_v24 = vadd.f32 %v4139_v63, %v4310_v49 }
 0x17b   :  { %2526 = vst.msk [vmem:[%s4688_s3 + $0x1f4] sm:$0xf] %vm2400_vm2, %v2968_v8  ;;  %v1810_v44 = vsel %vm1522_vm11, %v1338_v41, %v1666_v14  ;;  %v2901_v15 = vpack.c.bf16 %v1738_v55, %v1738_v55  ;;  %vm1520_vm13 = vcmp.ge.f32.partialorder %v1330_v42, 0.0  ;;  %v1664_v23 = vmul.f32 0.2, %v1330_v42 }
 0x17c   :  { %v2973_v0 = vpack.c.bf16 %v1810_v44, %v1810_v44  ;;  %v1736_v20 = vsel %vm1448_vm12, %v1042_v31, %v1592_v35  ;;  %vm1451_vm14 = vcmp.ge.f32.partialorder %v1053_v34, 0.0  ;;  %v1595_v22 = vmul.f32 0.2, %v1053_v34 }
 0x17d   :  { %v2899_v21 = vpack.c.bf16 %v1736_v20, %v1736_v20  ;;  %2459 = vst.msk [vmem:[%s4688_s3 + $0xe8] sm:$0xf] %vm2400_vm2, %v2901_v15  ;;  %vm1523_vm15 = vcmp.ge.f32.partialorder %v1341_v6, 0.0  ;;  %v1667_v36 = vmul.f32 0.2, %v1341_v6  ;;  %vm1449_vm0 = vcmp.ge.f32.partialorder %v1045_v24, 0.0 }
 0x17e   :  { %2531 = vst.msk [vmem:[%s4688_s3 + $0x208] sm:$0xf] %vm2400_vm2, %v2973_v0  ;;  %v1593_v49 = vmul.f32 0.2, %v1045_v24  ;;  %v1808_v61 = vsel %vm1520_vm13, %v1330_v42, %v1664_v23  ;;  %v1739_v26 = vsel %vm1451_vm14, %v1053_v34, %v1595_v22  ;;  %v1333_v7 = vadd.f32 %v4139_v63, %v4312_v47 }
 0x17f   :  { %2457 = vst.msk [vmem:[%s4688_s3 + $0xe0] sm:$0xf] %vm2400_vm2, %v2899_v21  ;;  %v1066_v25 = vadd.f32 %v4139_v63, %v4330_v56  ;;  %v2971_v45 = vpack.c.bf16 %v1808_v61, %v1808_v61  ;;  %v2902_v13 = vpack.c.bf16 %v1739_v26, %v1739_v26  ;;  %v1811_v5 = vsel %vm1523_vm15, %v1341_v6, %v1667_v36 }
 0x180   :  { %v1737_v10 = vsel %vm1449_vm0, %v1045_v24, %v1593_v49  ;;  %v2974_v51 = vpack.c.bf16 %v1811_v5, %v1811_v5  ;;  %vm1521_vm1 = vcmp.ge.f32.partialorder %v1333_v7, 0.0  ;;  %v1665_v40 = vmul.f32 0.2, %v1333_v7 }
 0x181   :  { %v2900_v30 = vpack.c.bf16 %v1737_v10, %v1737_v10  ;;  %2529 = vst.msk [vmem:[%s4688_s3 + $0x200] sm:$0xf] %vm2400_vm2, %v2971_v45  ;;  %2460 = vst.msk [vmem:[%s4688_s3 + $0xec] sm:$0xf] %vm2400_vm2, %v2902_v13  ;;  %vm1454_vm3 = vcmp.ge.f32.partialorder %v1066_v25, 0.0  ;;  %v1354_v56 = vadd.f32 %v4139_v63, %v4332_v53  ;;  %v1058_v50 = vadd.f32 %v4139_v63, %v4334_v60 }
 0x182   :  { %v1598_v47 = vmul.f32 0.2, %v1066_v25  ;;  %2532 = vst.msk [vmem:[%s4688_s3 + $0x20c] sm:$0xf] %vm2400_vm2, %v2974_v51  ;;  %v1809_v41 = vsel %vm1521_vm1, %v1333_v7, %v1665_v40  ;;  %v1346_v9 = vadd.f32 %v4139_v63, %v4336_v1  ;;  %v1069_v53 = vadd.f32 %v4139_v63, %v4350_v37 }
 0x183   :  { %2458 = vst.msk [vmem:[%s4688_s3 + $0xe4] sm:$0xf] %vm2400_vm2, %v2900_v30  ;;  %v1357_v60 = vadd.f32 %v4139_v63, %v4352_v2  ;;  %v2972_v43 = vpack.c.bf16 %v1809_v41, %v1809_v41  ;;  %vm1526_vm4 = vcmp.ge.f32.partialorder %v1354_v56, 0.0  ;;  %v1670_v31 = vmul.f32 0.2, %v1354_v56 }
 0x184   :  { %v1742_v46 = vsel %vm1454_vm3, %v1066_v25, %v1598_v47  ;;  %vm1452_vm5 = vcmp.ge.f32.partialorder %v1058_v50, 0.0  ;;  %v1596_v58 = vmul.f32 0.2, %v1058_v50  ;;  %vm1524_vm6 = vcmp.ge.f32.partialorder %v1346_v9, 0.0 }
 0x185   :  { %v2905_v52 = vpack.c.bf16 %v1742_v46, %v1742_v46  ;;  %2530 = vst.msk [vmem:[%s4688_s3 + $0x204] sm:$0xf] %vm2400_vm2, %v2972_v43  ;;  %v1814_v1 = vsel %vm1526_vm4, %v1354_v56, %v1670_v31  ;;  %v1668_v17 = vmul.f32 0.2, %v1346_v9  ;;  %vm1455_vm7 = vcmp.ge.f32.partialorder %v1069_v53, 0.0 }
 0x186   :  { %v1599_v37 = vmul.f32 0.2, %v1069_v53  ;;  %v2977_v2 = vpack.c.bf16 %v1814_v1, %v1814_v1  ;;  %v1740_v8 = vsel %vm1452_vm5, %v1058_v50, %v1596_v58  ;;  %vm1527_vm8 = vcmp.ge.f32.partialorder %v1357_v60, 0.0 }
 0x187   :  { %2463 = vst.msk [vmem:[%s4688_s3 + $0xf8] sm:$0xf] %vm2400_vm2, %v2905_v52  ;;  %v1671_v18 = vmul.f32 0.2, %v1357_v60  ;;  %v2903_v14 = vpack.c.bf16 %v1740_v8, %v1740_v8  ;;  %v1812_v35 = vsel %vm1524_vm6, %v1346_v9, %v1668_v17  ;;  %v1061_v34 = vadd.f32 %v4139_v63, %v4368_v16 }
 0x188   :  { %v1743_v42 = vsel %vm1455_vm7, %v1069_v53, %v1599_v37  ;;  %2535 = vst.msk [vmem:[%s4688_s3 + $0x218] sm:$0xf] %vm2400_vm2, %v2977_v2  ;;  %v2975_v55 = vpack.c.bf16 %v1812_v35, %v1812_v35  ;;  %v1349_v24 = vadd.f32 %v4139_v63, %v4370_v19  ;;  %v1082_v16 = vadd.f32 %v4139_v63, %v4382_v38 }
 0x189   :  { %v2906_v44 = vpack.c.bf16 %v1743_v42, %v1743_v42  ;;  %v1815_v6 = vsel %vm1527_vm8, %v1357_v60, %v1671_v18  ;;  %2461 = vst.msk [vmem:[%s4688_s3 + $0xf0] sm:$0xf] %vm2400_vm2, %v2903_v14  ;;  %vm1453_vm9 = vcmp.ge.f32.partialorder %v1061_v34, 0.0  ;;  %v1597_v0 = vmul.f32 0.2, %v1061_v34 }
 0x18a   :  { %v2978_v15 = vpack.c.bf16 %v1815_v6, %v1815_v6  ;;  %2533 = vst.msk [vmem:[%s4688_s3 + $0x210] sm:$0xf] %vm2400_vm2, %v2975_v55  ;;  %vm1525_vm10 = vcmp.ge.f32.partialorder %v1349_v24, 0.0  ;;  %v1669_v19 = vmul.f32 0.2, %v1349_v24  ;;  %v1370_v20 = vadd.f32 %v4139_v63, %v4384_v39 }
 0x18b   :  { %2464 = vst.msk [vmem:[%s4688_s3 + $0xfc] sm:$0xf] %vm2400_vm2, %v2906_v44  ;;  %v1074_v21 = vadd.f32 %v4139_v63, %v4392_v3  ;;  %v1741_v38 = vsel %vm1453_vm9, %v1061_v34, %v1597_v0  ;;  %vm1458_vm11 = vcmp.ge.f32.partialorder %v1082_v16, 0.0  ;;  %v1602_v23 = vmul.f32 0.2, %v1082_v16 }
 0x18c   :  { %2536 = vst.msk [vmem:[%s4688_s3 + $0x21c] sm:$0xf] %vm2400_vm2, %v2978_v15  ;;  %v1362_v22 = vadd.f32 %v4139_v63, %v4394_v28  ;;  %v2904_v36 = vpack.c.bf16 %v1741_v38, %v1741_v38  ;;  %v1813_v49 = vsel %vm1525_vm10, %v1349_v24, %v1669_v19  ;;  %vm1530_vm12 = vcmp.ge.f32.partialorder %v1370_v20, 0.0 }
 0x18d   :  { %v1674_v61 = vmul.f32 0.2, %v1370_v20  ;;  %v2976_v26 = vpack.c.bf16 %v1813_v49, %v1813_v49  ;;  %v1746_v39 = vsel %vm1458_vm11, %v1082_v16, %v1602_v23  ;;  %vm1456_vm13 = vcmp.ge.f32.partialorder %v1074_v21, 0.0 }
 0x18e   :  { %v1600_v7 = vmul.f32 0.2, %v1074_v21  ;;  %2462 = vst.msk [vmem:[%s4688_s3 + $0xf4] sm:$0xf] %vm2400_vm2, %v2904_v36  ;;  %v2909_v3 = vpack.c.bf16 %v1746_v39, %v1746_v39  ;;  %vm1528_vm14 = vcmp.ge.f32.partialorder %v1362_v22, 0.0  ;;  %v1085_v5 = vadd.f32 %v4139_v63, %v4402_v33 }
 0x18f   :  { %v1818_v25 = vsel %vm1530_vm12, %v1370_v20, %v1674_v61  ;;  %v1672_v45 = vmul.f32 0.2, %v1362_v22  ;;  %2534 = vst.msk [vmem:[%s4688_s3 + $0x214] sm:$0xf] %vm2400_vm2, %v2976_v26  ;;  %v1373_v10 = vadd.f32 %v4139_v63, %v4404_v54  ;;  %v1077_v40 = vadd.f32 %v4139_v63, %v4418_v59 }
 0x190   :  { %v2981_v28 = vpack.c.bf16 %v1818_v25, %v1818_v25  ;;  %v1744_v13 = vsel %vm1456_vm13, %v1074_v21, %v1600_v7  ;;  %2467 = vst.msk [vmem:[%s4688_s3 + $0x108] sm:$0xf] %vm2400_vm2, %v2909_v3  ;;  %v1365_v47 = vadd.f32 %v4139_v63, %v4420_v57  ;;  %vm1459_vm15 = vcmp.ge.f32.partialorder %v1085_v5, 0.0 }
 0x191   :  { %v2907_v51 = vpack.c.bf16 %v1744_v13, %v1744_v13  ;;  %v1816_v30 = vsel %vm1528_vm14, %v1362_v22, %v1672_v45  ;;  %v1603_v54 = vmul.f32 0.2, %v1085_v5  ;;  %vm1531_vm0 = vcmp.ge.f32.partialorder %v1373_v10, 0.0 }
 0x192   :  { %2539 = vst.msk [vmem:[%s4688_s3 + $0x228] sm:$0xf] %vm2400_vm2, %v2981_v28  ;;  %v2979_v33 = vpack.c.bf16 %v1816_v30, %v1816_v30  ;;  %v1675_v56 = vmul.f32 0.2, %v1373_v10  ;;  %vm1457_vm1 = vcmp.ge.f32.partialorder %v1077_v40, 0.0  ;;  %vm1529_vm3 = vcmp.ge.f32.partialorder %v1365_v47, 0.0 }
 0x193   :  { %2465 = vst.msk [vmem:[%s4688_s3 + $0x100] sm:$0xf] %vm2400_vm2, %v2907_v51  ;;  %v1601_v59 = vmul.f32 0.2, %v1077_v40  ;;  %v1747_v57 = vsel %vm1459_vm15, %v1085_v5, %v1603_v54  ;;  %v1673_v50 = vmul.f32 0.2, %v1365_v47  ;;  %v1098_v41 = vadd.f32 %v4139_v63, %v4440_v32 }
 0x194   :  { %2537 = vst.msk [vmem:[%s4688_s3 + $0x220] sm:$0xf] %vm2400_vm2, %v2979_v33  ;;  %v1386_v9 = vadd.f32 %v4139_v63, %v4442_v4  ;;  %v2910_v53 = vpack.c.bf16 %v1747_v57, %v1747_v57  ;;  %v1819_v60 = vsel %vm1531_vm0, %v1373_v10, %v1675_v56  ;;  %v1090_v46 = vadd.f32 %v4139_v63, %v4452_v12 }
 0x195   :  { %v1745_v43 = vsel %vm1457_vm1, %v1077_v40, %v1601_v59  ;;  %v2982_v31 = vpack.c.bf16 %v1819_v60, %v1819_v60  ;;  %v1817_v58 = vsel %vm1529_vm3, %v1365_v47, %v1673_v50  ;;  %vm1462_vm4 = vcmp.ge.f32.partialorder %v1098_v41, 0.0 }
 0x196   :  { %v2908_v52 = vpack.c.bf16 %v1745_v43, %v1745_v43  ;;  %2468 = vst.msk [vmem:[%s4688_s3 + $0x10c] sm:$0xf] %vm2400_vm2, %v2910_v53  ;;  %v2980_v1 = vpack.c.bf16 %v1817_v58, %v1817_v58  ;;  %v1606_v32 = vmul.f32 0.2, %v1098_v41  ;;  %vm1534_vm5 = vcmp.ge.f32.partialorder %v1386_v9, 0.0 }
 0x197   :  { %v1678_v17 = vmul.f32 0.2, %v1386_v9  ;;  %2540 = vst.msk [vmem:[%s4688_s3 + $0x22c] sm:$0xf] %vm2400_vm2, %v2982_v31  ;;  %vm1460_vm6 = vcmp.ge.f32.partialorder %v1090_v46, 0.0  ;;  %v1378_v12 = vadd.f32 %v4139_v63, %v4454_v48  ;;  %v1101_v37 = vadd.f32 %v4139_v63, %v4460_v62 }
 0x198   :  { %2466 = vst.msk [vmem:[%s4688_s3 + $0x104] sm:$0xf] %vm2400_vm2, %v2908_v52  ;;  %v1604_v4 = vmul.f32 0.2, %v1090_v46  ;;  %2538 = vst.msk [vmem:[%s4688_s3 + $0x224] sm:$0xf] %vm2400_vm2, %v2980_v1  ;;  %v1750_v2 = vsel %vm1462_vm4, %v1098_v41, %v1606_v32  ;;  %v1389_v18 = vadd.f32 %v4139_v63, %v4462_v27  ;;  %v1093_v14 = vadd.f32 %v4139_v63, %v4476_v29 }
 0x199   :  { %v1822_v8 = vsel %vm1534_vm5, %v1386_v9, %v1678_v17  ;;  %v2913_v35 = vpack.c.bf16 %v1750_v2, %v1750_v2  ;;  %vm1532_vm7 = vcmp.ge.f32.partialorder %v1378_v12, 0.0  ;;  %v1676_v55 = vmul.f32 0.2, %v1378_v12 }
 0x19a   :  { %v2985_v42 = vpack.c.bf16 %v1822_v8, %v1822_v8  ;;  %v1748_v34 = vsel %vm1460_vm6, %v1090_v46, %v1604_v4  ;;  %vm1463_vm8 = vcmp.ge.f32.partialorder %v1101_v37, 0.0  ;;  %v1607_v62 = vmul.f32 0.2, %v1101_v37 }
 0x19b   :  { %v2911_v48 = vpack.c.bf16 %v1748_v34, %v1748_v34  ;;  %2471 = vst.msk [vmem:[%s4688_s3 + $0x118] sm:$0xf] %vm2400_vm2, %v2913_v35  ;;  %vm1535_vm9 = vcmp.ge.f32.partialorder %v1389_v18, 0.0  ;;  %v1679_v27 = vmul.f32 0.2, %v1389_v18  ;;  %vm1461_vm10 = vcmp.ge.f32.partialorder %v1093_v14, 0.0 }
 0x19c   :  { %2543 = vst.msk [vmem:[%s4688_s3 + $0x238] sm:$0xf] %vm2400_vm2, %v2985_v42  ;;  %v1605_v29 = vmul.f32 0.2, %v1093_v14  ;;  %v1820_v44 = vsel %vm1532_vm7, %v1378_v12, %v1676_v55  ;;  %v1751_v6 = vsel %vm1463_vm8, %v1101_v37, %v1607_v62  ;;  %v1381_v24 = vadd.f32 %v4139_v63, %v4478_v11 }
 0x19d   :  { %2469 = vst.msk [vmem:[%s4688_s3 + $0x110] sm:$0xf] %vm2400_vm2, %v2911_v48  ;;  %v2983_v15 = vpack.c.bf16 %v1820_v44, %v1820_v44  ;;  %v2914_v0 = vpack.c.bf16 %v1751_v6, %v1751_v6  ;;  %v1823_v16 = vsel %vm1535_vm9, %v1389_v18, %v1679_v27 }
 0x19e   :  { %v1749_v19 = vsel %vm1461_vm10, %v1093_v14, %v1605_v29  ;;  %v2986_v20 = vpack.c.bf16 %v1823_v16, %v1823_v16  ;;  %vm1533_vm11 = vcmp.ge.f32.partialorder %v1381_v24, 0.0  ;;  %v1677_v38 = vmul.f32 0.2, %v1381_v24 }
 0x19f   :  { %v2912_v21 = vpack.c.bf16 %v1749_v19, %v1749_v19  ;;  %2541 = vst.msk [vmem:[%s4688_s3 + $0x230] sm:$0xf] %vm2400_vm2, %v2983_v15  ;;  %2472 = vst.msk [vmem:[%s4688_s3 + $0x11c] sm:$0xf] %vm2400_vm2, %v2914_v0 }
 0x1a0   :  { %2544 = vst.msk [vmem:[%s4688_s3 + $0x23c] sm:$0xf] %vm2400_vm2, %v2986_v20  ;;  %v1821_v63 = vsel %vm1533_vm11, %v1381_v24, %v1677_v38 }
 0x1a1   :  { %2470 = vst.msk [vmem:[%s4688_s3 + $0x114] sm:$0xf] %vm2400_vm2, %v2912_v21  ;;  %v2984_v11 = vpack.c.bf16 %v1821_v63, %v1821_v63 }
 0x1a3   :  { %2542 = vst.msk [vmem:[%s4688_s3 + $0x234] sm:$0xf] %vm2400_vm2, %v2984_v11 }

// kernel: dis_forward.9
= control target key start
LH: loop header
LB: loop body
LE: loop exit
PB: predicated region body
PF: predicated region fallthrough
CT: control target
= control target key end

     0   :  { %vm184_vm0 = vcmask 588800   ;;  %vm239_vm1 = vcmask 1043456   ;;  %vm672_vm2 = vcmask 60416   ;;  %s1226_s1 = inlined_call_operand.vmem [shape: bf16[72,8], index: 1, kind: input, shape index: {}]   ;;  %s1227_s0 = inlined_call_operand.vmem [shape: bf16[288,72], index: 0, kind: input, shape index: {}]   ;;  %s1228_s2 = inlined_call_operand.vmem [shape: f32[1,8], index: 2, kind: input, shape index: {}]   ;;  %s1229_s3 = inlined_call_operand.vmem [shape: bf16[288,8], index: 3, kind: output, shape index: {}]  }
   0x1   :  { %v908_v0 = vld [vmem:[%s1226_s1] sm:$0xff]   ;;  %v909_v1 = vld [vmem:[%s1226_s1 + $0x8] sm:$0xff]   ;;  %v910_v2 = vld [vmem:[%s1226_s1 + $0x10] sm:$0xff]  }
   0x2   :  { %850 = vmatprep.subr.bf16.mxu0 %v908_v0  ;;  %896 = vmatprep.subr.bf16.mxu1 %v908_v0  ;;  %v913_v3 = vld [vmem:[%s1227_s0] sm:$0xff]   ;;  %v915_v4 = vld [vmem:[%s1227_s0 + $0x50] sm:$0xff]   ;;  %v911_v5 = vld [vmem:[%s1226_s1 + $0x18] sm:$0xff]  }
   0x3   :  { %851 = vmatpush3.bf16.msra.mxu0 %v908_v0  ;;  %901 = vmatpush3.bf16.msra.mxu1 %v908_v0  ;;  %v912_v6 = vld [vmem:[%s1226_s1 + $0x20] ss:$0 sps:$4 sm:$0xff]   ;;  %v914_v8 = vld [vmem:[%s1227_s0 + $0x8] sm:$0xff]   ;;  %v916_v9 = vld [vmem:[%s1227_s0 + $0x58] sm:$0xff]  }
   0x4   :  { %852 = vmatprep.subr.bf16.mxu0 %v909_v1  ;;  %897 = vmatprep.subr.bf16.mxu1 %v909_v1  ;;  %v241_v7 = vsel %vm239_vm1, %v912_v6, 0  ;;  %v917_v10 = vld [vmem:[%s1227_s0 + $0x10] sm:$0xff]   ;;  %v919_v11 = vld [vmem:[%s1227_s0 + $0x60] sm:$0xff]   ;;  %v918_v12 = vld [vmem:[%s1227_s0 + $0x18] sm:$0xff]  }
   0x5   :  { %860 = vmatprep.mubr.msk.bf16.mxu0 %vm184_vm0, %v913_v3  ;;  %880 = vmatprep.mubr.msk.bf16.mxu1 %vm184_vm0, %v915_v4  ;;  %v920_v13 = vld [vmem:[%s1227_s0 + $0x68] sm:$0xff]   ;;  %v921_v14 = vld [vmem:[%s1227_s0 + $0x20] sm:$0xff]   ;;  %v923_v15 = vld [vmem:[%s1227_s0 + $0x70] sm:$0xff]  }
   0x6   :  { %v922_v16 = vld [vmem:[%s1227_s0 + $0x28] sm:$0xff]   ;;  %v924_v17 = vld [vmem:[%s1227_s0 + $0x78] sm:$0xff]   ;;  %v925_v18 = vld [vmem:[%s1227_s0 + $0x30] sm:$0xff]  }
   0x7   :  { %853 = vmatpush3.bf16.msra.mxu0 %v909_v1  ;;  %902 = vmatpush3.bf16.msra.mxu1 %v909_v1  ;;  %v927_v19 = vld [vmem:[%s1227_s0 + $0x80] sm:$0xff]   ;;  %v926_v20 = vld [vmem:[%s1227_s0 + $0x38] sm:$0xff]   ;;  %v928_v21 = vld [vmem:[%s1227_s0 + $0x88] sm:$0xff]  }
   0x8   :  { %854 = vmatprep.subr.bf16.mxu0 %v910_v2  ;;  %898 = vmatprep.subr.bf16.mxu1 %v910_v2  ;;  %v929_v22 = vld [vmem:[%s1227_s0 + $0x40] sm:$0xff]   ;;  %v930_v23 = vld [vmem:[%s1227_s0 + $0x48] sm:$0xff]  }
   0x9   :  { %v1041_v24 = vld [vmem:[%s1228_s2] ss:$0 sm:$0xff] }
   0xb   :  { %855 = vmatpush3.bf16.msra.mxu0 %v910_v2  ;;  %903 = vmatpush3.bf16.msra.mxu1 %v910_v2 }
   0xc   :  { %856 = vmatprep.subr.bf16.mxu0 %v911_v5  ;;  %899 = vmatprep.subr.bf16.mxu1 %v911_v5 }
   0xf   :  { %857 = vmatpush3.bf16.msra.mxu0 %v911_v5  ;;  %904 = vmatpush3.bf16.msra.mxu1 %v911_v5 }
  0x10   :  { %906 = vmatprep.subr.msk.bf16.mxu0 %vm239_vm1, %v912_v6  ;;  %907 = vmatprep.subr.msk.bf16.mxu1 %vm239_vm1, %v912_v6 }
  0x13   :  { %859 = vmatpush3.bf16.msra.mxu0 %v241_v7  ;;  %905 = vmatpush3.bf16.msra.mxu1 %v241_v7 }
  0x16   :  { %861 = vmatmul.mubr.msk.bf16.vlgmr.msra.gmra.mrb[0].mxu0 %vm184_vm0, %v914_v8  ;;  %881 = vmatmul.mubr.msk.bf16.vlgmr.msra.gmra.mrb[0].mxu1 %vm184_vm0, %v916_v9 }
  0x17   :  { %864 = vmatprep.mubr.msk.bf16.mxu0 %vm184_vm0, %v917_v10  ;;  %884 = vmatprep.mubr.msk.bf16.mxu1 %vm184_vm0, %v919_v11 }
  0x1e   :  { %865 = vmatmul.mubr.msk.bf16.gmra.mrb[4].mxu0 %vm184_vm0, %v918_v12  ;;  %885 = vmatmul.mubr.msk.bf16.gmra.mrb[4].mxu1 %vm184_vm0, %v920_v13 }
  0x1f   :  { %868 = vmatprep.mubr.msk.bf16.mxu0 %vm184_vm0, %v921_v14  ;;  %888 = vmatprep.mubr.msk.bf16.mxu1 %vm184_vm0, %v923_v15 }
  0x26   :  { %869 = vmatmul.mubr.msk.bf16.gmra.mrb[8].mxu0 %vm184_vm0, %v922_v16  ;;  %889 = vmatmul.mubr.msk.bf16.gmra.mrb[8].mxu1 %vm184_vm0, %v924_v17 }
  0x27   :  { %872 = vmatprep.mubr.msk.bf16.mxu0 %vm184_vm0, %v925_v18  ;;  %892 = vmatprep.mubr.msk.bf16.mxu1 %vm184_vm0, %v927_v19 }
  0x2e   :  { %873 = vmatmul.mubr.msk.bf16.gmra.mrb[12].mxu0 %vm184_vm0, %v926_v20  ;;  %893 = vmatmul.mubr.msk.bf16.gmra.mrb[12].mxu1 %vm184_vm0, %v928_v21 }
  0x2f   :  { %876 = vmatprep.mubr.msk.bf16.mxu0 %vm184_vm0, %v929_v22 }
  0x36   :  { %877 = vmatmul.mubr.msk.bf16.gmra.mrb[16].mxu0 %vm184_vm0, %v930_v23 }
  0xe9   :  { %v862_v25 = vpop.f32.mrb[0].mxu0  ;;  %v882_v26 = vpop.f32.mrb[0].mxu1 }
  0xea   :  { %v286_v27 = vadd.f32 %v862_v25, %v1041_v24  ;;  %v277_v28 = vpop.f32.mrb[1].mxu0  ;;  %v366_v29 = vadd.f32 %v882_v26, %v1041_v24  ;;  %v357_v30 = vpop.f32.mrb[1].mxu1 }
  0xeb   :  { %v278_v31 = vadd.f32 %v1041_v24, %v277_v28  ;;  %v863_v32 = vpop.f32.mrb[2].mxu0  ;;  %v358_v33 = vadd.f32 %v1041_v24, %v357_v30  ;;  %v883_v34 = vpop.f32.mrb[2].mxu1 }
  0xec   :  { %vm422_vm3 = vcmp.ge.f32.partialorder %v286_v27, 0.0  ;;  %v458_v35 = vmul.f32 0.2, %v286_v27  ;;  %v289_v36 = vadd.f32 %v863_v32, %v1041_v24  ;;  %v280_v37 = vpop.f32.mrb[3].mxu0  ;;  %vm442_vm4 = vcmp.ge.f32.partialorder %v366_v29, 0.0  ;;  %v360_v38 = vpop.f32.mrb[3].mxu1 }
  0xed   :  { %vm420_vm5 = vcmp.ge.f32.partialorder %v278_v31, 0.0  ;;  %v456_v39 = vmul.f32 0.2, %v278_v31  ;;  %v281_v40 = vadd.f32 %v1041_v24, %v280_v37  ;;  %v478_v41 = vmul.f32 0.2, %v366_v29 }
  0xee   :  { %v494_v42 = vsel %vm422_vm3, %v286_v27, %v458_v35  ;;  %vm423_vm6 = vcmp.ge.f32.partialorder %v289_v36, 0.0  ;;  %v459_v43 = vmul.f32 0.2, %v289_v36  ;;  %vm440_vm7 = vcmp.ge.f32.partialorder %v358_v33, 0.0 }
  0xef   :  { %v793_v44 = vpack.c.bf16 %v494_v42, %v494_v42  ;;  %v492_v45 = vsel %vm420_vm5, %v278_v31, %v456_v39  ;;  %vm421_vm8 = vcmp.ge.f32.partialorder %v281_v40, 0.0  ;;  %v457_v46 = vmul.f32 0.2, %v281_v40 }
  0xf0   :  { %v791_v47 = vpack.c.bf16 %v492_v45, %v492_v45  ;;  %v495_v48 = vsel %vm423_vm6, %v289_v36, %v459_v43  ;;  %v514_v49 = vsel %vm442_vm4, %v366_v29, %v478_v41  ;;  %v476_v50 = vmul.f32 0.2, %v358_v33 }
  0xf1   :  { %675 = vst.msk [vmem:[%s1229_s3 + $0x8] sm:$0xf] %vm672_vm2, %v793_v44  ;;  %v794_v51 = vpack.c.bf16 %v495_v48, %v495_v48  ;;  %v493_v52 = vsel %vm421_vm8, %v281_v40, %v457_v46  ;;  %v813_v53 = vpack.c.bf16 %v514_v49, %v514_v49  ;;  %v369_v54 = vadd.f32 %v883_v34, %v1041_v24  ;;  %v866_v55 = vpop.f32.mrb[4].mxu0  ;;  %v886_v56 = vpop.f32.mrb[4].mxu1 }
  0xf2   :  { %673 = vst.msk [vmem:[%s1229_s3] sm:$0xf] %vm672_vm2, %v791_v47  ;;  %v792_v57 = vpack.c.bf16 %v493_v52, %v493_v52  ;;  %v512_v58 = vsel %vm440_vm7, %v358_v33, %v476_v50  ;;  %v361_v59 = vadd.f32 %v1041_v24, %v360_v38  ;;  %v302_v60 = vadd.f32 %v866_v55, %v1041_v24  ;;  %v293_v61 = vpop.f32.mrb[5].mxu0  ;;  %v373_v62 = vpop.f32.mrb[5].mxu1 }
  0xf3   :  { %676 = vst.msk [vmem:[%s1229_s3 + $0xc] sm:$0xf] %vm672_vm2, %v794_v51  ;;  %695 = vst.msk [vmem:[%s1229_s3 + $0x58] sm:$0xf] %vm672_vm2, %v813_v53  ;;  %v811_v63 = vpack.c.bf16 %v512_v58, %v512_v58  ;;  %vm443_vm9 = vcmp.ge.f32.partialorder %v369_v54, 0.0  ;;  %v294_v1 = vadd.f32 %v1041_v24, %v293_v61  ;;  %v867_v2 = vpop.f32.mrb[6].mxu0  ;;  %v382_v21 = vadd.f32 %v886_v56, %v1041_v24 }
  0xf4   :  { %v479_v0 = vmul.f32 0.2, %v369_v54  ;;  %v887_v3 = vpop.f32.mrb[6].mxu1  ;;  %674 = vst.msk [vmem:[%s1229_s3 + $0x4] sm:$0xf] %vm672_vm2, %v792_v57  ;;  %vm441_vm10 = vcmp.ge.f32.partialorder %v361_v59, 0.0  ;;  %v305_v8 = vadd.f32 %v867_v2, %v1041_v24  ;;  %v374_v22 = vadd.f32 %v1041_v24, %v373_v62 }
  0xf5   :  { %v477_v4 = vmul.f32 0.2, %v361_v59  ;;  %vm426_vm11 = vcmp.ge.f32.partialorder %v302_v60, 0.0  ;;  %v462_v5 = vmul.f32 0.2, %v302_v60  ;;  %vm424_vm12 = vcmp.ge.f32.partialorder %v294_v1, 0.0 }
  0xf6   :  { %693 = vst.msk [vmem:[%s1229_s3 + $0x50] sm:$0xf] %vm672_vm2, %v811_v63  ;;  %v515_v6 = vsel %vm443_vm9, %v369_v54, %v479_v0  ;;  %v460_v7 = vmul.f32 0.2, %v294_v1  ;;  %v296_v9 = vpop.f32.mrb[7].mxu0  ;;  %v376_v10 = vpop.f32.mrb[7].mxu1  ;;  %v385_v23 = vadd.f32 %v887_v3, %v1041_v24 }
  0xf7   :  { %v814_v11 = vpack.c.bf16 %v515_v6, %v515_v6  ;;  %v513_v12 = vsel %vm441_vm10, %v361_v59, %v477_v4  ;;  %v498_v13 = vsel %vm426_vm11, %v302_v60, %v462_v5  ;;  %v297_v14 = vadd.f32 %v1041_v24, %v296_v9 }
  0xf8   :  { %v812_v15 = vpack.c.bf16 %v513_v12, %v513_v12  ;;  %v797_v16 = vpack.c.bf16 %v498_v13, %v498_v13  ;;  %v496_v17 = vsel %vm424_vm12, %v294_v1, %v460_v7  ;;  %vm427_vm13 = vcmp.ge.f32.partialorder %v305_v8, 0.0 }
  0xf9   :  { %696 = vst.msk [vmem:[%s1229_s3 + $0x5c] sm:$0xf] %vm672_vm2, %v814_v11  ;;  %v795_v18 = vpack.c.bf16 %v496_v17, %v496_v17  ;;  %v463_v19 = vmul.f32 0.2, %v305_v8  ;;  %vm425_vm14 = vcmp.ge.f32.partialorder %v297_v14, 0.0  ;;  %v377_v25 = vadd.f32 %v1041_v24, %v376_v10  ;;  %v870_v26 = vpop.f32.mrb[8].mxu0 }
  0xfa   :  { %v461_v20 = vmul.f32 0.2, %v297_v14  ;;  %694 = vst.msk [vmem:[%s1229_s3 + $0x54] sm:$0xf] %vm672_vm2, %v812_v15  ;;  %679 = vst.msk [vmem:[%s1229_s3 + $0x18] sm:$0xf] %vm672_vm2, %v797_v16  ;;  %v318_v30 = vadd.f32 %v870_v26, %v1041_v24 }
  0xfb   :  { %v890_v27 = vpop.f32.mrb[8].mxu1  ;;  %677 = vst.msk [vmem:[%s1229_s3 + $0x10] sm:$0xf] %vm672_vm2, %v795_v18  ;;  %v499_v28 = vsel %vm427_vm13, %v305_v8, %v463_v19  ;;  %v309_v31 = vpop.f32.mrb[9].mxu0  ;;  %vm446_vm15 = vcmp.ge.f32.partialorder %v382_v21, 0.0  ;;  %vm444_vm0 = vcmp.ge.f32.partialorder %v374_v22, 0.0 }
  0xfc   :  { %v497_v29 = vsel %vm425_vm14, %v297_v14, %v461_v20  ;;  %v398_v32 = vadd.f32 %v890_v27, %v1041_v24  ;;  %v389_v33 = vpop.f32.mrb[9].mxu1  ;;  %v798_v34 = vpack.c.bf16 %v499_v28, %v499_v28  ;;  %v482_v36 = vmul.f32 0.2, %v382_v21  ;;  %v871_v37 = vpop.f32.mrb[10].mxu0 }
  0xfd   :  { %v796_v35 = vpack.c.bf16 %v497_v29, %v497_v29  ;;  %v891_v38 = vpop.f32.mrb[10].mxu1  ;;  %v480_v39 = vmul.f32 0.2, %v374_v22  ;;  %vm447_vm1 = vcmp.ge.f32.partialorder %v385_v23, 0.0  ;;  %v483_v40 = vmul.f32 0.2, %v385_v23 }
  0xfe   :  { %680 = vst.msk [vmem:[%s1229_s3 + $0x1c] sm:$0xf] %vm672_vm2, %v798_v34  ;;  %v518_v41 = vsel %vm446_vm15, %v382_v21, %v482_v36  ;;  %vm445_vm3 = vcmp.ge.f32.partialorder %v377_v25, 0.0  ;;  %v481_v42 = vmul.f32 0.2, %v377_v25  ;;  %vm430_vm4 = vcmp.ge.f32.partialorder %v318_v30, 0.0 }
  0xff   :  { %678 = vst.msk [vmem:[%s1229_s3 + $0x14] sm:$0xf] %vm672_vm2, %v796_v35  ;;  %v312_v43 = vpop.f32.mrb[11].mxu0  ;;  %v392_v44 = vpop.f32.mrb[11].mxu1  ;;  %v817_v45 = vpack.c.bf16 %v518_v41, %v518_v41  ;;  %v516_v46 = vsel %vm444_vm0, %v374_v22, %v480_v39  ;;  %v519_v47 = vsel %vm447_vm1, %v385_v23, %v483_v40  ;;  %v466_v48 = vmul.f32 0.2, %v318_v30 }
 0x100   :  { %v815_v49 = vpack.c.bf16 %v516_v46, %v516_v46  ;;  %v818_v50 = vpack.c.bf16 %v519_v47, %v519_v47  ;;  %v517_v51 = vsel %vm445_vm3, %v377_v25, %v481_v42  ;;  %v310_v52 = vadd.f32 %v1041_v24, %v309_v31 }
 0x101   :  { %699 = vst.msk [vmem:[%s1229_s3 + $0x68] sm:$0xf] %vm672_vm2, %v817_v45  ;;  %v816_v53 = vpack.c.bf16 %v517_v51, %v517_v51  ;;  %v502_v54 = vsel %vm430_vm4, %v318_v30, %v466_v48  ;;  %v321_v55 = vadd.f32 %v871_v37, %v1041_v24  ;;  %v313_v56 = vadd.f32 %v1041_v24, %v312_v43  ;;  %v874_v59 = vpop.f32.mrb[12].mxu0  ;;  %v894_v60 = vpop.f32.mrb[12].mxu1 }
 0x102   :  { %697 = vst.msk [vmem:[%s1229_s3 + $0x60] sm:$0xf] %vm672_vm2, %v815_v49  ;;  %700 = vst.msk [vmem:[%s1229_s3 + $0x6c] sm:$0xf] %vm672_vm2, %v818_v50  ;;  %v801_v57 = vpack.c.bf16 %v502_v54, %v502_v54  ;;  %vm428_vm5 = vcmp.ge.f32.partialorder %v310_v52, 0.0  ;;  %vm450_vm6 = vcmp.ge.f32.partialorder %v398_v32, 0.0  ;;  %v390_v1 = vadd.f32 %v1041_v24, %v389_v33 }
 0x103   :  { %v464_v58 = vmul.f32 0.2, %v310_v52  ;;  %698 = vst.msk [vmem:[%s1229_s3 + $0x64] sm:$0xf] %vm672_vm2, %v816_v53  ;;  %vm431_vm7 = vcmp.ge.f32.partialorder %v321_v55, 0.0  ;;  %vm429_vm8 = vcmp.ge.f32.partialorder %v313_v56, 0.0  ;;  %v401_v2 = vadd.f32 %v891_v38, %v1041_v24 }
 0x104   :  { %v467_v61 = vmul.f32 0.2, %v321_v55  ;;  %v465_v62 = vmul.f32 0.2, %v313_v56  ;;  %683 = vst.msk [vmem:[%s1229_s3 + $0x28] sm:$0xf] %vm672_vm2, %v801_v57  ;;  %v393_v8 = vadd.f32 %v1041_v24, %v392_v44  ;;  %v334_v20 = vadd.f32 %v874_v59, %v1041_v24 }
 0x105   :  { %v500_v63 = vsel %vm428_vm5, %v310_v52, %v464_v58  ;;  %v486_v0 = vmul.f32 0.2, %v398_v32  ;;  %v325_v3 = vpop.f32.mrb[13].mxu0  ;;  %v405_v4 = vpop.f32.mrb[13].mxu1  ;;  %vm448_vm9 = vcmp.ge.f32.partialorder %v390_v1, 0.0  ;;  %vm451_vm10 = vcmp.ge.f32.partialorder %v401_v2, 0.0 }
 0x106   :  { %v799_v5 = vpack.c.bf16 %v500_v63, %v500_v63  ;;  %v503_v6 = vsel %vm431_vm7, %v321_v55, %v467_v61  ;;  %v501_v7 = vsel %vm429_vm8, %v313_v56, %v465_v62  ;;  %v875_v9 = vpop.f32.mrb[14].mxu0  ;;  %v895_v10 = vpop.f32.mrb[14].mxu1  ;;  %v484_v17 = vmul.f32 0.2, %v390_v1 }
 0x107   :  { %v802_v11 = vpack.c.bf16 %v503_v6, %v503_v6  ;;  %v800_v12 = vpack.c.bf16 %v501_v7, %v501_v7  ;;  %v522_v13 = vsel %vm450_vm6, %v398_v32, %v486_v0  ;;  %v328_v14 = vpop.f32.mrb[15].mxu0  ;;  %v408_v15 = vpop.f32.mrb[15].mxu1  ;;  %v487_v18 = vmul.f32 0.2, %v401_v2 }
 0x108   :  { %681 = vst.msk [vmem:[%s1229_s3 + $0x20] sm:$0xf] %vm672_vm2, %v799_v5  ;;  %v821_v16 = vpack.c.bf16 %v522_v13, %v522_v13  ;;  %vm449_vm11 = vcmp.ge.f32.partialorder %v393_v8, 0.0  ;;  %v485_v19 = vmul.f32 0.2, %v393_v8  ;;  %v326_v21 = vadd.f32 %v1041_v24, %v325_v3 }
 0x109   :  { %684 = vst.msk [vmem:[%s1229_s3 + $0x2c] sm:$0xf] %vm672_vm2, %v802_v11  ;;  %682 = vst.msk [vmem:[%s1229_s3 + $0x24] sm:$0xf] %vm672_vm2, %v800_v12  ;;  %v520_v22 = vsel %vm448_vm9, %v390_v1, %v484_v17  ;;  %v523_v23 = vsel %vm451_vm10, %v401_v2, %v487_v18  ;;  %v337_v25 = vadd.f32 %v875_v9, %v1041_v24  ;;  %vm434_vm12 = vcmp.ge.f32.partialorder %v334_v20, 0.0  ;;  %v878_v30 = vpop.f32.mrb[16].mxu0 }
 0x10a   :  { %703 = vst.msk [vmem:[%s1229_s3 + $0x78] sm:$0xf] %vm672_vm2, %v821_v16  ;;  %v329_v26 = vadd.f32 %v1041_v24, %v328_v14  ;;  %v819_v27 = vpack.c.bf16 %v520_v22, %v520_v22  ;;  %v822_v28 = vpack.c.bf16 %v523_v23, %v523_v23  ;;  %v521_v29 = vsel %vm449_vm11, %v393_v8, %v485_v19  ;;  %v341_v34 = vpop.f32.mrb[17].mxu0 }
 0x10b   :  { %v820_v31 = vpack.c.bf16 %v521_v29, %v521_v29  ;;  %v470_v32 = vmul.f32 0.2, %v334_v20  ;;  %vm432_vm13 = vcmp.ge.f32.partialorder %v326_v21, 0.0  ;;  %v468_v33 = vmul.f32 0.2, %v326_v21  ;;  %v879_v41 = vpop.f32.mrb[18].mxu0 }
 0x10c   :  { %701 = vst.msk [vmem:[%s1229_s3 + $0x70] sm:$0xf] %vm672_vm2, %v819_v27  ;;  %704 = vst.msk [vmem:[%s1229_s3 + $0x7c] sm:$0xf] %vm672_vm2, %v822_v28  ;;  %vm435_vm14 = vcmp.ge.f32.partialorder %v337_v25, 0.0  ;;  %vm433_vm15 = vcmp.ge.f32.partialorder %v329_v26, 0.0  ;;  %v414_v39 = vadd.f32 %v894_v60, %v1041_v24  ;;  %v406_v40 = vadd.f32 %v1041_v24, %v405_v4 }
 0x10d   :  { %v471_v35 = vmul.f32 0.2, %v337_v25  ;;  %v469_v36 = vmul.f32 0.2, %v329_v26  ;;  %702 = vst.msk [vmem:[%s1229_s3 + $0x74] sm:$0xf] %vm672_vm2, %v820_v31  ;;  %v506_v37 = vsel %vm434_vm12, %v334_v20, %v470_v32  ;;  %v504_v38 = vsel %vm432_vm13, %v326_v21, %v468_v33 }
 0x10e   :  { %v805_v42 = vpack.c.bf16 %v506_v37, %v506_v37  ;;  %v803_v43 = vpack.c.bf16 %v504_v38, %v504_v38  ;;  %v344_v46 = vpop.f32.mrb[19].mxu0  ;;  %vm454_vm0 = vcmp.ge.f32.partialorder %v414_v39, 0.0  ;;  %v490_v49 = vmul.f32 0.2, %v414_v39 }
 0x10f   :  { %v507_v44 = vsel %vm435_vm14, %v337_v25, %v471_v35  ;;  %v505_v45 = vsel %vm433_vm15, %v329_v26, %v469_v36  ;;  %vm452_vm1 = vcmp.ge.f32.partialorder %v406_v40, 0.0  ;;  %v488_v50 = vmul.f32 0.2, %v406_v40 }
 0x110   :  { %v806_v47 = vpack.c.bf16 %v507_v44, %v507_v44  ;;  %v804_v48 = vpack.c.bf16 %v505_v45, %v505_v45  ;;  %687 = vst.msk [vmem:[%s1229_s3 + $0x38] sm:$0xf] %vm672_vm2, %v805_v42  ;;  %685 = vst.msk [vmem:[%s1229_s3 + $0x30] sm:$0xf] %vm672_vm2, %v803_v43  ;;  %v417_v51 = vadd.f32 %v895_v10, %v1041_v24 }
 0x111   :  { %v409_v52 = vadd.f32 %v1041_v24, %v408_v15  ;;  %v526_v53 = vsel %vm454_vm0, %v414_v39, %v490_v49  ;;  %v350_v54 = vadd.f32 %v878_v30, %v1041_v24  ;;  %v342_v55 = vadd.f32 %v1041_v24, %v341_v34 }
 0x112   :  { %688 = vst.msk [vmem:[%s1229_s3 + $0x3c] sm:$0xf] %vm672_vm2, %v806_v47  ;;  %686 = vst.msk [vmem:[%s1229_s3 + $0x34] sm:$0xf] %vm672_vm2, %v804_v48  ;;  %v353_v56 = vadd.f32 %v879_v41, %v1041_v24  ;;  %v825_v57 = vpack.c.bf16 %v526_v53, %v526_v53  ;;  %v524_v58 = vsel %vm452_vm1, %v406_v40, %v488_v50  ;;  %vm455_vm3 = vcmp.ge.f32.partialorder %v417_v51, 0.0 }
 0x113   :  { %v491_v59 = vmul.f32 0.2, %v417_v51  ;;  %v823_v60 = vpack.c.bf16 %v524_v58, %v524_v58  ;;  %vm453_vm4 = vcmp.ge.f32.partialorder %v409_v52, 0.0  ;;  %v489_v61 = vmul.f32 0.2, %v409_v52 }
 0x114   :  { %vm438_vm5 = vcmp.ge.f32.partialorder %v350_v54, 0.0  ;;  %707 = vst.msk [vmem:[%s1229_s3 + $0x88] sm:$0xf] %vm672_vm2, %v825_v57  ;;  %v474_v63 = vmul.f32 0.2, %v350_v54  ;;  %vm436_vm6 = vcmp.ge.f32.partialorder %v342_v55, 0.0  ;;  %v345_v7 = vadd.f32 %v1041_v24, %v344_v46 }
 0x115   :  { %v527_v62 = vsel %vm455_vm3, %v417_v51, %v491_v59  ;;  %v472_v0 = vmul.f32 0.2, %v342_v55  ;;  %705 = vst.msk [vmem:[%s1229_s3 + $0x80] sm:$0xf] %vm672_vm2, %v823_v60  ;;  %v525_v2 = vsel %vm453_vm4, %v409_v52, %v489_v61  ;;  %vm439_vm7 = vcmp.ge.f32.partialorder %v353_v56, 0.0 }
 0x116   :  { %v826_v1 = vpack.c.bf16 %v527_v62, %v527_v62  ;;  %v475_v3 = vmul.f32 0.2, %v353_v56  ;;  %v824_v4 = vpack.c.bf16 %v525_v2, %v525_v2  ;;  %v510_v5 = vsel %vm438_vm5, %v350_v54, %v474_v63 }
 0x117   :  { %v508_v6 = vsel %vm436_vm6, %v342_v55, %v472_v0  ;;  %v809_v8 = vpack.c.bf16 %v510_v5, %v510_v5  ;;  %vm437_vm8 = vcmp.ge.f32.partialorder %v345_v7, 0.0  ;;  %v473_v12 = vmul.f32 0.2, %v345_v7 }
 0x118   :  { %708 = vst.msk [vmem:[%s1229_s3 + $0x8c] sm:$0xf] %vm672_vm2, %v826_v1  ;;  %v807_v9 = vpack.c.bf16 %v508_v6, %v508_v6  ;;  %v511_v10 = vsel %vm439_vm7, %v353_v56, %v475_v3  ;;  %706 = vst.msk [vmem:[%s1229_s3 + $0x84] sm:$0xf] %vm672_vm2, %v824_v4 }
 0x119   :  { %v810_v11 = vpack.c.bf16 %v511_v10, %v511_v10  ;;  %691 = vst.msk [vmem:[%s1229_s3 + $0x48] sm:$0xf] %vm672_vm2, %v809_v8  ;;  %v509_v24 = vsel %vm437_vm8, %v345_v7, %v473_v12 }
 0x11a   :  { %689 = vst.msk [vmem:[%s1229_s3 + $0x40] sm:$0xf] %vm672_vm2, %v807_v9  ;;  %v808_v13 = vpack.c.bf16 %v509_v24, %v509_v24 }
 0x11b   :  { %692 = vst.msk [vmem:[%s1229_s3 + $0x4c] sm:$0xf] %vm672_vm2, %v810_v11 }
 0x11c   :  { %690 = vst.msk [vmem:[%s1229_s3 + $0x44] sm:$0xf] %vm672_vm2, %v808_v13 }

// kernel: dis_forward.10
= control target key start
LH: loop header
LB: loop body
LE: loop exit
PB: predicated region body
PF: predicated region fallthrough
CT: control target
= control target key end

     0   :  { %v724_v0 = vmov 0.0   ;;  %vm725_vm0 = vmmov 0   ;;  %vm186_vm1 = vcmask 1043456   ;;  %vm146_vm2 = vcmask 588800   ;;  %s979_s1 = inlined_call_operand.vmem [shape: bf16[72,64], index: 1, kind: input, shape index: {}]   ;;  %s980_s0 = inlined_call_operand.vmem [shape: bf16[200,72], index: 0, kind: input, shape index: {}]   ;;  %s981_s2 = inlined_call_operand.vmem [shape: f32[1,64], index: 2, kind: input, shape index: {}]   ;;  %s982_s3 = inlined_call_operand.vmem [shape: bf16[200,64], index: 3, kind: output, shape index: {}]  }
   0x1   :  { %632 = vmatprep.subr.bf16.mxu0 %v724_v0  ;;  %v706_v1 = vld [vmem:[%s979_s1] sm:$0xff]   ;;  %694 = vmatprep.subr.bf16.mxu1 %v724_v0  ;;  %v707_v2 = vld [vmem:[%s979_s1 + $0x8] sm:$0xff]   ;;  %v708_v3 = vld [vmem:[%s979_s1 + $0x10] sm:$0xff]   ;;  %vm502_vm5 = vcmask 519168  }
   0x2   :  { %642 = vmatprep.mubr.msk.bf16.mxu0 %vm725_vm0, %v724_v0  ;;  %670 = vmatprep.mubr.msk.bf16.mxu1 %vm725_vm0, %v724_v0  ;;  %v709_v4 = vld [vmem:[%s979_s1 + $0x18] sm:$0xff]   ;;  %v710_v5 = vld [vmem:[%s979_s1 + $0x20] ss:$0 sps:$4 sm:$0xff]   ;;  %v713_v9 = vld [vmem:[%s980_s0 + $0x8] sm:$0xff]  }
   0x3   :  { %633 = vmatpush3.bf16.msra.mxu0 %v706_v1  ;;  %699 = vmatpush3.bf16.msra.mxu1 %v706_v1  ;;  %v188_v6 = vsel %vm186_vm1, %v710_v5, 0  ;;  %v711_v7 = vld [vmem:[%s980_s0] sm:$0xff]   ;;  %v712_v8 = vld [vmem:[%s980_s0 + $0x38] sm:$0xff]   ;;  %v715_v11 = vld [vmem:[%s980_s0 + $0x10] sm:$0xff]  }
   0x4   :  { %634 = vmatprep.subr.bf16.mxu0 %v724_v0  ;;  %695 = vmatprep.subr.bf16.mxu1 %v724_v0  ;;  %v714_v10 = vld [vmem:[%s980_s0 + $0x40] sm:$0xff]   ;;  %v716_v12 = vld [vmem:[%s980_s0 + $0x48] sm:$0xff]   ;;  %v717_v13 = vld [vmem:[%s980_s0 + $0x18] sm:$0xff]  }
   0x5   :  { %v718_v14 = vld [vmem:[%s980_s0 + $0x50] sm:$0xff]   ;;  %v719_v15 = vld [vmem:[%s980_s0 + $0x20] sm:$0xff]   ;;  %v720_v16 = vld [vmem:[%s980_s0 + $0x58] sm:$0xff]  }
   0x6   :  { %v721_v17 = vld [vmem:[%s980_s0 + $0x28] sm:$0xff]   ;;  %v722_v18 = vld [vmem:[%s980_s0 + $0x60] ss:$0 sps:$4 sm:$0xff]   ;;  %v723_v19 = vld [vmem:[%s980_s0 + $0x30] sm:$0xff]  }
   0x7   :  { %635 = vmatpush3.bf16.msra.mxu0 %v707_v2  ;;  %700 = vmatpush3.bf16.msra.mxu1 %v707_v2  ;;  %v852_v20 = vld [vmem:[%s981_s2] ss:$0 sm:$0xff] }
   0x8   :  { %636 = vmatprep.subr.bf16.mxu0 %v724_v0  ;;  %696 = vmatprep.subr.bf16.mxu1 %v724_v0 }
   0xb   :  { %637 = vmatpush3.bf16.msra.mxu0 %v708_v3  ;;  %701 = vmatpush3.bf16.msra.mxu1 %v708_v3 }
   0xc   :  { %638 = vmatprep.subr.bf16.mxu0 %v724_v0  ;;  %697 = vmatprep.subr.bf16.mxu1 %v724_v0 }
   0xf   :  { %639 = vmatpush3.bf16.msra.mxu0 %v709_v4  ;;  %702 = vmatpush3.bf16.msra.mxu1 %v709_v4 }
  0x10   :  { %640 = vmatprep.subr.bf16.mxu0 %v724_v0  ;;  %698 = vmatprep.subr.bf16.mxu1 %v724_v0 }
  0x13   :  { %641 = vmatpush3.bf16.msra.mxu0 %v188_v6  ;;  %703 = vmatpush3.bf16.msra.mxu1 %v188_v6 }
  0x16   :  { %643 = vmatmul.mubr.msk.bf16.vlgmr.msra.gmra.mrb[0].mxu0 %vm146_vm2, %v711_v7  ;;  %671 = vmatmul.mubr.msk.bf16.vlgmr.msra.gmra.mrb[0].mxu1 %vm146_vm2, %v712_v8 }
  0x17   :  { %646 = vmatprep.mubr.msk.bf16.mxu0 %vm725_vm0, %v724_v0  ;;  %674 = vmatprep.mubr.msk.bf16.mxu1 %vm725_vm0, %v724_v0 }
  0x1e   :  { %647 = vmatmul.mubr.msk.bf16.gmra.mrb[4].mxu0 %vm146_vm2, %v713_v9  ;;  %675 = vmatmul.mubr.msk.bf16.gmra.mrb[4].mxu1 %vm146_vm2, %v714_v10 }
  0x1f   :  { %650 = vmatprep.mubr.msk.bf16.mxu0 %vm725_vm0, %v724_v0  ;;  %678 = vmatprep.mubr.msk.bf16.mxu1 %vm725_vm0, %v724_v0 }
  0x26   :  { %651 = vmatmul.mubr.msk.bf16.gmra.mrb[8].mxu0 %vm146_vm2, %v715_v11  ;;  %679 = vmatmul.mubr.msk.bf16.gmra.mrb[8].mxu1 %vm146_vm2, %v716_v12 }
  0x27   :  { %654 = vmatprep.mubr.msk.bf16.mxu0 %vm725_vm0, %v724_v0  ;;  %682 = vmatprep.mubr.msk.bf16.mxu1 %vm725_vm0, %v724_v0 }
  0x2e   :  { %655 = vmatmul.mubr.msk.bf16.gmra.mrb[12].mxu0 %vm146_vm2, %v717_v13  ;;  %683 = vmatmul.mubr.msk.bf16.gmra.mrb[12].mxu1 %vm146_vm2, %v718_v14 }
  0x2f   :  { %658 = vmatprep.mubr.msk.bf16.mxu0 %vm725_vm0, %v724_v0  ;;  %686 = vmatprep.mubr.msk.bf16.mxu1 %vm725_vm0, %v724_v0 }
  0x36   :  { %659 = vmatmul.mubr.msk.bf16.gmra.mrb[16].mxu0 %vm146_vm2, %v719_v15  ;;  %687 = vmatmul.mubr.msk.bf16.gmra.mrb[16].mxu1 %vm146_vm2, %v720_v16 }
  0x37   :  { %662 = vmatprep.mubr.msk.bf16.mxu0 %vm725_vm0, %v724_v0  ;;  %690 = vmatprep.mubr.msk.bf16.mxu1 %vm725_vm0, %v724_v0 }
  0x3e   :  { %663 = vmatmul.mubr.msk.bf16.gmra.mrb[20].mxu0 %vm146_vm2, %v721_v17  ;;  %691 = vmatmul.mubr.msk.bf16.gmra.mrb[20].mxu1 %vm146_vm2, %v722_v18 }
  0x3f   :  { %666 = vmatprep.mubr.msk.bf16.mxu0 %vm725_vm0, %v724_v0 }
  0x46   :  { %667 = vmatmul.mubr.msk.bf16.gmra.mrb[24].mxu0 %vm146_vm2, %v723_v19 }
  0xe9   :  { %v224_v21 = vpop.f32.mrb[0].mxu0  ;;  %v280_v22 = vpop.f32.mrb[0].mxu1 }
  0xea   :  { %v225_v23 = vadd.f32 %v852_v20, %v224_v21  ;;  %v644_v24 = vpop.f32.mrb[1].mxu0  ;;  %v281_v25 = vadd.f32 %v852_v20, %v280_v22  ;;  %v672_v26 = vpop.f32.mrb[1].mxu1 }
  0xeb   :  { %v227_v27 = vpop.f32.mrb[2].mxu0  ;;  %v283_v28 = vpop.f32.mrb[2].mxu1 }
  0xec   :  { %vm326_vm3 = vcmp.ge.f32.partialorder %v225_v23, 0.0  ;;  %v351_v29 = vmul.f32 0.2, %v225_v23  ;;  %v228_v30 = vadd.f32 %v852_v20, %v227_v27  ;;  %v645_v31 = vpop.f32.mrb[3].mxu0  ;;  %vm340_vm4 = vcmp.ge.f32.partialorder %v281_v25, 0.0  ;;  %v673_v32 = vpop.f32.mrb[3].mxu1 }
  0xed   :  { %v365_v33 = vmul.f32 0.2, %v281_v25  ;;  %v284_v34 = vadd.f32 %v852_v20, %v283_v28 }
  0xee   :  { %v376_v35 = vsel %vm326_vm3, %v225_v23, %v351_v29  ;;  %vm327_vm6 = vcmp.ge.f32.partialorder %v228_v30, 0.0  ;;  %v352_v36 = vmul.f32 0.2, %v228_v30 }
  0xef   :  { %v589_v37 = vpack.c.bf16 %v376_v35, %v376_v35  ;;  %v390_v38 = vsel %vm340_vm4, %v281_v25, %v365_v33  ;;  %vm341_vm7 = vcmp.ge.f32.partialorder %v284_v34, 0.0  ;;  %v366_v39 = vmul.f32 0.2, %v284_v34 }
  0xf0   :  { %v377_v40 = vsel %vm327_vm6, %v228_v30, %v352_v36  ;;  %v603_v41 = vpack.c.bf16 %v390_v38, %v390_v38 }
  0xf1   :  { %503 = vst.msk [vmem:[%s982_s3] sm:$0xf] %vm502_vm5, %v589_v37  ;;  %v590_v42 = vpack.c.bf16 %v377_v40, %v377_v40  ;;  %v232_v43 = vpop.f32.mrb[4].mxu0  ;;  %v391_v44 = vsel %vm341_vm7, %v284_v34, %v366_v39  ;;  %v288_v45 = vpop.f32.mrb[4].mxu1 }
  0xf2   :  { %517 = vst.msk [vmem:[%s982_s3 + $0x38] sm:$0xf] %vm502_vm5, %v603_v41  ;;  %v233_v46 = vadd.f32 %v852_v20, %v232_v43  ;;  %v604_v47 = vpack.c.bf16 %v391_v44, %v391_v44  ;;  %v648_v48 = vpop.f32.mrb[5].mxu0  ;;  %v289_v49 = vadd.f32 %v852_v20, %v288_v45  ;;  %v676_v50 = vpop.f32.mrb[5].mxu1 }
  0xf3   :  { %504 = vst.msk [vmem:[%s982_s3 + $0x4] sm:$0xf] %vm502_vm5, %v590_v42  ;;  %v235_v51 = vpop.f32.mrb[6].mxu0  ;;  %v291_v52 = vpop.f32.mrb[6].mxu1 }
  0xf4   :  { %vm328_vm8 = vcmp.ge.f32.partialorder %v233_v46, 0.0  ;;  %v353_v53 = vmul.f32 0.2, %v233_v46  ;;  %518 = vst.msk [vmem:[%s982_s3 + $0x3c] sm:$0xf] %vm502_vm5, %v604_v47  ;;  %v236_v54 = vadd.f32 %v852_v20, %v235_v51  ;;  %v649_v55 = vpop.f32.mrb[7].mxu0  ;;  %v292_v58 = vadd.f32 %v852_v20, %v291_v52 }
  0xf5   :  { %vm342_vm9 = vcmp.ge.f32.partialorder %v289_v49, 0.0  ;;  %v677_v56 = vpop.f32.mrb[7].mxu1  ;;  %v367_v57 = vmul.f32 0.2, %v289_v49 }
  0xf6   :  { %v378_v59 = vsel %vm328_vm8, %v233_v46, %v353_v53  ;;  %vm329_vm10 = vcmp.ge.f32.partialorder %v236_v54, 0.0  ;;  %v354_v60 = vmul.f32 0.2, %v236_v54  ;;  %vm343_vm11 = vcmp.ge.f32.partialorder %v292_v58, 0.0 }
  0xf7   :  { %v591_v61 = vpack.c.bf16 %v378_v59, %v378_v59  ;;  %v392_v62 = vsel %vm342_vm9, %v289_v49, %v367_v57  ;;  %v368_v63 = vmul.f32 0.2, %v292_v58 }
  0xf8   :  { %v379_v0 = vsel %vm329_vm10, %v236_v54, %v354_v60  ;;  %v605_v1 = vpack.c.bf16 %v392_v62, %v392_v62 }
  0xf9   :  { %505 = vst.msk [vmem:[%s982_s3 + $0x8] sm:$0xf] %vm502_vm5, %v591_v61  ;;  %v592_v2 = vpack.c.bf16 %v379_v0, %v379_v0  ;;  %v240_v3 = vpop.f32.mrb[8].mxu0  ;;  %v393_v4 = vsel %vm343_vm11, %v292_v58, %v368_v63  ;;  %v296_v5 = vpop.f32.mrb[8].mxu1 }
  0xfa   :  { %519 = vst.msk [vmem:[%s982_s3 + $0x40] sm:$0xf] %vm502_vm5, %v605_v1  ;;  %v241_v6 = vadd.f32 %v852_v20, %v240_v3  ;;  %v606_v7 = vpack.c.bf16 %v393_v4, %v393_v4  ;;  %v652_v8 = vpop.f32.mrb[9].mxu0  ;;  %v297_v9 = vadd.f32 %v852_v20, %v296_v5  ;;  %v680_v10 = vpop.f32.mrb[9].mxu1 }
  0xfb   :  { %506 = vst.msk [vmem:[%s982_s3 + $0xc] sm:$0xf] %vm502_vm5, %v592_v2  ;;  %v243_v11 = vpop.f32.mrb[10].mxu0  ;;  %v299_v12 = vpop.f32.mrb[10].mxu1 }
  0xfc   :  { %vm330_vm12 = vcmp.ge.f32.partialorder %v241_v6, 0.0  ;;  %v355_v13 = vmul.f32 0.2, %v241_v6  ;;  %520 = vst.msk [vmem:[%s982_s3 + $0x44] sm:$0xf] %vm502_vm5, %v606_v7  ;;  %v244_v14 = vadd.f32 %v852_v20, %v243_v11  ;;  %v653_v15 = vpop.f32.mrb[11].mxu0  ;;  %v300_v18 = vadd.f32 %v852_v20, %v299_v12 }
  0xfd   :  { %vm344_vm13 = vcmp.ge.f32.partialorder %v297_v9, 0.0  ;;  %v681_v16 = vpop.f32.mrb[11].mxu1  ;;  %v369_v17 = vmul.f32 0.2, %v297_v9 }
  0xfe   :  { %v380_v19 = vsel %vm330_vm12, %v241_v6, %v355_v13  ;;  %vm331_vm14 = vcmp.ge.f32.partialorder %v244_v14, 0.0  ;;  %v356_v21 = vmul.f32 0.2, %v244_v14  ;;  %vm345_vm15 = vcmp.ge.f32.partialorder %v300_v18, 0.0 }
  0xff   :  { %v593_v22 = vpack.c.bf16 %v380_v19, %v380_v19  ;;  %v394_v23 = vsel %vm344_vm13, %v297_v9, %v369_v17  ;;  %v370_v24 = vmul.f32 0.2, %v300_v18 }
 0x100   :  { %v381_v25 = vsel %vm331_vm14, %v244_v14, %v356_v21  ;;  %v607_v26 = vpack.c.bf16 %v394_v23, %v394_v23 }
 0x101   :  { %507 = vst.msk [vmem:[%s982_s3 + $0x10] sm:$0xf] %vm502_vm5, %v593_v22  ;;  %v594_v27 = vpack.c.bf16 %v381_v25, %v381_v25  ;;  %v248_v28 = vpop.f32.mrb[12].mxu0  ;;  %v395_v29 = vsel %vm345_vm15, %v300_v18, %v370_v24  ;;  %v304_v30 = vpop.f32.mrb[12].mxu1 }
 0x102   :  { %521 = vst.msk [vmem:[%s982_s3 + $0x48] sm:$0xf] %vm502_vm5, %v607_v26  ;;  %v249_v31 = vadd.f32 %v852_v20, %v248_v28  ;;  %v608_v32 = vpack.c.bf16 %v395_v29, %v395_v29  ;;  %v656_v33 = vpop.f32.mrb[13].mxu0  ;;  %v305_v34 = vadd.f32 %v852_v20, %v304_v30  ;;  %v684_v35 = vpop.f32.mrb[13].mxu1 }
 0x103   :  { %508 = vst.msk [vmem:[%s982_s3 + $0x14] sm:$0xf] %vm502_vm5, %v594_v27  ;;  %v251_v36 = vpop.f32.mrb[14].mxu0  ;;  %v307_v37 = vpop.f32.mrb[14].mxu1 }
 0x104   :  { %vm332_vm0 = vcmp.ge.f32.partialorder %v249_v31, 0.0  ;;  %v357_v38 = vmul.f32 0.2, %v249_v31  ;;  %522 = vst.msk [vmem:[%s982_s3 + $0x4c] sm:$0xf] %vm502_vm5, %v608_v32  ;;  %v252_v39 = vadd.f32 %v852_v20, %v251_v36  ;;  %v657_v40 = vpop.f32.mrb[15].mxu0  ;;  %v308_v43 = vadd.f32 %v852_v20, %v307_v37 }
 0x105   :  { %vm346_vm1 = vcmp.ge.f32.partialorder %v305_v34, 0.0  ;;  %v685_v41 = vpop.f32.mrb[15].mxu1  ;;  %v371_v42 = vmul.f32 0.2, %v305_v34 }
 0x106   :  { %v382_v44 = vsel %vm332_vm0, %v249_v31, %v357_v38  ;;  %vm333_vm2 = vcmp.ge.f32.partialorder %v252_v39, 0.0  ;;  %v358_v45 = vmul.f32 0.2, %v252_v39  ;;  %vm347_vm3 = vcmp.ge.f32.partialorder %v308_v43, 0.0 }
 0x107   :  { %v595_v46 = vpack.c.bf16 %v382_v44, %v382_v44  ;;  %v396_v47 = vsel %vm346_vm1, %v305_v34, %v371_v42  ;;  %v372_v48 = vmul.f32 0.2, %v308_v43 }
 0x108   :  { %v383_v49 = vsel %vm333_vm2, %v252_v39, %v358_v45  ;;  %v609_v50 = vpack.c.bf16 %v396_v47, %v396_v47 }
 0x109   :  { %509 = vst.msk [vmem:[%s982_s3 + $0x18] sm:$0xf] %vm502_vm5, %v595_v46  ;;  %v596_v51 = vpack.c.bf16 %v383_v49, %v383_v49  ;;  %v256_v52 = vpop.f32.mrb[16].mxu0  ;;  %v397_v53 = vsel %vm347_vm3, %v308_v43, %v372_v48  ;;  %v312_v54 = vpop.f32.mrb[16].mxu1 }
 0x10a   :  { %523 = vst.msk [vmem:[%s982_s3 + $0x50] sm:$0xf] %vm502_vm5, %v609_v50  ;;  %v257_v55 = vadd.f32 %v852_v20, %v256_v52  ;;  %v610_v56 = vpack.c.bf16 %v397_v53, %v397_v53  ;;  %v660_v57 = vpop.f32.mrb[17].mxu0  ;;  %v313_v58 = vadd.f32 %v852_v20, %v312_v54  ;;  %v688_v59 = vpop.f32.mrb[17].mxu1 }
 0x10b   :  { %510 = vst.msk [vmem:[%s982_s3 + $0x1c] sm:$0xf] %vm502_vm5, %v596_v51  ;;  %v259_v60 = vpop.f32.mrb[18].mxu0  ;;  %v315_v61 = vpop.f32.mrb[18].mxu1 }
 0x10c   :  { %vm334_vm4 = vcmp.ge.f32.partialorder %v257_v55, 0.0  ;;  %v359_v62 = vmul.f32 0.2, %v257_v55  ;;  %524 = vst.msk [vmem:[%s982_s3 + $0x54] sm:$0xf] %vm502_vm5, %v610_v56  ;;  %v260_v63 = vadd.f32 %v852_v20, %v259_v60  ;;  %v661_v0 = vpop.f32.mrb[19].mxu0  ;;  %v316_v3 = vadd.f32 %v852_v20, %v315_v61 }
 0x10d   :  { %vm348_vm6 = vcmp.ge.f32.partialorder %v313_v58, 0.0  ;;  %v689_v1 = vpop.f32.mrb[19].mxu1  ;;  %v373_v2 = vmul.f32 0.2, %v313_v58 }
 0x10e   :  { %v384_v4 = vsel %vm334_vm4, %v257_v55, %v359_v62  ;;  %vm335_vm7 = vcmp.ge.f32.partialorder %v260_v63, 0.0  ;;  %v360_v5 = vmul.f32 0.2, %v260_v63  ;;  %vm349_vm8 = vcmp.ge.f32.partialorder %v316_v3, 0.0 }
 0x10f   :  { %v597_v6 = vpack.c.bf16 %v384_v4, %v384_v4  ;;  %v398_v7 = vsel %vm348_vm6, %v313_v58, %v373_v2  ;;  %v374_v8 = vmul.f32 0.2, %v316_v3 }
 0x110   :  { %v385_v9 = vsel %vm335_vm7, %v260_v63, %v360_v5  ;;  %v611_v10 = vpack.c.bf16 %v398_v7, %v398_v7 }
 0x111   :  { %511 = vst.msk [vmem:[%s982_s3 + $0x20] sm:$0xf] %vm502_vm5, %v597_v6  ;;  %v598_v11 = vpack.c.bf16 %v385_v9, %v385_v9  ;;  %v264_v12 = vpop.f32.mrb[20].mxu0  ;;  %v399_v13 = vsel %vm349_vm8, %v316_v3, %v374_v8  ;;  %v320_v14 = vpop.f32.mrb[20].mxu1 }
 0x112   :  { %525 = vst.msk [vmem:[%s982_s3 + $0x58] sm:$0xf] %vm502_vm5, %v611_v10  ;;  %v265_v15 = vadd.f32 %v852_v20, %v264_v12  ;;  %v612_v16 = vpack.c.bf16 %v399_v13, %v399_v13  ;;  %v664_v17 = vpop.f32.mrb[21].mxu0  ;;  %v321_v18 = vadd.f32 %v852_v20, %v320_v14  ;;  %v692_v19 = vpop.f32.mrb[21].mxu1 }
 0x113   :  { %512 = vst.msk [vmem:[%s982_s3 + $0x24] sm:$0xf] %vm502_vm5, %v598_v11  ;;  %v267_v21 = vpop.f32.mrb[22].mxu0  ;;  %v323_v22 = vpop.f32.mrb[22].mxu1 }
 0x114   :  { %vm336_vm9 = vcmp.ge.f32.partialorder %v265_v15, 0.0  ;;  %v361_v23 = vmul.f32 0.2, %v265_v15  ;;  %526 = vst.msk [vmem:[%s982_s3 + $0x5c] sm:$0xf] %vm502_vm5, %v612_v16  ;;  %v268_v24 = vadd.f32 %v852_v20, %v267_v21  ;;  %v665_v25 = vpop.f32.mrb[23].mxu0 }
 0x115   :  { %vm350_vm10 = vcmp.ge.f32.partialorder %v321_v18, 0.0  ;;  %v693_v26 = vpop.f32.mrb[23].mxu1  ;;  %v375_v27 = vmul.f32 0.2, %v321_v18 }
 0x116   :  { %v386_v28 = vsel %vm336_vm9, %v265_v15, %v361_v23  ;;  %vm337_vm11 = vcmp.ge.f32.partialorder %v268_v24, 0.0  ;;  %v362_v29 = vmul.f32 0.2, %v268_v24 }
 0x117   :  { %v599_v30 = vpack.c.bf16 %v386_v28, %v386_v28  ;;  %v400_v31 = vsel %vm350_vm10, %v321_v18, %v375_v27 }
 0x118   :  { %v387_v32 = vsel %vm337_vm11, %v268_v24, %v362_v29  ;;  %v613_v33 = vpack.c.bf16 %v400_v31, %v400_v31 }
 0x119   :  { %513 = vst.msk [vmem:[%s982_s3 + $0x28] sm:$0xf] %vm502_vm5, %v599_v30  ;;  %v600_v34 = vpack.c.bf16 %v387_v32, %v387_v32  ;;  %v272_v35 = vpop.f32.mrb[24].mxu0 }
 0x11a   :  { %527 = vst.msk [vmem:[%s982_s3 + $0x60] sm:$0xf] %vm502_vm5, %v613_v33  ;;  %v273_v36 = vadd.f32 %v852_v20, %v272_v35  ;;  %v668_v37 = vpop.f32.mrb[25].mxu0 }
 0x11b   :  { %514 = vst.msk [vmem:[%s982_s3 + $0x2c] sm:$0xf] %vm502_vm5, %v600_v34  ;;  %v275_v38 = vpop.f32.mrb[26].mxu0 }
 0x11c   :  { %vm338_vm12 = vcmp.ge.f32.partialorder %v273_v36, 0.0  ;;  %v363_v39 = vmul.f32 0.2, %v273_v36  ;;  %v276_v40 = vadd.f32 %v852_v20, %v275_v38  ;;  %v669_v41 = vpop.f32.mrb[27].mxu0 }
 0x11e   :  { %v388_v42 = vsel %vm338_vm12, %v273_v36, %v363_v39  ;;  %vm339_vm13 = vcmp.ge.f32.partialorder %v276_v40, 0.0  ;;  %v364_v43 = vmul.f32 0.2, %v276_v40 }
 0x11f   :  { %v601_v44 = vpack.c.bf16 %v388_v42, %v388_v42 }
 0x120   :  { %v389_v45 = vsel %vm339_vm13, %v276_v40, %v364_v43 }
 0x121   :  { %515 = vst.msk [vmem:[%s982_s3 + $0x30] sm:$0xf] %vm502_vm5, %v601_v44  ;;  %v602_v46 = vpack.c.bf16 %v389_v45, %v389_v45 }
 0x123   :  { %516 = vst.msk [vmem:[%s982_s3 + $0x34] sm:$0xf] %vm502_vm5, %v602_v46 }

// kernel: dis_forward.11
= control target key start
LH: loop header
LB: loop body
LE: loop exit
PB: predicated region body
PF: predicated region fallthrough
CT: control target
= control target key end

     0   :  { %vm558_vm0 = vcmask 523264   ;;  %vm986_vm1 = vcmask 257024   ;;  %s1768_s1 = inlined_call_operand.vmem [shape: bf16[576,32], index: 1, kind: input, shape index: {}]   ;;  %s1769_s0 = inlined_call_operand.vmem [shape: bf16[128,576], index: 0, kind: input, shape index: {}]   ;;  %s1770_s2 = inlined_call_operand.vmem [shape: f32[1,32], index: 2, kind: input, shape index: {}]   ;;  %s1771_s3 = inlined_call_operand.vmem [shape: bf16[128,32], index: 3, kind: output, shape index: {}]  }
   0x1   :  { %v1296_v0 = vld [vmem:[%s1768_s1 + $0x40] sm:$0xff]   ;;  %v1300_v4 = vld [vmem:[%s1768_s1 + $0x48] sm:$0xff]   ;;  %v1304_v8 = vld [vmem:[%s1768_s1 + $0x50] sm:$0xff]  }
   0x2   :  { %v1297_v1 = vld [vmem:[%s1768_s1 + $0xc0] sm:$0xff]   ;;  %1124 = vmatprep.subr.bf16.mxu0 %v1296_v0  ;;  %v1301_v5 = vld [vmem:[%s1768_s1 + $0xc8] sm:$0xff]   ;;  %v1305_v9 = vld [vmem:[%s1768_s1 + $0xd0] sm:$0xff]  }
   0x3   :  { %v1298_v2 = vld [vmem:[%s1768_s1] sm:$0xff]   ;;  %1188 = vmatprep.subr.bf16.mxu1 %v1297_v1  ;;  %v1302_v6 = vld [vmem:[%s1768_s1 + $0x8] sm:$0xff]   ;;  %v1306_v10 = vld [vmem:[%s1768_s1 + $0x10] sm:$0xff]  }
   0x4   :  { %v1299_v3 = vld [vmem:[%s1768_s1 + $0x80] sm:$0xff]   ;;  %1125 = vmatpush3.bf16.msra.mxu0 %v1298_v2  ;;  %v1303_v7 = vld [vmem:[%s1768_s1 + $0x88] sm:$0xff]   ;;  %v1307_v11 = vld [vmem:[%s1768_s1 + $0x90] sm:$0xff]  }
   0x5   :  { %1189 = vmatpush3.bf16.msra.mxu1 %v1299_v3  ;;  %1126 = vmatprep.subr.bf16.mxu0 %v1300_v4  ;;  %v1308_v12 = vld [vmem:[%s1768_s1 + $0x58] sm:$0xff]   ;;  %v1312_v16 = vld [vmem:[%s1768_s1 + $0x60] sm:$0xff]   ;;  %v1316_v20 = vld [vmem:[%s1768_s1 + $0x68] sm:$0xff]  }
   0x6   :  { %1190 = vmatprep.subr.bf16.mxu1 %v1301_v5  ;;  %v1309_v13 = vld [vmem:[%s1768_s1 + $0xd8] sm:$0xff]   ;;  %v1313_v17 = vld [vmem:[%s1768_s1 + $0xe0] sm:$0xff]   ;;  %v1317_v21 = vld [vmem:[%s1768_s1 + $0xe8] sm:$0xff]  }
   0x7   :  { %v1310_v14 = vld [vmem:[%s1768_s1 + $0x18] sm:$0xff]   ;;  %v1314_v18 = vld [vmem:[%s1768_s1 + $0x20] sm:$0xff]   ;;  %v1318_v22 = vld [vmem:[%s1768_s1 + $0x28] sm:$0xff]  }
   0x8   :  { %1127 = vmatpush3.bf16.msra.mxu0 %v1302_v6  ;;  %v1311_v15 = vld [vmem:[%s1768_s1 + $0x98] sm:$0xff]   ;;  %v1315_v19 = vld [vmem:[%s1768_s1 + $0xa0] sm:$0xff]   ;;  %v1319_v23 = vld [vmem:[%s1768_s1 + $0xa8] sm:$0xff]  }
   0x9   :  { %1191 = vmatpush3.bf16.msra.mxu1 %v1303_v7  ;;  %1128 = vmatprep.subr.bf16.mxu0 %v1304_v8  ;;  %v1320_v24 = vld [vmem:[%s1768_s1 + $0x70] sm:$0xff]   ;;  %v1324_v28 = vld [vmem:[%s1768_s1 + $0x78] sm:$0xff]   ;;  %v1333_v35 = vld [vmem:[%s1769_s0 + $0xc] ss:$20 sps:$4 sm:$0xff]  }
   0xa   :  { %1192 = vmatprep.subr.bf16.mxu1 %v1305_v9  ;;  %v1321_v25 = vld [vmem:[%s1768_s1 + $0xf0] sm:$0xff]   ;;  %v1325_v29 = vld [vmem:[%s1768_s1 + $0xf8] sm:$0xff]   ;;  %v1334_v36 = vld [vmem:[%s1768_s1 + $0x100] sm:$0xff]   ;;  %712 = vmatprep.mubr.bf16.mxu1 %v1333_v35 }
   0xb   :  { %v1322_v26 = vld [vmem:[%s1768_s1 + $0x30] sm:$0xff]   ;;  %v1326_v30 = vld [vmem:[%s1768_s1 + $0x38] sm:$0xff]   ;;  %v1335_v37 = vld [vmem:[%s1769_s0 + $0x2c] ss:$20 sps:$4 sm:$0xff]  }
   0xc   :  { %1129 = vmatpush3.bf16.msra.mxu0 %v1306_v10  ;;  %v1323_v27 = vld [vmem:[%s1768_s1 + $0xb0] sm:$0xff]   ;;  %v1327_v31 = vld [vmem:[%s1768_s1 + $0xb8] sm:$0xff]   ;;  %v1347_v42 = vld [vmem:[%s1768_s1 + $0x108] sm:$0xff]  }
   0xd   :  { %1193 = vmatpush3.bf16.msra.mxu1 %v1307_v11  ;;  %1130 = vmatprep.subr.bf16.mxu0 %v1308_v12  ;;  %v1328_v32 = vld [vmem:[%s1769_s0] ss:$20 sps:$4 sm:$0xff]   ;;  %v1330_v33 = vld [vmem:[%s1769_s0 + $0x4] ss:$20 sps:$4 sm:$0xff]   ;;  %v1331_v34 = vld [vmem:[%s1769_s0 + $0x8] ss:$20 sps:$4 sm:$0xff]  }
   0xe   :  { %1194 = vmatprep.subr.bf16.mxu1 %v1309_v13  ;;  %615 = vmatprep.mubr.bf16.mxu0 %v1330_v33  ;;  %v1337_v38 = vld [vmem:[%s1769_s0 + $0x34] ss:$20 sps:$4 sm:$0xff]   ;;  %v1340_v40 = vld [vmem:[%s1769_s0 + $0x30] ss:$20 sps:$4 sm:$0xff]   ;;  %v1346_v45 = vld [vmem:[%s1769_s0 + $0x58] ss:$20 sps:$4 sm:$0xff]  }
   0xf   :  { %v1339_v39 = vld [vmem:[%s1769_s0 + $0x28] ss:$20 sps:$4 sm:$0xff]   ;;  %v1345_v44 = vld [vmem:[%s1769_s0 + $0x50] ss:$20 sps:$4 sm:$0xff]   ;;  %v1352_v50 = vld [vmem:[%s1769_s0 + $0x78] ss:$20 sps:$4 sm:$0xff]  }
  0x10   :  { %1131 = vmatpush3.bf16.msra.mxu0 %v1310_v14  ;;  %v1341_v41 = vld [vmem:[%s1769_s0 + $0x54] ss:$20 sps:$4 sm:$0xff]   ;;  %v1343_v43 = vld [vmem:[%s1769_s0 + $0x5c] ss:$20 sps:$4 sm:$0xff]   ;;  %v1350_v48 = vld [vmem:[%s1769_s0 + $0x84] ss:$20 sps:$4 sm:$0xff]  }
  0x11   :  { %1195 = vmatpush3.bf16.msra.mxu1 %v1311_v15  ;;  %1132 = vmatprep.subr.bf16.mxu0 %v1312_v16  ;;  %v1360_v46 = vld [vmem:[%s1768_s1 + $0x110] sm:$0xff]   ;;  %v1373_v49 = vld [vmem:[%s1768_s1 + $0x118] sm:$0xff]   ;;  %v1356_v53 = vld [vmem:[%s1769_s0 + $0xac] ss:$20 sps:$4 sm:$0xff]  }
  0x12   :  { %1196 = vmatprep.subr.bf16.mxu1 %v1313_v17  ;;  %v1348_v47 = vld [vmem:[%s1769_s0 + $0x7c] ss:$20 sps:$4 sm:$0xff]   ;;  %v1353_v51 = vld [vmem:[%s1769_s0 + $0x80] ss:$20 sps:$4 sm:$0xff]   ;;  %v1354_v52 = vld [vmem:[%s1769_s0 + $0xa4] ss:$20 sps:$4 sm:$0xff]  }
  0x13   :  { %v1358_v54 = vld [vmem:[%s1769_s0 + $0xa0] ss:$20 sps:$4 sm:$0xff]   ;;  %v1359_v55 = vld [vmem:[%s1769_s0 + $0xa8] ss:$20 sps:$4 sm:$0xff]   ;;  %v1366_v59 = vld [vmem:[%s1769_s0 + $0xd0] ss:$20 sps:$4 sm:$0xff]  }
  0x14   :  { %1133 = vmatpush3.bf16.msra.mxu0 %v1314_v18  ;;  %v1361_v56 = vld [vmem:[%s1769_s0 + $0xcc] ss:$20 sps:$4 sm:$0xff]   ;;  %v1363_v57 = vld [vmem:[%s1769_s0 + $0xd4] ss:$20 sps:$4 sm:$0xff]   ;;  %v1369_v61 = vld [vmem:[%s1769_s0 + $0xfc] ss:$20 sps:$4 sm:$0xff]  }
  0x15   :  { %1197 = vmatpush3.bf16.msra.mxu1 %v1315_v19  ;;  %1134 = vmatprep.subr.bf16.mxu0 %v1316_v20  ;;  %v1365_v58 = vld [vmem:[%s1769_s0 + $0xc8] ss:$20 sps:$4 sm:$0xff]   ;;  %v1371_v62 = vld [vmem:[%s1769_s0 + $0xf0] ss:$20 sps:$4 sm:$0xff]   ;;  %v1372_v63 = vld [vmem:[%s1769_s0 + $0xf8] ss:$20 sps:$4 sm:$0xff]  }
  0x16   :  { %1198 = vmatprep.subr.bf16.mxu1 %v1317_v21  ;;  %v1367_v60 = vld [vmem:[%s1769_s0 + $0xf4] ss:$20 sps:$4 sm:$0xff]   ;;  %v1374_v0 = vld [vmem:[%s1769_s0 + $0x11c] ss:$20 sps:$4 sm:$0xff]   ;;  %v1376_v1 = vld [vmem:[%s1769_s0 + $0x124] ss:$20 sps:$4 sm:$0xff]  }
  0x17   :  { %v1378_v2 = vld [vmem:[%s1769_s0 + $0x118] ss:$20 sps:$4 sm:$0xff]   ;;  %v1379_v3 = vld [vmem:[%s1769_s0 + $0x120] ss:$20 sps:$4 sm:$0xff]   ;;  %v1380_v4 = vld [vmem:[%s1769_s0 + $0x10] ss:$20 sps:$4 sm:$0xff]  }
  0x18   :  { %1135 = vmatpush3.bf16.msra.mxu0 %v1318_v22  ;;  %v1381_v5 = vld [vmem:[%s1769_s0 + $0xb0] ss:$20 sps:$4 sm:$0xff]   ;;  %v1382_v6 = vld [vmem:[%s1769_s0 + $0x38] ss:$20 sps:$4 sm:$0xff]   ;;  %v1384_v8 = vld [vmem:[%s1769_s0 + $0x60] ss:$20 sps:$4 sm:$0xff]  }
  0x19   :  { %1199 = vmatpush3.bf16.msra.mxu1 %v1319_v23  ;;  %1136 = vmatprep.subr.bf16.mxu0 %v1320_v24  ;;  %v1383_v7 = vld [vmem:[%s1769_s0 + $0xd8] ss:$20 sps:$4 sm:$0xff]   ;;  %v1385_v9 = vld [vmem:[%s1769_s0 + $0x100] ss:$20 sps:$4 sm:$0xff]   ;;  %v1386_v10 = vld [vmem:[%s1769_s0 + $0x88] ss:$20 sps:$4 sm:$0xff]  }
  0x1a   :  { %1200 = vmatprep.subr.bf16.mxu1 %v1321_v25  ;;  %v1387_v11 = vld [vmem:[%s1769_s0 + $0x128] ss:$20 sps:$4 sm:$0xff]   ;;  %v1647_v14 = vld [vmem:[%s1770_s2] ss:$0 sm:$0xff] }
  0x1c   :  { %1137 = vmatpush3.bf16.msra.mxu0 %v1322_v26 }
  0x1d   :  { %1201 = vmatpush3.bf16.msra.mxu1 %v1323_v27  ;;  %1138 = vmatprep.subr.bf16.mxu0 %v1324_v28 }
  0x1e   :  { %1202 = vmatprep.subr.bf16.mxu1 %v1325_v29 }
  0x20   :  { %1139 = vmatpush3.bf16.msra.mxu0 %v1326_v30 }
  0x21   :  { %1203 = vmatpush3.bf16.msra.mxu1 %v1327_v31  ;;  %1264 = vmatprep.subr.bf16.mxu0 %v1334_v36 }
  0x22   :  { %1288 = vmatprep.subr.bf16.mxu1 %v1334_v36 }
  0x23   :  { %616 = vmatmul.mubr.bf16.vlgmr.msra.gmra.mrb[0].mxu0 %v1328_v32 }
  0x24   :  { %713 = vmatmul.mubr.bf16.vlgmr.msra.gmra.mrb[0].mxu1 %v1331_v34  ;;  %1265 = vmatpush3.bf16.msra.mxu0 %v1334_v36 }
  0x25   :  { %1292 = vmatpush3.bf16.msra.mxu1 %v1334_v36  ;;  %623 = vmatprep.mubr.bf16.mxu0 %v1335_v37 }
  0x26   :  { %720 = vmatprep.mubr.bf16.mxu1 %v1337_v38  ;;  %1266 = vmatprep.subr.bf16.mxu0 %v1347_v42 }
  0x27   :  { %1289 = vmatprep.subr.bf16.mxu1 %v1347_v42 }
  0x28   :  { %1267 = vmatpush3.bf16.msra.mxu0 %v1347_v42 }
  0x29   :  { %1293 = vmatpush3.bf16.msra.mxu1 %v1347_v42  ;;  %1268 = vmatprep.subr.bf16.mxu0 %v1360_v46 }
  0x2a   :  { %1290 = vmatprep.subr.bf16.mxu1 %v1360_v46 }
  0x2b   :  { %624 = vmatmul.mubr.bf16.gmra.mrb[4].mxu0 %v1339_v39 }
  0x2c   :  { %721 = vmatmul.mubr.bf16.gmra.mrb[4].mxu1 %v1340_v40  ;;  %631 = vmatprep.mubr.bf16.mxu0 %v1341_v41 }
  0x2d   :  { %728 = vmatprep.mubr.bf16.mxu1 %v1343_v43  ;;  %1269 = vmatpush3.bf16.msra.mxu0 %v1360_v46 }
  0x2e   :  { %1294 = vmatpush3.bf16.msra.mxu1 %v1360_v46  ;;  %1270 = vmatprep.subr.bf16.mxu0 %v1373_v49 }
  0x2f   :  { %1291 = vmatprep.subr.bf16.mxu1 %v1373_v49 }
  0x31   :  { %1271 = vmatpush3.bf16.msra.mxu0 %v1373_v49 }
  0x32   :  { %1295 = vmatpush3.bf16.msra.mxu1 %v1373_v49 }
  0x33   :  { %632 = vmatmul.mubr.bf16.gmra.mrb[8].mxu0 %v1345_v44 }
  0x34   :  { %729 = vmatmul.mubr.bf16.gmra.mrb[8].mxu1 %v1346_v45  ;;  %639 = vmatprep.mubr.bf16.mxu0 %v1348_v47 }
  0x35   :  { %736 = vmatprep.mubr.bf16.mxu1 %v1350_v48 }
  0x3b   :  { %640 = vmatmul.mubr.bf16.gmra.mrb[12].mxu0 %v1352_v50 }
  0x3c   :  { %737 = vmatmul.mubr.bf16.gmra.mrb[12].mxu1 %v1353_v51  ;;  %647 = vmatprep.mubr.bf16.mxu0 %v1354_v52 }
  0x3d   :  { %744 = vmatprep.mubr.bf16.mxu1 %v1356_v53 }
  0x43   :  { %648 = vmatmul.mubr.bf16.gmra.mrb[16].mxu0 %v1358_v54 }
  0x44   :  { %745 = vmatmul.mubr.bf16.gmra.mrb[16].mxu1 %v1359_v55  ;;  %655 = vmatprep.mubr.bf16.mxu0 %v1361_v56 }
  0x45   :  { %752 = vmatprep.mubr.bf16.mxu1 %v1363_v57 }
  0x4b   :  { %656 = vmatmul.mubr.bf16.gmra.mrb[20].mxu0 %v1365_v58 }
  0x4c   :  { %753 = vmatmul.mubr.bf16.gmra.mrb[20].mxu1 %v1366_v59  ;;  %663 = vmatprep.mubr.bf16.mxu0 %v1367_v60 }
  0x4d   :  { %760 = vmatprep.mubr.bf16.mxu1 %v1369_v61 }
  0x53   :  { %664 = vmatmul.mubr.bf16.gmra.mrb[24].mxu0 %v1371_v62 }
  0x54   :  { %761 = vmatmul.mubr.bf16.gmra.mrb[24].mxu1 %v1372_v63  ;;  %671 = vmatprep.mubr.bf16.mxu0 %v1374_v0 }
  0x55   :  { %768 = vmatprep.mubr.bf16.mxu1 %v1376_v1 }
  0x5b   :  { %672 = vmatmul.mubr.bf16.gmra.mrb[28].mxu0 %v1378_v2 }
  0x5c   :  { %769 = vmatmul.mubr.bf16.gmra.mrb[28].mxu1 %v1379_v3  ;;  %1272 = vmatprep.mubr.msk.bf16.mxu0 %vm558_vm0, %v1380_v4 }
  0x5d   :  { %1280 = vmatprep.mubr.msk.bf16.mxu1 %vm558_vm0, %v1381_v5 }
  0x63   :  { %1273 = vmatmul.mubr.msk.bf16.vlgmr.msra.gmra.mrb[32].mxu0 %vm558_vm0, %v1382_v6 }
  0x64   :  { %1281 = vmatmul.mubr.msk.bf16.vlgmr.msra.gmra.mrb[32].mxu1 %vm558_vm0, %v1383_v7  ;;  %1276 = vmatprep.mubr.msk.bf16.mxu0 %vm558_vm0, %v1384_v8 }
  0x65   :  { %1284 = vmatprep.mubr.msk.bf16.mxu1 %vm558_vm0, %v1385_v9 }
  0x6b   :  { %1277 = vmatmul.mubr.msk.bf16.gmra.mrb[36].mxu0 %vm558_vm0, %v1386_v10 }
  0x6c   :  { %1285 = vmatmul.mubr.msk.bf16.gmra.mrb[36].mxu1 %vm558_vm0, %v1387_v11 }
  0xf6   :  { %v1140_v12 = vpop.f32.mrb[0].mxu0 }
  0xf7   :  { %v1204_v13 = vpop.f32.mrb[0].mxu1  ;;  %v1141_v15 = vpop.f32.mrb[1].mxu0 }
  0xf8   :  { %v1142_v16 = vadd.f32 %v1141_v15, %v1140_v12  ;;  %v1205_v17 = vpop.f32.mrb[1].mxu1  ;;  %v1143_v18 = vpop.f32.mrb[2].mxu0 }
  0xf9   :  { %v1206_v19 = vadd.f32 %v1205_v17, %v1204_v13  ;;  %v1207_v20 = vpop.f32.mrb[2].mxu1  ;;  %v1144_v21 = vpop.f32.mrb[3].mxu0 }
  0xfa   :  { %v618_v22 = vadd.f32 %v1142_v16, %v1647_v14  ;;  %v1145_v23 = vadd.f32 %v1144_v21, %v1143_v18  ;;  %v1208_v24 = vpop.f32.mrb[3].mxu1 }
  0xfb   :  { %v1209_v25 = vadd.f32 %v1208_v24, %v1207_v20 }
  0xfc   :  { %v621_v26 = vadd.f32 %v1145_v23, %v1647_v14  ;;  %v1651_v27 = vadd.f32 %v1206_v19, %v618_v22 }
  0xfe   :  { %v1146_v28 = vpop.f32.mrb[4].mxu0  ;;  %v1653_v29 = vadd.f32 %v1209_v25, %v621_v26 }
  0xff   :  { %v1210_v30 = vpop.f32.mrb[4].mxu1  ;;  %v1147_v31 = vpop.f32.mrb[5].mxu0 }
 0x100   :  { %v1148_v32 = vadd.f32 %v1147_v31, %v1146_v28  ;;  %v1211_v33 = vpop.f32.mrb[5].mxu1  ;;  %v1149_v34 = vpop.f32.mrb[6].mxu0 }
 0x101   :  { %v1212_v35 = vadd.f32 %v1211_v33, %v1210_v30  ;;  %v1213_v36 = vpop.f32.mrb[6].mxu1  ;;  %v1150_v37 = vpop.f32.mrb[7].mxu0 }
 0x102   :  { %v626_v38 = vadd.f32 %v1148_v32, %v1647_v14  ;;  %v1151_v39 = vadd.f32 %v1150_v37, %v1149_v34  ;;  %v1214_v40 = vpop.f32.mrb[7].mxu1 }
 0x103   :  { %v1215_v41 = vadd.f32 %v1214_v40, %v1213_v36 }
 0x104   :  { %v629_v42 = vadd.f32 %v1151_v39, %v1647_v14  ;;  %v1657_v43 = vadd.f32 %v1212_v35, %v626_v38 }
 0x106   :  { %v1152_v44 = vpop.f32.mrb[8].mxu0  ;;  %v1659_v45 = vadd.f32 %v1215_v41, %v629_v42 }
 0x107   :  { %v1216_v46 = vpop.f32.mrb[8].mxu1  ;;  %v1153_v47 = vpop.f32.mrb[9].mxu0 }
 0x108   :  { %v1154_v48 = vadd.f32 %v1153_v47, %v1152_v44  ;;  %v1217_v49 = vpop.f32.mrb[9].mxu1  ;;  %v1155_v50 = vpop.f32.mrb[10].mxu0 }
 0x109   :  { %v1218_v51 = vadd.f32 %v1217_v49, %v1216_v46  ;;  %v1219_v52 = vpop.f32.mrb[10].mxu1  ;;  %v1156_v53 = vpop.f32.mrb[11].mxu0 }
 0x10a   :  { %v634_v54 = vadd.f32 %v1154_v48, %v1647_v14  ;;  %v1157_v55 = vadd.f32 %v1156_v53, %v1155_v50  ;;  %v1220_v56 = vpop.f32.mrb[11].mxu1 }
 0x10b   :  { %v1221_v57 = vadd.f32 %v1220_v56, %v1219_v52 }
 0x10c   :  { %v637_v58 = vadd.f32 %v1157_v55, %v1647_v14  ;;  %v1663_v59 = vadd.f32 %v1218_v51, %v634_v54 }
 0x10e   :  { %v1158_v60 = vpop.f32.mrb[12].mxu0  ;;  %v1665_v61 = vadd.f32 %v1221_v57, %v637_v58 }
 0x10f   :  { %v1222_v62 = vpop.f32.mrb[12].mxu1  ;;  %v1159_v63 = vpop.f32.mrb[13].mxu0 }
 0x110   :  { %v1160_v0 = vadd.f32 %v1159_v63, %v1158_v60  ;;  %v1223_v1 = vpop.f32.mrb[13].mxu1  ;;  %v1161_v2 = vpop.f32.mrb[14].mxu0 }
 0x111   :  { %v1224_v3 = vadd.f32 %v1223_v1, %v1222_v62  ;;  %v1225_v4 = vpop.f32.mrb[14].mxu1  ;;  %v1162_v5 = vpop.f32.mrb[15].mxu0 }
 0x112   :  { %v642_v6 = vadd.f32 %v1160_v0, %v1647_v14  ;;  %v1163_v7 = vadd.f32 %v1162_v5, %v1161_v2  ;;  %v1226_v8 = vpop.f32.mrb[15].mxu1 }
 0x113   :  { %v1227_v9 = vadd.f32 %v1226_v8, %v1225_v4 }
 0x114   :  { %v645_v10 = vadd.f32 %v1163_v7, %v1647_v14  ;;  %v1669_v11 = vadd.f32 %v1224_v3, %v642_v6 }
 0x116   :  { %v1164_v12 = vpop.f32.mrb[16].mxu0  ;;  %v1671_v13 = vadd.f32 %v1227_v9, %v645_v10 }
 0x117   :  { %v1228_v15 = vpop.f32.mrb[16].mxu1  ;;  %v1165_v16 = vpop.f32.mrb[17].mxu0 }
 0x118   :  { %v1166_v17 = vadd.f32 %v1165_v16, %v1164_v12  ;;  %v1229_v18 = vpop.f32.mrb[17].mxu1  ;;  %v1167_v19 = vpop.f32.mrb[18].mxu0 }
 0x119   :  { %v1230_v20 = vadd.f32 %v1229_v18, %v1228_v15  ;;  %v1231_v21 = vpop.f32.mrb[18].mxu1  ;;  %v1168_v22 = vpop.f32.mrb[19].mxu0 }
 0x11a   :  { %v650_v23 = vadd.f32 %v1166_v17, %v1647_v14  ;;  %v1169_v24 = vadd.f32 %v1168_v22, %v1167_v19  ;;  %v1232_v25 = vpop.f32.mrb[19].mxu1 }
 0x11b   :  { %v1233_v26 = vadd.f32 %v1232_v25, %v1231_v21 }
 0x11c   :  { %v653_v28 = vadd.f32 %v1169_v24, %v1647_v14  ;;  %v747_v30 = vadd.f32 %v1230_v20, %v650_v23 }
 0x11e   :  { %v1170_v31 = vpop.f32.mrb[20].mxu0  ;;  %v1675_v32 = vadd.f32 %v1233_v26, %v653_v28 }
 0x11f   :  { %v1234_v33 = vpop.f32.mrb[20].mxu1  ;;  %v1171_v34 = vpop.f32.mrb[21].mxu0 }
 0x120   :  { %v1172_v35 = vadd.f32 %v1171_v34, %v1170_v31  ;;  %v1235_v36 = vpop.f32.mrb[21].mxu1  ;;  %v1173_v37 = vpop.f32.mrb[22].mxu0 }
 0x121   :  { %v1236_v38 = vadd.f32 %v1235_v36, %v1234_v33  ;;  %v1237_v39 = vpop.f32.mrb[22].mxu1  ;;  %v1174_v40 = vpop.f32.mrb[23].mxu0 }
 0x122   :  { %v658_v41 = vadd.f32 %v1172_v35, %v1647_v14  ;;  %v1175_v42 = vadd.f32 %v1174_v40, %v1173_v37  ;;  %v1238_v44 = vpop.f32.mrb[23].mxu1 }
 0x123   :  { %v1239_v46 = vadd.f32 %v1238_v44, %v1237_v39 }
 0x124   :  { %v661_v47 = vadd.f32 %v1175_v42, %v1647_v14  ;;  %v755_v48 = vadd.f32 %v1236_v38, %v658_v41 }
 0x126   :  { %v1176_v49 = vpop.f32.mrb[24].mxu0  ;;  %v1679_v50 = vadd.f32 %v1239_v46, %v661_v47 }
 0x127   :  { %v1240_v51 = vpop.f32.mrb[24].mxu1  ;;  %v1177_v52 = vpop.f32.mrb[25].mxu0 }
 0x128   :  { %v1178_v53 = vadd.f32 %v1177_v52, %v1176_v49  ;;  %v1241_v54 = vpop.f32.mrb[25].mxu1  ;;  %v1179_v55 = vpop.f32.mrb[26].mxu0 }
 0x129   :  { %v1242_v56 = vadd.f32 %v1241_v54, %v1240_v51  ;;  %v1243_v57 = vpop.f32.mrb[26].mxu1  ;;  %v1180_v58 = vpop.f32.mrb[27].mxu0 }
 0x12a   :  { %v666_v60 = vadd.f32 %v1178_v53, %v1647_v14  ;;  %v1181_v62 = vadd.f32 %v1180_v58, %v1179_v55  ;;  %v1244_v63 = vpop.f32.mrb[27].mxu1 }
 0x12b   :  { %v1245_v0 = vadd.f32 %v1244_v63, %v1243_v57 }
 0x12c   :  { %v669_v1 = vadd.f32 %v1181_v62, %v1647_v14  ;;  %v1683_v2 = vadd.f32 %v1242_v56, %v666_v60 }
 0x12e   :  { %v1182_v3 = vpop.f32.mrb[28].mxu0  ;;  %v1685_v4 = vadd.f32 %v1245_v0, %v669_v1 }
 0x12f   :  { %v1246_v5 = vpop.f32.mrb[28].mxu1  ;;  %v1183_v6 = vpop.f32.mrb[29].mxu0 }
 0x130   :  { %v1184_v7 = vadd.f32 %v1183_v6, %v1182_v3  ;;  %v1247_v8 = vpop.f32.mrb[29].mxu1  ;;  %v1185_v9 = vpop.f32.mrb[30].mxu0 }
 0x131   :  { %v1248_v10 = vadd.f32 %v1247_v8, %v1246_v5  ;;  %v1249_v12 = vpop.f32.mrb[30].mxu1  ;;  %v1186_v15 = vpop.f32.mrb[31].mxu0 }
 0x132   :  { %v674_v16 = vadd.f32 %v1184_v7, %v1647_v14  ;;  %v1187_v17 = vadd.f32 %v1186_v15, %v1185_v9  ;;  %v1250_v18 = vpop.f32.mrb[31].mxu1 }
 0x133   :  { %v1251_v19 = vadd.f32 %v1250_v18, %v1249_v12 }
 0x134   :  { %v677_v20 = vadd.f32 %v1187_v17, %v1647_v14  ;;  %v771_v21 = vadd.f32 %v1248_v10, %v674_v16 }
 0x136   :  { %v1274_v22 = vpop.f32.mrb[32].mxu0  ;;  %v1689_v23 = vadd.f32 %v1251_v19, %v677_v20 }
 0x137   :  { %v820_v24 = vadd.f32 %v1274_v22, %v1657_v43  ;;  %v1282_v25 = vpop.f32.mrb[32].mxu1  ;;  %v811_v26 = vpop.f32.mrb[33].mxu0 }
 0x138   :  { %v852_v28 = vadd.f32 %v1282_v25, %v755_v48  ;;  %v812_v31 = vadd.f32 %v811_v26, %v1651_v27  ;;  %v843_v33 = vpop.f32.mrb[33].mxu1  ;;  %v1275_v34 = vpop.f32.mrb[34].mxu0 }
 0x139   :  { %vm876_vm2 = vcmp.ge.f32.partialorder %v820_v24, 0.0  ;;  %v892_v35 = vmul.f32 0.2, %v820_v24  ;;  %v844_v36 = vadd.f32 %v843_v33, %v747_v30  ;;  %v823_v37 = vadd.f32 %v1275_v34, %v1659_v45  ;;  %v1283_v14 = vpop.f32.mrb[34].mxu1  ;;  %v814_v38 = vpop.f32.mrb[35].mxu0 }
 0x13a   :  { %vm884_vm3 = vcmp.ge.f32.partialorder %v852_v28, 0.0  ;;  %v900_v39 = vmul.f32 0.2, %v852_v28  ;;  %vm874_vm4 = vcmp.ge.f32.partialorder %v812_v31, 0.0  ;;  %v890_v40 = vmul.f32 0.2, %v812_v31 }
 0x13b   :  { %v908_v43 = vsel %vm876_vm2, %v820_v24, %v892_v35  ;;  %vm882_vm5 = vcmp.ge.f32.partialorder %v844_v36, 0.0  ;;  %v898_v41 = vmul.f32 0.2, %v844_v36  ;;  %vm877_vm6 = vcmp.ge.f32.partialorder %v823_v37, 0.0  ;;  %v846_v42 = vpop.f32.mrb[35].mxu1 }
 0x13c   :  { %v1110_v44 = vpack.c.bf16 %v908_v43, %v908_v43  ;;  %v916_v27 = vsel %vm884_vm3, %v852_v28, %v900_v39  ;;  %v906_v46 = vsel %vm874_vm4, %v812_v31, %v890_v40  ;;  %v893_v47 = vmul.f32 0.2, %v823_v37 }
 0x13d   :  { %v1118_v48 = vpack.c.bf16 %v916_v27, %v916_v27  ;;  %v1108_v49 = vpack.c.bf16 %v906_v46, %v906_v46  ;;  %v914_v30 = vsel %vm882_vm5, %v844_v36, %v898_v41  ;;  %v855_v45 = vadd.f32 %v1283_v14, %v1679_v50 }
 0x13e   :  { %989 = vst.msk [vmem:[%s1771_s3 + $0x8] sm:$0xf] %vm986_vm1, %v1110_v44  ;;  %v1116_v51 = vpack.c.bf16 %v914_v30, %v914_v30  ;;  %v909_v52 = vsel %vm877_vm6, %v823_v37, %v893_v47  ;;  %v815_v53 = vadd.f32 %v814_v38, %v1653_v29  ;;  %v847_v54 = vadd.f32 %v846_v42, %v1675_v32  ;;  %v1278_v55 = vpop.f32.mrb[36].mxu0 }
 0x13f   :  { %997 = vst.msk [vmem:[%s1771_s3 + $0x28] sm:$0xf] %vm986_vm1, %v1118_v48  ;;  %987 = vst.msk [vmem:[%s1771_s3] sm:$0xf] %vm986_vm1, %v1108_v49  ;;  %v1111_v50 = vpack.c.bf16 %v909_v52, %v909_v52  ;;  %vm885_vm7 = vcmp.ge.f32.partialorder %v855_v45, 0.0  ;;  %v836_v57 = vadd.f32 %v1278_v55, %v1669_v11  ;;  %v1286_v58 = vpop.f32.mrb[36].mxu1 }
 0x140   :  { %v901_v56 = vmul.f32 0.2, %v855_v45  ;;  %v827_v29 = vpop.f32.mrb[37].mxu0  ;;  %995 = vst.msk [vmem:[%s1771_s3 + $0x20] sm:$0xf] %vm986_vm1, %v1116_v51  ;;  %vm875_vm8 = vcmp.ge.f32.partialorder %v815_v53, 0.0  ;;  %v868_v11 = vadd.f32 %v1286_v58, %v771_v21 }
 0x141   :  { %v891_v32 = vmul.f32 0.2, %v815_v53  ;;  %vm883_vm9 = vcmp.ge.f32.partialorder %v847_v54, 0.0  ;;  %v899_v60 = vmul.f32 0.2, %v847_v54  ;;  %vm880_vm10 = vcmp.ge.f32.partialorder %v836_v57, 0.0 }
 0x142   :  { %990 = vst.msk [vmem:[%s1771_s3 + $0xc] sm:$0xf] %vm986_vm1, %v1111_v50  ;;  %v917_v62 = vsel %vm885_vm7, %v855_v45, %v901_v56  ;;  %v896_v63 = vmul.f32 0.2, %v836_v57  ;;  %v859_v0 = vpop.f32.mrb[37].mxu1  ;;  %v1279_v1 = vpop.f32.mrb[38].mxu0  ;;  %v828_v7 = vadd.f32 %v827_v29, %v1663_v59 }
 0x143   :  { %v1119_v3 = vpack.c.bf16 %v917_v62, %v917_v62  ;;  %v907_v5 = vsel %vm875_vm8, %v815_v53, %v891_v32  ;;  %v915_v6 = vsel %vm883_vm9, %v847_v54, %v899_v60  ;;  %v1287_v8 = vpop.f32.mrb[38].mxu1  ;;  %v830_v9 = vpop.f32.mrb[39].mxu0  ;;  %vm888_vm11 = vcmp.ge.f32.partialorder %v868_v11, 0.0 }
 0x144   :  { %v1109_v10 = vpack.c.bf16 %v907_v5, %v907_v5  ;;  %v1117_v12 = vpack.c.bf16 %v915_v6, %v915_v6  ;;  %v912_v15 = vsel %vm880_vm10, %v836_v57, %v896_v63  ;;  %v862_v16 = vpop.f32.mrb[39].mxu1  ;;  %v904_v18 = vmul.f32 0.2, %v868_v11 }
 0x145   :  { %998 = vst.msk [vmem:[%s1771_s3 + $0x2c] sm:$0xf] %vm986_vm1, %v1119_v3  ;;  %v1114_v17 = vpack.c.bf16 %v912_v15, %v912_v15  ;;  %vm878_vm12 = vcmp.ge.f32.partialorder %v828_v7, 0.0  ;;  %v894_v19 = vmul.f32 0.2, %v828_v7  ;;  %v860_v59 = vadd.f32 %v859_v0, %v1683_v2 }
 0x146   :  { %988 = vst.msk [vmem:[%s1771_s3 + $0x4] sm:$0xf] %vm986_vm1, %v1109_v10  ;;  %996 = vst.msk [vmem:[%s1771_s3 + $0x24] sm:$0xf] %vm986_vm1, %v1117_v12  ;;  %v839_v20 = vadd.f32 %v1279_v1, %v1671_v13  ;;  %v871_v21 = vadd.f32 %v1287_v8, %v1689_v23  ;;  %v831_v22 = vadd.f32 %v830_v9, %v1665_v61 }
 0x147   :  { %993 = vst.msk [vmem:[%s1771_s3 + $0x18] sm:$0xf] %vm986_vm1, %v1114_v17  ;;  %v920_v24 = vsel %vm888_vm11, %v868_v11, %v904_v18  ;;  %v910_v25 = vsel %vm878_vm12, %v828_v7, %v894_v19  ;;  %v863_v26 = vadd.f32 %v862_v16, %v1685_v4  ;;  %vm886_vm13 = vcmp.ge.f32.partialorder %v860_v59, 0.0 }
 0x148   :  { %v1122_v28 = vpack.c.bf16 %v920_v24, %v920_v24  ;;  %v1112_v31 = vpack.c.bf16 %v910_v25, %v910_v25  ;;  %v902_v33 = vmul.f32 0.2, %v860_v59  ;;  %vm881_vm14 = vcmp.ge.f32.partialorder %v839_v20, 0.0 }
 0x149   :  { %v897_v2 = vmul.f32 0.2, %v839_v20  ;;  %vm889_vm15 = vcmp.ge.f32.partialorder %v871_v21, 0.0  ;;  %v905_v13 = vmul.f32 0.2, %v871_v21  ;;  %vm879_vm0 = vcmp.ge.f32.partialorder %v831_v22, 0.0 }
 0x14a   :  { %1001 = vst.msk [vmem:[%s1771_s3 + $0x38] sm:$0xf] %vm986_vm1, %v1122_v28  ;;  %991 = vst.msk [vmem:[%s1771_s3 + $0x10] sm:$0xf] %vm986_vm1, %v1112_v31  ;;  %v918_v61 = vsel %vm886_vm13, %v860_v59, %v902_v33  ;;  %v895_v4 = vmul.f32 0.2, %v831_v22 }
 0x14b   :  { %vm887_vm2 = vcmp.ge.f32.partialorder %v863_v26, 0.0  ;;  %v1120_v23 = vpack.c.bf16 %v918_v61, %v918_v61  ;;  %v913_v34 = vsel %vm881_vm14, %v839_v20, %v897_v2  ;;  %v921_v35 = vsel %vm889_vm15, %v871_v21, %v905_v13 }
 0x14c   :  { %v903_v36 = vmul.f32 0.2, %v863_v26  ;;  %v1115_v37 = vpack.c.bf16 %v913_v34, %v913_v34  ;;  %v1123_v14 = vpack.c.bf16 %v921_v35, %v921_v35  ;;  %v911_v38 = vsel %vm879_vm0, %v831_v22, %v895_v4 }
 0x14d   :  { %999 = vst.msk [vmem:[%s1771_s3 + $0x30] sm:$0xf] %vm986_vm1, %v1120_v23  ;;  %v1113_v39 = vpack.c.bf16 %v911_v38, %v911_v38 }
 0x14e   :  { %v919_v40 = vsel %vm887_vm2, %v863_v26, %v903_v36  ;;  %994 = vst.msk [vmem:[%s1771_s3 + $0x1c] sm:$0xf] %vm986_vm1, %v1115_v37  ;;  %1002 = vst.msk [vmem:[%s1771_s3 + $0x3c] sm:$0xf] %vm986_vm1, %v1123_v14 }
 0x14f   :  { %v1121_v43 = vpack.c.bf16 %v919_v40, %v919_v40  ;;  %992 = vst.msk [vmem:[%s1771_s3 + $0x14] sm:$0xf] %vm986_vm1, %v1113_v39 }
 0x151   :  { %1000 = vst.msk [vmem:[%s1771_s3 + $0x34] sm:$0xf] %vm986_vm1, %v1121_v43 }

// kernel: dis_forward.12
= control target key start
LH: loop header
LB: loop body
LE: loop exit
PB: predicated region body
PF: predicated region fallthrough
CT: control target
= control target key end

     0   :  { %v665_v1 = vmov 0.0   ;;  %vm666_vm0 = vmmov 0   ;;  %vm254_vm1 = vcmask 261120   ;;  %vm478_vm3 = vcmask 125952   ;;  %s850_s1 = inlined_call_operand.vmem [shape: bf16[288,16], index: 1, kind: input, shape index: {}]   ;;  %s851_s0 = inlined_call_operand.vmem [shape: bf16[72,288], index: 0, kind: input, shape index: {}]   ;;  %s852_s2 = inlined_call_operand.vmem [shape: f32[1,16], index: 2, kind: input, shape index: {}]   ;;  %s853_s3 = inlined_call_operand.vmem [shape: bf16[72,16], index: 3, kind: output, shape index: {}]  }
   0x1   :  { %v628_v0 = vld [vmem:[%s850_s1 + $0x40] sm:$0xff]   ;;  %602 = vmatprep.subr.bf16.mxu1 %v665_v1  ;;  %606 = vmatprep.mubr.msk.bf16.mxu1 %vm666_vm0, %v665_v1  ;;  %v630_v3 = vld [vmem:[%s850_s1 + $0x48] sm:$0xff]   ;;  %v632_v5 = vld [vmem:[%s850_s1 + $0x50] sm:$0xff]  }
   0x2   :  { %v629_v2 = vld [vmem:[%s850_s1] sm:$0xff]   ;;  %549 = vmatprep.subr.bf16.mxu0 %v628_v0  ;;  %v631_v4 = vld [vmem:[%s850_s1 + $0x8] sm:$0xff]   ;;  %v633_v6 = vld [vmem:[%s850_s1 + $0x10] sm:$0xff]  }
   0x3   :  { %550 = vmatpush3.bf16.msra.mxu0 %v629_v2  ;;  %v634_v7 = vld [vmem:[%s850_s1 + $0x58] sm:$0xff]   ;;  %v636_v9 = vld [vmem:[%s850_s1 + $0x60] sm:$0xff]   ;;  %v638_v12 = vld [vmem:[%s850_s1 + $0x68] sm:$0xff]  }
   0x4   :  { %551 = vmatprep.subr.bf16.mxu0 %v630_v3  ;;  %v635_v8 = vld [vmem:[%s850_s1 + $0x18] sm:$0xff]   ;;  %v642_v10 = vld [vmem:[%s850_s1 + $0x80] sm:$0xff]   ;;  %v639_v13 = vld [vmem:[%s850_s1 + $0x28] sm:$0xff]  }
   0x5   :  { %v637_v11 = vld [vmem:[%s850_s1 + $0x20] sm:$0xff]   ;;  %603 = vmatpush3.bf16.msra.mxu1 %v642_v10  ;;  %v640_v14 = vld [vmem:[%s850_s1 + $0x70] sm:$0xff]   ;;  %v648_v16 = vld [vmem:[%s850_s1 + $0x88] sm:$0xff]  }
   0x6   :  { %604 = vmatprep.subr.bf16.mxu1 %v665_v1  ;;  %v647_v15 = vld [vmem:[%s851_s0 + $0x4] ss:$12 sps:$4 sm:$0xff]   ;;  %v649_v17 = vld [vmem:[%s851_s0 + $0x8] ss:$12 sps:$4 sm:$0xff]   ;;  %v643_v19 = vld [vmem:[%s850_s1 + $0x78] sm:$0xff]  }
   0x7   :  { %552 = vmatpush3.bf16.msra.mxu0 %v631_v4  ;;  %302 = vmatprep.mubr.bf16.mxu0 %v647_v15  ;;  %v641_v18 = vld [vmem:[%s850_s1 + $0x30] sm:$0xff]   ;;  %v644_v20 = vld [vmem:[%s850_s1 + $0x38] sm:$0xff]   ;;  %v653_v21 = vld [vmem:[%s851_s0 + $0x20] ss:$12 sps:$4 sm:$0xff]  }
   0x8   :  { %553 = vmatprep.subr.bf16.mxu0 %v632_v5  ;;  %v645_v22 = vld [vmem:[%s851_s0] ss:$12 sps:$4 sm:$0xff]   ;;  %v650_v23 = vld [vmem:[%s851_s0 + $0x1c] ss:$12 sps:$4 sm:$0xff]   ;;  %v657_v24 = vld [vmem:[%s851_s0 + $0x38] ss:$12 sps:$4 sm:$0xff]  }
   0x9   :  { %605 = vmatpush3.bf16.msra.mxu1 %v648_v16  ;;  %v652_v25 = vld [vmem:[%s851_s0 + $0x18] ss:$12 sps:$4 sm:$0xff]   ;;  %v654_v26 = vld [vmem:[%s851_s0 + $0x34] ss:$12 sps:$4 sm:$0xff]   ;;  %v661_v27 = vld [vmem:[%s851_s0 + $0x50] ss:$12 sps:$4 sm:$0xff]  }
   0xa   :  { %v656_v28 = vld [vmem:[%s851_s0 + $0x30] ss:$12 sps:$4 sm:$0xff]   ;;  %v658_v29 = vld [vmem:[%s851_s0 + $0x4c] ss:$12 sps:$4 sm:$0xff]   ;;  %v31_v30 = vld [vmem:[%s851_s0 + $0x60] sm:$0xff] }
   0xb   :  { %554 = vmatpush3.bf16.msra.mxu0 %v633_v6  ;;  %v664_v31 = vld [vmem:[%s851_s0 + $0x68] ss:$0 sps:$4 sm:$0xff]   ;;  %v506_v33 = vcombine.high %v31_v30, %v31_v30  ;;  %v505_v34 = vcombine.low %v31_v30, %v31_v30  ;;  %v803_v44 = vld [vmem:[%s852_s2] ss:$0 sm:$0xff] }
   0xc   :  { %555 = vmatprep.subr.bf16.mxu0 %v634_v7  ;;  %607 = vmatmul.mubr.msk.bf16.vlgmr.msra.gmra.mrb[0].mxu1 %vm254_vm1, %v649_v17  ;;  %v660_v32 = vld [vmem:[%s851_s0 + $0x48] ss:$12 sps:$4 sm:$0xff]  }
   0xd   :  { %610 = vmatprep.mubr.msk.bf16.mxu1 %vm666_vm0, %v665_v1 }
   0xf   :  { %556 = vmatpush3.bf16.msra.mxu0 %v635_v8 }
  0x10   :  { %557 = vmatprep.subr.bf16.mxu0 %v636_v9 }
  0x13   :  { %558 = vmatpush3.bf16.msra.mxu0 %v637_v11 }
  0x14   :  { %559 = vmatprep.subr.bf16.mxu0 %v638_v12  ;;  %611 = vmatmul.mubr.msk.bf16.gmra.mrb[4].mxu1 %vm254_vm1, %v653_v21 }
  0x15   :  { %614 = vmatprep.mubr.msk.bf16.mxu1 %vm666_vm0, %v665_v1 }
  0x17   :  { %560 = vmatpush3.bf16.msra.mxu0 %v639_v13 }
  0x18   :  { %561 = vmatprep.subr.bf16.mxu0 %v640_v14 }
  0x1b   :  { %562 = vmatpush3.bf16.msra.mxu0 %v641_v18 }
  0x1c   :  { %563 = vmatprep.subr.bf16.mxu0 %v643_v19  ;;  %615 = vmatmul.mubr.msk.bf16.gmra.mrb[8].mxu1 %vm254_vm1, %v657_v24 }
  0x1d   :  { %618 = vmatprep.mubr.msk.bf16.mxu1 %vm666_vm0, %v665_v1 }
  0x1f   :  { %564 = vmatpush3.bf16.msra.mxu0 %v644_v20 }
  0x22   :  { %303 = vmatmul.mubr.bf16.vlgmr.msra.gmra.mrb[0].mxu0 %v645_v22 }
  0x23   :  { %310 = vmatprep.mubr.bf16.mxu0 %v650_v23 }
  0x24   :  { %619 = vmatmul.mubr.msk.bf16.gmra.mrb[12].mxu1 %vm254_vm1, %v661_v27 }
  0x25   :  { %622 = vmatprep.mubr.msk.bf16.mxu1 %vm666_vm0, %v665_v1 }
  0x2a   :  { %311 = vmatmul.mubr.bf16.gmra.mrb[4].mxu0 %v652_v25 }
  0x2b   :  { %318 = vmatprep.mubr.bf16.mxu0 %v654_v26 }
  0x2c   :  { %623 = vmatmul.mubr.msk.bf16.gmra.mrb[16].mxu1 %vm254_vm1, %v664_v31 }
  0x32   :  { %319 = vmatmul.mubr.bf16.gmra.mrb[8].mxu0 %v656_v28 }
  0x33   :  { %326 = vmatprep.mubr.bf16.mxu0 %v658_v29 }
  0x3a   :  { %327 = vmatmul.mubr.bf16.gmra.mrb[12].mxu0 %v660_v32 }
  0x3b   :  { %334 = vmatprep.mubr.bf16.mxu0 %v506_v33 }
  0x42   :  { %335 = vmatmul.mubr.bf16.gmra.mrb[16].mxu0 %v505_v34 }
  0xdf   :  { %v376_v35 = vpop.f32.mrb[0].mxu1 }
  0xe0   :  { %v608_v36 = vpop.f32.mrb[1].mxu1 }
  0xe1   :  { %v379_v37 = vpop.f32.mrb[2].mxu1 }
  0xe2   :  { %v609_v38 = vpop.f32.mrb[3].mxu1 }
  0xe7   :  { %v384_v39 = vpop.f32.mrb[4].mxu1 }
  0xe8   :  { %v612_v40 = vpop.f32.mrb[5].mxu1 }
  0xe9   :  { %v387_v42 = vpop.f32.mrb[6].mxu1 }
  0xea   :  { %v613_v45 = vpop.f32.mrb[7].mxu1 }
  0xef   :  { %v392_v53 = vpop.f32.mrb[8].mxu1 }
  0xf0   :  { %v616_v54 = vpop.f32.mrb[9].mxu1 }
  0xf1   :  { %v395_v58 = vpop.f32.mrb[10].mxu1 }
  0xf2   :  { %v617_v60 = vpop.f32.mrb[11].mxu1 }
  0xf5   :  { %v565_v41 = vpop.f32.mrb[0].mxu0 }
  0xf6   :  { %v566_v43 = vpop.f32.mrb[1].mxu0 }
  0xf7   :  { %v567_v46 = vadd.f32 %v566_v43, %v565_v41  ;;  %v568_v47 = vpop.f32.mrb[2].mxu0  ;;  %v400_v9 = vpop.f32.mrb[12].mxu1 }
  0xf8   :  { %v569_v48 = vpop.f32.mrb[3].mxu0  ;;  %v620_v10 = vpop.f32.mrb[13].mxu1 }
  0xf9   :  { %v305_v49 = vadd.f32 %v567_v46, %v803_v44  ;;  %v570_v50 = vadd.f32 %v569_v48, %v568_v47  ;;  %v403_v14 = vpop.f32.mrb[14].mxu1 }
  0xfa   :  { %v621_v16 = vpop.f32.mrb[15].mxu1 }
  0xfb   :  { %v377_v51 = vadd.f32 %v376_v35, %v305_v49  ;;  %v308_v52 = vadd.f32 %v570_v50, %v803_v44 }
  0xfd   :  { %vm414_vm2 = vcmp.ge.f32.partialorder %v377_v51, 0.0  ;;  %v423_v55 = vmul.f32 0.2, %v377_v51  ;;  %v380_v56 = vadd.f32 %v379_v37, %v308_v52  ;;  %v571_v57 = vpop.f32.mrb[4].mxu0 }
  0xfe   :  { %v572_v59 = vpop.f32.mrb[5].mxu0 }
  0xff   :  { %v432_v61 = vsel %vm414_vm2, %v377_v51, %v423_v55  ;;  %vm415_vm4 = vcmp.ge.f32.partialorder %v380_v56, 0.0  ;;  %v424_v62 = vmul.f32 0.2, %v380_v56  ;;  %v573_v63 = vadd.f32 %v572_v59, %v571_v57  ;;  %v574_v0 = vpop.f32.mrb[6].mxu0  ;;  %v408_v29 = vpop.f32.mrb[16].mxu1 }
 0x100   :  { %v540_v1 = vpack.c.bf16 %v432_v61, %v432_v61  ;;  %v575_v2 = vpop.f32.mrb[7].mxu0  ;;  %v624_v30 = vpop.f32.mrb[17].mxu1 }
 0x101   :  { %v433_v3 = vsel %vm415_vm4, %v380_v56, %v424_v62  ;;  %v313_v4 = vadd.f32 %v573_v63, %v803_v44  ;;  %v576_v5 = vadd.f32 %v575_v2, %v574_v0  ;;  %v411_v34 = vpop.f32.mrb[18].mxu1 }
 0x102   :  { %479 = vst.msk [vmem:[%s853_s3] sm:$0xf] %vm478_vm3, %v540_v1  ;;  %v541_v6 = vpack.c.bf16 %v433_v3, %v433_v3  ;;  %v625_v36 = vpop.f32.mrb[19].mxu1 }
 0x103   :  { %v385_v7 = vadd.f32 %v384_v39, %v313_v4  ;;  %v316_v8 = vadd.f32 %v576_v5, %v803_v44 }
 0x104   :  { %480 = vst.msk [vmem:[%s853_s3 + $0x4] sm:$0xf] %vm478_vm3, %v541_v6 }
 0x105   :  { %vm416_vm5 = vcmp.ge.f32.partialorder %v385_v7, 0.0  ;;  %v425_v11 = vmul.f32 0.2, %v385_v7  ;;  %v388_v12 = vadd.f32 %v387_v42, %v316_v8  ;;  %v577_v13 = vpop.f32.mrb[8].mxu0 }
 0x106   :  { %v578_v15 = vpop.f32.mrb[9].mxu0 }
 0x107   :  { %v434_v17 = vsel %vm416_vm5, %v385_v7, %v425_v11  ;;  %vm417_vm6 = vcmp.ge.f32.partialorder %v388_v12, 0.0  ;;  %v426_v18 = vmul.f32 0.2, %v388_v12  ;;  %v579_v19 = vadd.f32 %v578_v15, %v577_v13  ;;  %v580_v20 = vpop.f32.mrb[10].mxu0 }
 0x108   :  { %v542_v21 = vpack.c.bf16 %v434_v17, %v434_v17  ;;  %v581_v22 = vpop.f32.mrb[11].mxu0 }
 0x109   :  { %v435_v23 = vsel %vm417_vm6, %v388_v12, %v426_v18  ;;  %v321_v24 = vadd.f32 %v579_v19, %v803_v44  ;;  %v582_v25 = vadd.f32 %v581_v22, %v580_v20 }
 0x10a   :  { %481 = vst.msk [vmem:[%s853_s3 + $0x8] sm:$0xf] %vm478_vm3, %v542_v21  ;;  %v543_v26 = vpack.c.bf16 %v435_v23, %v435_v23 }
 0x10b   :  { %v393_v27 = vadd.f32 %v392_v53, %v321_v24  ;;  %v324_v28 = vadd.f32 %v582_v25, %v803_v44 }
 0x10c   :  { %482 = vst.msk [vmem:[%s853_s3 + $0xc] sm:$0xf] %vm478_vm3, %v543_v26 }
 0x10d   :  { %vm418_vm7 = vcmp.ge.f32.partialorder %v393_v27, 0.0  ;;  %v427_v31 = vmul.f32 0.2, %v393_v27  ;;  %v396_v32 = vadd.f32 %v395_v58, %v324_v28  ;;  %v583_v33 = vpop.f32.mrb[12].mxu0 }
 0x10e   :  { %v584_v35 = vpop.f32.mrb[13].mxu0 }
 0x10f   :  { %v436_v37 = vsel %vm418_vm7, %v393_v27, %v427_v31  ;;  %vm419_vm8 = vcmp.ge.f32.partialorder %v396_v32, 0.0  ;;  %v428_v38 = vmul.f32 0.2, %v396_v32  ;;  %v585_v39 = vadd.f32 %v584_v35, %v583_v33  ;;  %v586_v40 = vpop.f32.mrb[14].mxu0 }
 0x110   :  { %v544_v41 = vpack.c.bf16 %v436_v37, %v436_v37  ;;  %v587_v42 = vpop.f32.mrb[15].mxu0 }
 0x111   :  { %v437_v43 = vsel %vm419_vm8, %v396_v32, %v428_v38  ;;  %v329_v45 = vadd.f32 %v585_v39, %v803_v44  ;;  %v588_v46 = vadd.f32 %v587_v42, %v586_v40 }
 0x112   :  { %483 = vst.msk [vmem:[%s853_s3 + $0x10] sm:$0xf] %vm478_vm3, %v544_v41  ;;  %v545_v47 = vpack.c.bf16 %v437_v43, %v437_v43 }
 0x113   :  { %v401_v48 = vadd.f32 %v400_v9, %v329_v45  ;;  %v332_v49 = vadd.f32 %v588_v46, %v803_v44 }
 0x114   :  { %484 = vst.msk [vmem:[%s853_s3 + $0x14] sm:$0xf] %vm478_vm3, %v545_v47 }
 0x115   :  { %vm420_vm9 = vcmp.ge.f32.partialorder %v401_v48, 0.0  ;;  %v429_v50 = vmul.f32 0.2, %v401_v48  ;;  %v404_v51 = vadd.f32 %v403_v14, %v332_v49  ;;  %v589_v52 = vpop.f32.mrb[16].mxu0 }
 0x116   :  { %v590_v53 = vpop.f32.mrb[17].mxu0 }
 0x117   :  { %v438_v54 = vsel %vm420_vm9, %v401_v48, %v429_v50  ;;  %vm421_vm10 = vcmp.ge.f32.partialorder %v404_v51, 0.0  ;;  %v430_v55 = vmul.f32 0.2, %v404_v51  ;;  %v591_v56 = vadd.f32 %v590_v53, %v589_v52  ;;  %v592_v57 = vpop.f32.mrb[18].mxu0 }
 0x118   :  { %v546_v58 = vpack.c.bf16 %v438_v54, %v438_v54  ;;  %v593_v59 = vpop.f32.mrb[19].mxu0 }
 0x119   :  { %v439_v60 = vsel %vm421_vm10, %v404_v51, %v430_v55  ;;  %v337_v61 = vadd.f32 %v591_v56, %v803_v44 }
 0x11a   :  { %485 = vst.msk [vmem:[%s853_s3 + $0x18] sm:$0xf] %vm478_vm3, %v546_v58  ;;  %v547_v62 = vpack.c.bf16 %v439_v60, %v439_v60 }
 0x11b   :  { %v409_v63 = vadd.f32 %v408_v29, %v337_v61 }
 0x11c   :  { %486 = vst.msk [vmem:[%s853_s3 + $0x1c] sm:$0xf] %vm478_vm3, %v547_v62 }
 0x11d   :  { %vm422_vm11 = vcmp.ge.f32.partialorder %v409_v63, 0.0  ;;  %v431_v0 = vmul.f32 0.2, %v409_v63 }
 0x11f   :  { %v440_v1 = vsel %vm422_vm11, %v409_v63, %v431_v0 }
 0x120   :  { %v548_v2 = vpack.c.bf16 %v440_v1, %v440_v1 }
 0x122   :  { %487 = vst.msk [vmem:[%s853_s3 + $0x20] sm:$0xf] %vm478_vm3, %v548_v2 }

// kernel: dis_forward.13
= control target key start
LH: loop header
LB: loop body
LE: loop exit
PB: predicated region body
PF: predicated region fallthrough
CT: control target
= control target key end

     0   :  { %v399_v6 = vmov 1966171168   ;;  %v75_v8 = vlaneseq  ;;  %v400_v26 = vmov 0.0   ;;  %vm401_vm0 = vmmov 0   ;;  %s495_s1 = inlined_call_operand.vmem [shape: bf16[256,8], index: 1, kind: input, shape index: {}]   ;;  %s496_s0 = inlined_call_operand.vmem [shape: bf16[2,256], index: 0, kind: input, shape index: {}]   ;;  %s497_s3 = inlined_call_operand.vmem [shape: f32[8,1], index: 3, kind: input, shape index: {}]   ;;  %s498_s4 = inlined_call_operand.<no memory space> [shape: f32[1,1], index: 4, kind: input, shape index: {}]   ;;  %s499_s2 = inlined_call_operand.vmem [shape: f32[1,8], index: 2, kind: input, shape index: {}]   ;;  %s500_s5 = inlined_call_operand.vmem [shape: f32[2,1], index: 5, kind: output, shape index: {}]  }
   0x1   :  { %v375_v0 = vld [vmem:[%s495_s1 + $0x40] sm:$0xff]   ;;  %v377_v2 = vld [vmem:[%s495_s1 + $0x48] sm:$0xff]   ;;  %v379_v4 = vld [vmem:[%s495_s1 + $0x50] sm:$0xff]   ;;  %v73_v7 = vunpack.c.l.s4 %v399_v6  ;;  %367 = vmatprep.subr.mxu1 %v400_v26  ;;  %369 = vmatprep.mubr.msk.f32.mxu1 %vm401_vm0, %v400_v26  ;;  %v10_v28 = vstv %s498_s4  ;;  %vm237_vm1 = vcmask 64512   ;;  %vm317_vm2 = vcmask 1024  }
   0x2   :  { %v376_v1 = vld [vmem:[%s495_s1] sm:$0xff]   ;;  %343 = vmatprep.subr.bf16.mxu0 %v375_v0  ;;  %v378_v3 = vld [vmem:[%s495_s1 + $0x8] sm:$0xff]   ;;  %v380_v5 = vld [vmem:[%s495_s1 + $0x10] sm:$0xff]   ;;  %v76_v12 = vshrl.u32 %v75_v8, 7  ;;  %11 = vst [vmem:[#allocation2] sm:$0x1] %v10_v28 }
   0x3   :  { %344 = vmatpush3.bf16.msra.mxu0 %v376_v1  ;;  %v381_v9 = vld [vmem:[%s495_s1 + $0x58] sm:$0xff]   ;;  %v74_v11 = vunpack.c.0.s8 %v73_v7  ;;  %v383_v13 = vld [vmem:[%s495_s1 + $0x60] sm:$0xff]   ;;  %v385_v16 = vld [vmem:[%s495_s1 + $0x68] sm:$0xff]  }
   0x4   :  { %345 = vmatprep.subr.bf16.mxu0 %v377_v2  ;;  %v382_v10 = vld [vmem:[%s495_s1 + $0x18] sm:$0xff]   ;;  %v384_v14 = vld [vmem:[%s495_s1 + $0x20] sm:$0xff]   ;;  %v386_v19 = vld [vmem:[%s495_s1 + $0x28] sm:$0xff]  }
   0x5   :  { %v77_v15 = vsub.s32 %v74_v11, %v76_v12  ;;  %v324_v17 = vld.sshfl [vmem:[%s496_s0] sm:$0x11 pattern:$0x75316420]  ;;  %v387_v21 = vld [vmem:[%s495_s1 + $0x70] sm:$0xff]   ;;  %v389_v23 = vld [vmem:[%s495_s1 + $0x78] sm:$0xff]  }
   0x6   :  { %v71_v18 = vcombine.high %v324_v17, %v324_v17  ;;  %v388_v22 = vld [vmem:[%s495_s1 + $0x30] sm:$0xff]   ;;  %v390_v24 = vld [vmem:[%s495_s1 + $0x38] sm:$0xff]   ;;  %v229_v27 = vld [vmem:[%s497_s3] sm:$0xff] }
   0x7   :  { %346 = vmatpush3.bf16.msra.mxu0 %v378_v3  ;;  %v78_v25 = vrot.slane %v324_v17, %v77_v15  ;;  %368 = vmatpush3.msra.mxu1 %v229_v27  ;;  %v323_v30 = vld [vmem:[%s499_s2] ss:$0 sm:$0xff] }
   0x8   :  { %347 = vmatprep.subr.bf16.mxu0 %v379_v4  ;;  %v85_v20 = vrot.slane %v71_v18, %v77_v15 }
   0x9   :  { %v341_v41 = vld [vmem:[#allocation2] ss:$0 sm:$0xff] }
   0xa   :  { %216 = vmatprep.mubr.bf16.mxu0 %v85_v20 }
   0xb   :  { %348 = vmatpush3.bf16.msra.mxu0 %v380_v5 }
   0xc   :  { %349 = vmatprep.subr.bf16.mxu0 %v381_v9 }
   0xf   :  { %350 = vmatpush3.bf16.msra.mxu0 %v382_v10 }
  0x10   :  { %351 = vmatprep.subr.bf16.mxu0 %v383_v13 }
  0x13   :  { %352 = vmatpush3.bf16.msra.mxu0 %v384_v14 }
  0x14   :  { %353 = vmatprep.subr.bf16.mxu0 %v385_v16 }
  0x17   :  { %354 = vmatpush3.bf16.msra.mxu0 %v386_v19 }
  0x18   :  { %355 = vmatprep.subr.bf16.mxu0 %v387_v21 }
  0x1b   :  { %356 = vmatpush3.bf16.msra.mxu0 %v388_v22 }
  0x1c   :  { %357 = vmatprep.subr.bf16.mxu0 %v389_v23 }
  0x1f   :  { %358 = vmatpush3.bf16.msra.mxu0 %v390_v24 }
  0x22   :  { %217 = vmatmul.mubr.bf16.vlgmr.msra.gmra.mrb[0].mxu0 %v78_v25 }
  0xf5   :  { %v359_v29 = vpop.f32.mrb[0].mxu0 }
  0xf6   :  { %v360_v31 = vpop.f32.mrb[1].mxu0 }
  0xf7   :  { %v361_v32 = vadd.f32 %v360_v31, %v359_v29  ;;  %v362_v33 = vpop.f32.mrb[2].mxu0 }
  0xf8   :  { %v363_v34 = vpop.f32.mrb[3].mxu0 }
  0xf9   :  { %v219_v35 = vadd.f32 %v361_v32, %v323_v30 }
  0xfb   :  { %v224_v36 = vsub.f32 0.0, %v219_v35 }
  0xfd   :  { %v225_v37 = vmul.f32 1.442695, %v224_v36 }
  0xff   :  { %391 = vpow2.f32 %v225_v37 }
 0x109   :  { %v392_v38 = vpop.eup %391 }
 0x10a   :  { %v227_v39 = vadd.f32 1.0, %v392_v38 }
 0x10c   :  { %393 = vrcp.f32 %v227_v39 }
 0x116   :  { %v394_v40 = vpop.eup %393 }
 0x117   :  { %370 = vmatmul.mubr.msk.f32.vlgmr.msra.gmra.mrb[0].mxu1 %vm237_vm1, %v394_v40 }
 0x1ea   :  { %v307_v42 = vpop.f32.mrb[0].mxu1 }
 0x1eb   :  { %v308_v43 = vadd.f32 %v341_v41, %v307_v42  ;;  %v371_v44 = vpop.f32.mrb[1].mxu1 }
 0x1ed   :  { %v311_v45 = vsub.f32 0.0, %v308_v43 }
 0x1ef   :  { %v312_v46 = vmul.f32 1.442695, %v311_v45 }
 0x1f1   :  { %395 = vpow2.f32 %v312_v46 }
 0x1fb   :  { %v396_v47 = vpop.eup %395 }
 0x1fc   :  { %v314_v48 = vadd.f32 1.0, %v396_v47 }
 0x1fe   :  { %397 = vrcp.f32 %v314_v48 }
 0x208   :  { %v398_v49 = vpop.eup %397 }
 0x209   :  { %318 = vst.msk [vmem:[%s500_s5] sm:$0x3] %vm317_vm2, %v398_v49 }

</bundles_post_ra>
